<compile_context>
chip_gen: v6e
topology: v6e:2x2x1
jax: 0.10.0
libtpu: 0.0.40
codegen_flags: <defaults>
</compile_context>

<pallas_src>
import functools

import jax
import jax.numpy as jnp
from jax.experimental import pallas as pl
from jax.experimental.pallas import tpu as pltpu

EPS = 1e-12  # config.layer_norm_eps


def _vmem_limit_bytes():
    """~75% of physical VMEM (48 MiB on v7x, 96 MiB on v5e/v6e)."""
    try:
        cap = getattr(pltpu.get_tpu_info(), "vmem_capacity_bytes", None)
        if cap:
            return int(cap * 3 // 4)
    except Exception:
        pass
    return 48 * 1024 * 1024


def _spec(shape, index_map, *, single_buffer=False):
    """BlockSpec helper; single_buffer=True requests Buffered(1) pipelining."""
    if single_buffer and hasattr(pl, "Buffered"):
        try:
            return pl.BlockSpec(shape, index_map, pipeline_mode=pl.Buffered(1))
        except TypeError:  # jax without the pipeline_mode kwarg
            pass
    return pl.BlockSpec(shape, index_map)


def _pick_kv_tile(S):
    """Bound the [nh, S, TKV] score tile; dense fallback for small/odd S."""
    for t in (512, 256, 128):
        if S > t and S % t == 0:
            return t
    return S


# ---------------------------------------------------------------------------
# Fused kernel: one batch element per grid step. Attention-expert weights are
# selected via the scalar-prefetched expert indices feeding the BlockSpec
# index_maps (P2). FFN / router / LN weights use constant block indices and
# stay resident in a single VMEM buffer.
# ---------------------------------------------------------------------------
def momo_fused_kernel(eidx_ref, x_ref, mask_ref,
                      wq_ref, wk_ref, wv_ref, wo_ref, avec_ref,
                      wr_ref, br_ref, w1_ref, b1_ref, w2_ref, b2_ref, fln_ref,
                      o_ref, *, num_heads, n_ffn_experts, kv_tile):
    del eidx_ref                                   # consumed by the index_maps
    x = x_ref[0]                                   # [S, H] f32
    S, H = x.shape
    hd = H // num_heads
    x_bf = x.astype(jnp.bfloat16)

    add_mask = (mask_ref[0] - 1.0) * 1e9           # [1, S] additive key mask

    avec = avec_ref[0]                             # [6, H] packed per-expert vecs
    bq, bk, bv, bo = avec[0:1], avec[1:2], avec[2:3], avec[3:4]
    aln_g, aln_b = avec[4:5], avec[5:6]
    fln = fln_ref[...]                             # [2, H]
    fln_g, fln_b = fln[0:1], fln[1:2]

    # ---- attention expert: projections (bf16 MXU inputs, f32 accumulation) ----
    q = jnp.dot(x_bf, wq_ref[0], preferred_element_type=jnp.float32) + bq
    k = jnp.dot(x_bf, wk_ref[0], preferred_element_type=jnp.float32) + bk
    v = jnp.dot(x_bf, wv_ref[0], preferred_element_type=jnp.float32) + bv
    q = q * (1.0 / (hd ** 0.5))                    # fold 1/sqrt(hd) into q

    # head-major [nh, S, hd]: one explicit transpose instead of relayouts
    # around both batched matmuls.
    qh = jnp.transpose(q.astype(jnp.bfloat16).reshape(S, num_heads, hd), (1, 0, 2))
    kh = jnp.transpose(k.astype(jnp.bfloat16).reshape(S, num_heads, hd), (1, 0, 2))
    vh = jnp.transpose(v.astype(jnp.bfloat16).reshape(S, num_heads, hd), (1, 0, 2))

    # ---- KV-tiled online softmax (flash-style): score tiles stay
    # [nh, S, kv_tile] so VMEM is bounded for long sequences. ----
    n_kv = S // kv_tile
    m_i = jnp.full((num_heads, S, 1), -jnp.inf, jnp.float32)
    l_i = jnp.zeros((num_heads, S, 1), jnp.float32)
    acc = jnp.zeros((num_heads, S, hd), jnp.float32)
    for t in range(n_kv):                          # static unroll
        lo, hi = t * kv_tile, (t + 1) * kv_tile
        k_t = kh[:, lo:hi, :]
        v_t = vh[:, lo:hi, :]
        s_t = jnp.einsum('nqd,nkd->nqk', qh, k_t,
                         preferred_element_type=jnp.float32)
        s_t = s_t + add_mask[None, :, lo:hi]
        m_new = jnp.maximum(m_i, jnp.max(s_t, axis=-1, keepdims=True))
        alpha = jnp.exp(m_i - m_new)
        p_t = jnp.exp(s_t - m_new)
        l_i = alpha * l_i + jnp.sum(p_t, axis=-1, keepdims=True)
        acc = alpha * acc + jnp.einsum('nqk,nkd->nqd', p_t.astype(jnp.bfloat16),
                                       v_t, preferred_element_type=jnp.float32)
        m_i = m_new
    ctx = acc * pl.reciprocal(l_i, approx=True)    # softmax denom on the EUP slot
    ctx = jnp.transpose(ctx, (1, 0, 2)).reshape(S, H)

    attn_out = jnp.dot(ctx.astype(jnp.bfloat16), wo_ref[0],
                       preferred_element_type=jnp.float32) + bo
    # BERT SelfOutput: dropout (identity in eval) + LayerNorm(residual)
    y = attn_out + x
    mu = jnp.mean(y, axis=-1, keepdims=True)
    var = jnp.mean((y - mu) ** 2, axis=-1, keepdims=True)
    att = (y - mu) * jax.lax.rsqrt(var + EPS) * aln_g + aln_b       # [S, H] f32

    # ---- SwitchFeedForward: top-1 router over 2 experts ----
    # TODO(synk): both FFN experts are still evaluated densely for every token
    # (doubles the dominant FFN matmul + GELU cost); restructure as per-expert
    # token gathering (group-GEMM) with scalar-prefetched counts/offsets.
    att_bf = att.astype(jnp.bfloat16)
    logits = jnp.dot(att_bf, wr_ref[...],
                     preferred_element_type=jnp.float32) + br_ref[...]  # [S, 2]
    lm = jnp.max(logits, axis=-1, keepdims=True)
    le = jnp.exp(logits - lm)
    rprobs = le / jnp.sum(le, axis=-1, keepdims=True)   # exact; tiny tensor
    p0, p1 = rprobs[:, 0:1], rprobs[:, 1:2]
    is_e0 = p0 >= p1                       # torch top-1 tie-break: first index
    route_scale = jnp.where(is_e0, p0, p1)

    ys = []
    for ei in range(n_ffn_experts):
        h1 = jnp.dot(att_bf, w1_ref[ei],
                     preferred_element_type=jnp.float32) + b1_ref[ei]
        # TODO(synk): torch.nn.GELU default is exact erf; tanh approximation
        # kept here for a guaranteed EUP lowering.
        h1 = jax.nn.gelu(h1)
        ys.append(jnp.dot(h1.astype(jnp.bfloat16), w2_ref[ei],
                          preferred_element_type=jnp.float32) + b2_ref[ei])
    ffn = jnp.where(is_e0, ys[0], ys[1]) * route_scale
    # hidden dropout (eval) is identity

    # ---- final residual LayerNorm of MoMoShareLayer ----
    z = att + ffn
    mu2 = jnp.mean(z, axis=-1, keepdims=True)
    var2 = jnp.mean((z - mu2) ** 2, axis=-1, keepdims=True)
    o_ref[0] = ((z - mu2) * jax.lax.rsqrt(var2 + EPS) * fln_g + fln_b
                ).astype(o_ref.dtype)


def momo_fused_call(hidden, mask, expert_idx, p, *, num_heads, n_ffn_experts):
    B, S, H = hidden.shape
    F = p["w1"].shape[-1]
    mask3 = mask.reshape(B, 1, S).astype(jnp.float32)
    kv_tile = _pick_kv_tile(S)

    kernel = functools.partial(momo_fused_kernel,
                               num_heads=num_heads,
                               n_ffn_experts=n_ffn_experts,
                               kv_tile=kv_tile)

    # Advisory cost estimate (both FFN experts computed densely).
    flops = int(B * (8 * S * H * H + 4 * S * S * H
                     + n_ffn_experts * 4 * S * H * F
                     + 2 * S * H * n_ffn_experts))
    transcendentals = int(B * (num_heads * S * S + n_ffn_experts * S * F))
    bytes_accessed = int(2 * B * S * H * 4 + B * S * 4
                         + 2 * 4 * H * H * 2 + 2 * 6 * H * 4
                         + n_ffn_experts * 2 * H * F * 2)

    def build(single_buffer):
        # per-batch-element activations / output: default double buffering
        x_spec = pl.BlockSpec((1, S, H), lambda b, eidx: (b, 0, 0))
        m_spec = pl.BlockSpec((1, 1, S), lambda b, eidx: (b, 0, 0))
        out_spec = pl.BlockSpec((1, S, H), lambda b, eidx: (b, 0, 0))
        # attention-expert weights: block index follows prefetched expert id;
        # the batch is expert-sorted so it changes at most once -> 1 buffer.
        w_spec = _spec((1, H, H), lambda b, eidx: (eidx[b], 0, 0),
                       single_buffer=single_buffer)
        avec_spec = _spec((1, 6, H), lambda b, eidx: (eidx[b], 0, 0),
                          single_buffer=single_buffer)
        # FFN / router / final-LN weights: constant index -> resident, 1 buffer.
        wr_spec = _spec((H, n_ffn_experts), lambda b, eidx: (0, 0),
                        single_buffer=single_buffer)
        br_spec = _spec((1, n_ffn_experts), lambda b, eidx: (0, 0),
                        single_buffer=single_buffer)
        w1_spec = _spec((n_ffn_experts, H, F), lambda b, eidx: (0, 0, 0),
                        single_buffer=single_buffer)
        b1_spec = _spec((n_ffn_experts, 1, F), lambda b, eidx: (0, 0, 0),
                        single_buffer=single_buffer)
        w2_spec = _spec((n_ffn_experts, F, H), lambda b, eidx: (0, 0, 0),
                        single_buffer=single_buffer)
        b2_spec = _spec((n_ffn_experts, 1, H), lambda b, eidx: (0, 0, 0),
                        single_buffer=single_buffer)
        fln_spec = _spec((2, H), lambda b, eidx: (0, 0),
                         single_buffer=single_buffer)

        return pl.pallas_call(
            kernel,
            out_shape=jax.ShapeDtypeStruct((B, S, H), jnp.float32),
            grid_spec=pltpu.PrefetchScalarGridSpec(
                num_scalar_prefetch=1,
                grid=(B,),
                in_specs=[x_spec, m_spec,
                          w_spec, w_spec, w_spec, w_spec, avec_spec,
                          wr_spec, br_spec, w1_spec, b1_spec, w2_spec, b2_spec,
                          fln_spec],
                out_specs=out_spec,
            ),
            compiler_params=pltpu.CompilerParams(
                dimension_semantics=("parallel",),   # batch elems independent
                vmem_limit_bytes=_vmem_limit_bytes(),
            ),
            cost_estimate=pl.CostEstimate(flops=flops,
                                          transcendentals=transcendentals,
                                          bytes_accessed=bytes_accessed),
        )

    operands = (expert_idx, hidden, mask3,
                p["wq"], p["wk"], p["wv"], p["wo"], p["attn_vecs"],
                p["wr"], p["br"], p["w1"], p["b1"], p["w2"], p["b2"],
                p["final_ln"])
    try:
        return build(True)(*operands)
    except Exception:
        # Buffered(1) unavailable/rejected -> fall back to default buffering.
        return build(False)(*operands)


# ---------------------------------------------------------------------------
# Routing glue (tiny: mean over seq + nearest-of-2-centers). Plain JAX;
# argmin of squared distance == argmin of cdist.
# ---------------------------------------------------------------------------
def route_to_experts(routing_states, centers):
    h = jnp.mean(routing_states, axis=1)                               # [B, H]
    d2 = jnp.sum((h[:, None, :] - centers[None, :, :]) ** 2, axis=-1)  # [B, E]
    return jnp.argmin(d2, axis=-1).astype(jnp.int32)


def momo_share_layer(hidden_states, attention_mask, routing_states, params,
                     *, num_heads, n_ffn_experts):
    assert n_ffn_experts == 2, "top-1 select in kernel assumes 2 FFN experts"
    expert_idx = route_to_experts(routing_states, params["centers"])
    # Sort batch by expert id so consecutive grid steps reuse the same
    # attention-expert weight block (Pallas skips the DMA when the block
    # index is unchanged between steps; with Buffered(1) only one stall at
    # the single expert boundary).
    order = jnp.argsort(expert_idx)
    inv_order = jnp.argsort(order)
    h_s = jnp.take(hidden_states, order, axis=0)
    m_s = jnp.take(attention_mask, order, axis=0)
    e_s = jnp.take(expert_idx, order, axis=0)
    out_s = momo_fused_call(h_s, m_s, e_s, params,
                            num_heads=num_heads, n_ffn_experts=n_ffn_experts)
    return jnp.take(out_s, inv_order, axis=0)


# ---------------------------------------------------------------------------
# Deterministic parameter construction (weights bf16 for the MXU; biases /
# LN params / centers f32, packed for few DMA descriptors) + demo run.
# ---------------------------------------------------------------------------
def make_params(key, H, F, n_attn_experts=2, n_ffn_experts=2):
    ks = jax.random.split(key, 16)
    s = 0.02
    bf = jnp.bfloat16

    def vec(k):
        return s * jax.random.normal(k, (n_attn_experts, 1, H), jnp.float32)

    bq, bk, bv, bo = vec(ks[2]), vec(ks[4]), vec(ks[6]), vec(ks[8])
    aln_g = jnp.ones((n_attn_experts, 1, H), jnp.float32)
    aln_b = jnp.zeros((n_attn_experts, 1, H), jnp.float32)
    # packed rows: [bq, bk, bv, bo, attn_ln_gamma, attn_ln_beta]
    attn_vecs = jnp.concatenate([bq, bk, bv, bo, aln_g, aln_b], axis=1)

    final_ln = jnp.concatenate([jnp.ones((1, H), jnp.float32),
                                jnp.zeros((1, H), jnp.float32)], axis=0)

    return {
        "centers": jax.random.normal(ks[0], (n_attn_experts, H), jnp.float32),
        # stacked attention-expert weights: leading axis = expert
        "wq": (s * jax.random.normal(ks[1], (n_attn_experts, H, H))).astype(bf),
        "wk": (s * jax.random.normal(ks[3], (n_attn_experts, H, H))).astype(bf),
        "wv": (s * jax.random.normal(ks[5], (n_attn_experts, H, H))).astype(bf),
        "wo": (s * jax.random.normal(ks[7], (n_attn_experts, H, H))).astype(bf),
        "attn_vecs": attn_vecs,                      # [E, 6, H] f32
        # SwitchFeedForward
        "wr": (s * jax.random.normal(ks[9], (H, n_ffn_experts))).astype(bf),
        "br": jnp.zeros((1, n_ffn_experts), jnp.float32),
        "w1": (s * jax.random.normal(ks[10], (n_ffn_experts, H, F))).astype(bf),
        "b1": jnp.zeros((n_ffn_experts, 1, F), jnp.float32),
        "w2": (s * jax.random.normal(ks[11], (n_ffn_experts, F, H))).astype(bf),
        "b2": jnp.zeros((n_ffn_experts, 1, H), jnp.float32),
        # final LayerNorm of MoMoShareLayer (rows: gamma, beta)
        "final_ln": final_ln,
    }


if __name__ == "__main__":
    B, S, H, NH, F = 2, 8, 32, 2, 64

    key = jax.random.PRNGKey(0)
    k_param, k_hid, k_rout = jax.random.split(key, 3)

    params = make_params(k_param, H, F)

    hidden_states = jax.random.normal(k_hid, (B, S, H), jnp.float32)
    routing_states = jax.random.normal(k_rout, (B, S, H), jnp.float32)
    attention_mask = jnp.ones((B, S), jnp.float32).at[1, S - 2:].set(0.0)

    out = momo_share_layer(hidden_states, attention_mask, routing_states,
                           params, num_heads=NH, n_ffn_experts=2)
    out = jax.block_until_ready(out)
    assert out.shape == (B, S, H) and jnp.all(jnp.isfinite(out))
    print("KERNEL_OK")
</pallas_src>

<mosaic_0001>
module attributes {stable_mosaic.version = 11 : i64} {
  func.func @momo_fused_kernel(%arg0: i32, %arg1: memref<2xi32, #tpu.memory_space<smem>>, %arg2: memref<1x8x32xf32, #tpu.memory_space<vmem>>, %arg3: memref<1x1x8xf32, #tpu.memory_space<vmem>>, %arg4: memref<1x32x32xbf16, #tpu.memory_space<vmem>>, %arg5: memref<1x32x32xbf16, #tpu.memory_space<vmem>>, %arg6: memref<1x32x32xbf16, #tpu.memory_space<vmem>>, %arg7: memref<1x32x32xbf16, #tpu.memory_space<vmem>>, %arg8: memref<1x6x32xf32, #tpu.memory_space<vmem>>, %arg9: memref<32x2xbf16, #tpu.memory_space<vmem>>, %arg10: memref<1x2xf32, #tpu.memory_space<vmem>>, %arg11: memref<2x32x64xbf16, #tpu.memory_space<vmem>>, %arg12: memref<2x1x64xf32, #tpu.memory_space<vmem>>, %arg13: memref<2x64x32xbf16, #tpu.memory_space<vmem>>, %arg14: memref<2x1x32xf32, #tpu.memory_space<vmem>>, %arg15: memref<2x32xf32, #tpu.memory_space<vmem>>, %arg16: memref<1x8x32xf32, #tpu.memory_space<vmem>>) attributes {dimension_semantics = [#tpu.dimension_semantics<parallel>], iteration_bounds = array<i64: 2>, scalar_prefetch = 1 : i64, scratch_operands = 0 : i64, tpu.core_type = #tpu.core_type<tc>, window_params = [{transform_indices = @transform_0, window_bounds = array<i64: 1, 8, 32>}, {transform_indices = @transform_1, window_bounds = array<i64: 1, 1, 8>}, {pipeline_mode = #tpu.pipeline_mode<synchronous>, transform_indices = @transform_2, window_bounds = array<i64: 1, 32, 32>}, {pipeline_mode = #tpu.pipeline_mode<synchronous>, transform_indices = @transform_3, window_bounds = array<i64: 1, 32, 32>}, {pipeline_mode = #tpu.pipeline_mode<synchronous>, transform_indices = @transform_4, window_bounds = array<i64: 1, 32, 32>}, {pipeline_mode = #tpu.pipeline_mode<synchronous>, transform_indices = @transform_5, window_bounds = array<i64: 1, 32, 32>}, {pipeline_mode = #tpu.pipeline_mode<synchronous>, transform_indices = @transform_6, window_bounds = array<i64: 1, 6, 32>}, {pipeline_mode = #tpu.pipeline_mode<synchronous>, transform_indices = @transform_7, window_bounds = array<i64: 32, 2>}, {pipeline_mode = #tpu.pipeline_mode<synchronous>, transform_indices = @transform_8, window_bounds = array<i64: 1, 2>}, {pipeline_mode = #tpu.pipeline_mode<synchronous>, transform_indices = @transform_9, window_bounds = array<i64: 2, 32, 64>}, {pipeline_mode = #tpu.pipeline_mode<synchronous>, transform_indices = @transform_10, window_bounds = array<i64: 2, 1, 64>}, {pipeline_mode = #tpu.pipeline_mode<synchronous>, transform_indices = @transform_11, window_bounds = array<i64: 2, 64, 32>}, {pipeline_mode = #tpu.pipeline_mode<synchronous>, transform_indices = @transform_12, window_bounds = array<i64: 2, 1, 32>}, {pipeline_mode = #tpu.pipeline_mode<synchronous>, transform_indices = @transform_13, window_bounds = array<i64: 2, 32>}, {transform_indices = @transform_14, window_bounds = array<i64: 1, 8, 32>}]} {
    %c0 = arith.constant 0 : index
    %c0_0 = arith.constant 0 : index
    %c0_1 = arith.constant 0 : index
    %0 = vector.load %arg2[%c0, %c0_0, %c0_1] : memref<1x8x32xf32, #tpu.memory_space<vmem>>, vector<1x8x32xf32>
    %1 = vector.shape_cast %0 : vector<1x8x32xf32> to vector<8x32xf32>
    %2 = arith.truncf %1 : vector<8x32xf32> to vector<8x32xbf16>
    %c0_2 = arith.constant 0 : index
    %c0_3 = arith.constant 0 : index
    %c0_4 = arith.constant 0 : index
    %3 = vector.load %arg3[%c0_2, %c0_3, %c0_4] : memref<1x1x8xf32, #tpu.memory_space<vmem>>, vector<1x1x8xf32>
    %4 = vector.shape_cast %3 : vector<1x1x8xf32> to vector<1x8xf32>
    %cst = arith.constant 1.000000e+00 : f32
    %5 = vector.broadcast %cst : f32 to vector<1x8xf32>
    %6 = arith.subf %4, %5 : vector<1x8xf32>
    %cst_5 = arith.constant 1.000000e+09 : f32
    %7 = vector.broadcast %cst_5 : f32 to vector<1x8xf32>
    %8 = arith.mulf %6, %7 : vector<1x8xf32>
    %c0_6 = arith.constant 0 : index
    %c0_7 = arith.constant 0 : index
    %c0_8 = arith.constant 0 : index
    %9 = vector.load %arg8[%c0_6, %c0_7, %c0_8] : memref<1x6x32xf32, #tpu.memory_space<vmem>>, vector<1x6x32xf32>
    %10 = vector.shape_cast %9 : vector<1x6x32xf32> to vector<6x32xf32>
    %11 = vector.extract_strided_slice %10 {offsets = [0, 0], sizes = [1, 32], strides = [1, 1]} : vector<6x32xf32> to vector<1x32xf32>
    %12 = vector.extract_strided_slice %10 {offsets = [1, 0], sizes = [1, 32], strides = [1, 1]} : vector<6x32xf32> to vector<1x32xf32>
    %13 = vector.extract_strided_slice %10 {offsets = [2, 0], sizes = [1, 32], strides = [1, 1]} : vector<6x32xf32> to vector<1x32xf32>
    %14 = vector.extract_strided_slice %10 {offsets = [3, 0], sizes = [1, 32], strides = [1, 1]} : vector<6x32xf32> to vector<1x32xf32>
    %15 = vector.extract_strided_slice %10 {offsets = [4, 0], sizes = [1, 32], strides = [1, 1]} : vector<6x32xf32> to vector<1x32xf32>
    %16 = vector.extract_strided_slice %10 {offsets = [5, 0], sizes = [1, 32], strides = [1, 1]} : vector<6x32xf32> to vector<1x32xf32>
    %c0_9 = arith.constant 0 : index
    %c0_10 = arith.constant 0 : index
    %17 = vector.load %arg15[%c0_9, %c0_10] : memref<2x32xf32, #tpu.memory_space<vmem>>, vector<2x32xf32>
    %18 = vector.extract_strided_slice %17 {offsets = [0, 0], sizes = [1, 32], strides = [1, 1]} : vector<2x32xf32> to vector<1x32xf32>
    %19 = vector.extract_strided_slice %17 {offsets = [1, 0], sizes = [1, 32], strides = [1, 1]} : vector<2x32xf32> to vector<1x32xf32>
    %c0_11 = arith.constant 0 : index
    %c0_12 = arith.constant 0 : index
    %c0_13 = arith.constant 0 : index
    %20 = vector.load %arg4[%c0_11, %c0_12, %c0_13] : memref<1x32x32xbf16, #tpu.memory_space<vmem>>, vector<1x32x32xbf16>
    %21 = vector.shape_cast %20 : vector<1x32x32xbf16> to vector<32x32xbf16>
    %cst_14 = arith.constant dense<0.000000e+00> : vector<8x32xf32>
    %22 = tpu.matmul %2, %21, %cst_14 {dimension_numbers = #tpu.dot_dimension_numbers<[1], [0], [0], [1], [0, 0, 1, 1], [], []>} : vector<8x32xbf16>, vector<32x32xbf16>, vector<8x32xf32> -> vector<8x32xf32>
    %23 = vector.broadcast %11 : vector<1x32xf32> to vector<8x32xf32>
    %24 = arith.addf %22, %23 : vector<8x32xf32>
    %c0_15 = arith.constant 0 : index
    %c0_16 = arith.constant 0 : index
    %c0_17 = arith.constant 0 : index
    %25 = vector.load %arg5[%c0_15, %c0_16, %c0_17] : memref<1x32x32xbf16, #tpu.memory_space<vmem>>, vector<1x32x32xbf16>
    %26 = vector.shape_cast %25 : vector<1x32x32xbf16> to vector<32x32xbf16>
    %cst_18 = arith.constant dense<0.000000e+00> : vector<8x32xf32>
    %27 = tpu.matmul %2, %26, %cst_18 {dimension_numbers = #tpu.dot_dimension_numbers<[1], [0], [0], [1], [0, 0, 1, 1], [], []>} : vector<8x32xbf16>, vector<32x32xbf16>, vector<8x32xf32> -> vector<8x32xf32>
    %28 = vector.broadcast %12 : vector<1x32xf32> to vector<8x32xf32>
    %29 = arith.addf %27, %28 : vector<8x32xf32>
    %c0_19 = arith.constant 0 : index
    %c0_20 = arith.constant 0 : index
    %c0_21 = arith.constant 0 : index
    %30 = vector.load %arg6[%c0_19, %c0_20, %c0_21] : memref<1x32x32xbf16, #tpu.memory_space<vmem>>, vector<1x32x32xbf16>
    %31 = vector.shape_cast %30 : vector<1x32x32xbf16> to vector<32x32xbf16>
    %cst_22 = arith.constant dense<0.000000e+00> : vector<8x32xf32>
    %32 = tpu.matmul %2, %31, %cst_22 {dimension_numbers = #tpu.dot_dimension_numbers<[1], [0], [0], [1], [0, 0, 1, 1], [], []>} : vector<8x32xbf16>, vector<32x32xbf16>, vector<8x32xf32> -> vector<8x32xf32>
    %33 = vector.broadcast %13 : vector<1x32xf32> to vector<8x32xf32>
    %34 = arith.addf %32, %33 : vector<8x32xf32>
    %cst_23 = arith.constant 2.500000e-01 : f32
    %35 = vector.broadcast %cst_23 : f32 to vector<8x32xf32>
    %36 = arith.mulf %24, %35 : vector<8x32xf32>
    %37 = arith.truncf %36 : vector<8x32xf32> to vector<8x32xbf16>
    %38 = vector.shape_cast %37 : vector<8x32xbf16> to vector<8x2x16xbf16>
    %39 = tpu.transpose %38, [1, 0, 2] : vector<8x2x16xbf16> -> vector<2x8x16xbf16>
    %40 = arith.truncf %29 : vector<8x32xf32> to vector<8x32xbf16>
    %41 = vector.shape_cast %40 : vector<8x32xbf16> to vector<8x2x16xbf16>
    %42 = tpu.transpose %41, [1, 0, 2] : vector<8x2x16xbf16> -> vector<2x8x16xbf16>
    %43 = arith.truncf %34 : vector<8x32xf32> to vector<8x32xbf16>
    %44 = vector.shape_cast %43 : vector<8x32xbf16> to vector<8x2x16xbf16>
    %45 = tpu.transpose %44, [1, 0, 2] : vector<8x2x16xbf16> -> vector<2x8x16xbf16>
    %cst_24 = arith.constant 0xFF800000 : f32
    %46 = vector.broadcast %cst_24 : f32 to vector<2x8x1xf32>
    %cst_25 = arith.constant 0.000000e+00 : f32
    %47 = vector.broadcast %cst_25 : f32 to vector<2x8x1xf32>
    %cst_26 = arith.constant 0.000000e+00 : f32
    %48 = vector.broadcast %cst_26 : f32 to vector<2x8x16xf32>
    "tpu.trace_start"() <{level = 10 : i32, message = "nqd,nkd->nqk"}> : () -> ()
    %cst_27 = arith.constant dense<0.000000e+00> : vector<2x8x8xf32>
    %49 = tpu.matmul %39, %42, %cst_27 {dimension_numbers = #tpu.dot_dimension_numbers<[2], [2], [1], [1], [0, 0, 0, 1, 1, 1], [0], [0]>} : vector<2x8x16xbf16>, vector<2x8x16xbf16>, vector<2x8x8xf32> -> vector<2x8x8xf32>
    "tpu.trace_stop"() : () -> ()
    %50 = vector.shape_cast %8 : vector<1x8xf32> to vector<1x1x8xf32>
    %51 = vector.broadcast %50 : vector<1x1x8xf32> to vector<2x8x8xf32>
    %52 = arith.addf %49, %51 : vector<2x8x8xf32>
    %cst_28 = arith.constant dense<0xFF800000> : vector<2x8xf32>
    %53 = vector.multi_reduction <maximumf>, %52, %cst_28 [2] : vector<2x8x8xf32> to vector<2x8xf32>
    %54 = vector.shape_cast %53 : vector<2x8xf32> to vector<2x8x1xf32>
    %55 = arith.maximumf %46, %54 : vector<2x8x1xf32>
    %56 = arith.subf %46, %55 : vector<2x8x1xf32>
    %57 = math.exp %56 : vector<2x8x1xf32>
    %58 = vector.broadcast %55 : vector<2x8x1xf32> to vector<2x8x8xf32>
    %59 = arith.subf %52, %58 : vector<2x8x8xf32>
    %60 = math.exp %59 : vector<2x8x8xf32>
    %61 = arith.mulf %57, %47 : vector<2x8x1xf32>
    %cst_29 = arith.constant dense<0.000000e+00> : vector<2x8xf32>
    %62 = vector.multi_reduction <add>, %60, %cst_29 [2] : vector<2x8x8xf32> to vector<2x8xf32>
    %63 = vector.shape_cast %62 : vector<2x8xf32> to vector<2x8x1xf32>
    %64 = arith.addf %61, %63 : vector<2x8x1xf32>
    %65 = vector.broadcast %57 : vector<2x8x1xf32> to vector<2x8x16xf32>
    %66 = arith.mulf %65, %48 : vector<2x8x16xf32>
    %67 = arith.truncf %60 : vector<2x8x8xf32> to vector<2x8x8xbf16>
    "tpu.trace_start"() <{level = 10 : i32, message = "nqk,nkd->nqd"}> : () -> ()
    %cst_30 = arith.constant dense<0.000000e+00> : vector<2x8x16xf32>
    %68 = tpu.matmul %67, %45, %cst_30 {dimension_numbers = #tpu.dot_dimension_numbers<[2], [1], [1], [2], [0, 0, 0, 1, 1, 2], [0], [0]>} : vector<2x8x8xbf16>, vector<2x8x16xbf16>, vector<2x8x16xf32> -> vector<2x8x16xf32>
    "tpu.trace_stop"() : () -> ()
    %69 = arith.addf %66, %68 : vector<2x8x16xf32>
    %70 = tpu.reciprocal %64 {approx = true} : vector<2x8x1xf32> -> vector<2x8x1xf32>
    %71 = vector.broadcast %70 : vector<2x8x1xf32> to vector<2x8x16xf32>
    %72 = arith.mulf %69, %71 : vector<2x8x16xf32>
    %73 = tpu.transpose %72, [1, 0, 2] : vector<2x8x16xf32> -> vector<8x2x16xf32>
    %74 = vector.shape_cast %73 : vector<8x2x16xf32> to vector<8x32xf32>
    %75 = arith.truncf %74 : vector<8x32xf32> to vector<8x32xbf16>
    %c0_31 = arith.constant 0 : index
    %c0_32 = arith.constant 0 : index
    %c0_33 = arith.constant 0 : index
    %76 = vector.load %arg7[%c0_31, %c0_32, %c0_33] : memref<1x32x32xbf16, #tpu.memory_space<vmem>>, vector<1x32x32xbf16>
    %77 = vector.shape_cast %76 : vector<1x32x32xbf16> to vector<32x32xbf16>
    %cst_34 = arith.constant dense<0.000000e+00> : vector<8x32xf32>
    %78 = tpu.matmul %75, %77, %cst_34 {dimension_numbers = #tpu.dot_dimension_numbers<[1], [0], [0], [1], [0, 0, 1, 1], [], []>} : vector<8x32xbf16>, vector<32x32xbf16>, vector<8x32xf32> -> vector<8x32xf32>
    %79 = vector.broadcast %14 : vector<1x32xf32> to vector<8x32xf32>
    %80 = arith.addf %78, %79 : vector<8x32xf32>
    %81 = arith.addf %80, %1 : vector<8x32xf32>
    %cst_35 = arith.constant dense<0.000000e+00> : vector<8xf32>
    %82 = vector.multi_reduction <add>, %81, %cst_35 [1] : vector<8x32xf32> to vector<8xf32>
    %83 = vector.shape_cast %82 : vector<8xf32> to vector<8x1xf32>
    %cst_36 = arith.constant 3.200000e+01 : f32
    %84 = vector.broadcast %cst_36 : f32 to vector<8x1xf32>
    %85 = arith.divf %83, %84 : vector<8x1xf32>
    %86 = vector.broadcast %85 : vector<8x1xf32> to vector<8x32xf32>
    %87 = arith.subf %81, %86 : vector<8x32xf32>
    %88 = arith.mulf %87, %87 : vector<8x32xf32>
    %cst_37 = arith.constant dense<0.000000e+00> : vector<8xf32>
    %89 = vector.multi_reduction <add>, %88, %cst_37 [1] : vector<8x32xf32> to vector<8xf32>
    %90 = vector.shape_cast %89 : vector<8xf32> to vector<8x1xf32>
    %cst_38 = arith.constant 3.200000e+01 : f32
    %91 = vector.broadcast %cst_38 : f32 to vector<8x1xf32>
    %92 = arith.divf %90, %91 : vector<8x1xf32>
    %93 = vector.broadcast %85 : vector<8x1xf32> to vector<8x32xf32>
    %94 = arith.subf %81, %93 : vector<8x32xf32>
    %cst_39 = arith.constant 9.99999996E-13 : f32
    %95 = vector.broadcast %cst_39 : f32 to vector<8x1xf32>
    %96 = arith.addf %92, %95 : vector<8x1xf32>
    %97 = math.rsqrt %96 : vector<8x1xf32>
    %98 = vector.broadcast %97 : vector<8x1xf32> to vector<8x32xf32>
    %99 = arith.mulf %94, %98 : vector<8x32xf32>
    %100 = vector.broadcast %15 : vector<1x32xf32> to vector<8x32xf32>
    %101 = arith.mulf %99, %100 : vector<8x32xf32>
    %102 = vector.broadcast %16 : vector<1x32xf32> to vector<8x32xf32>
    %103 = arith.addf %101, %102 : vector<8x32xf32>
    %104 = arith.truncf %103 : vector<8x32xf32> to vector<8x32xbf16>
    %c0_40 = arith.constant 0 : index
    %c0_41 = arith.constant 0 : index
    %105 = vector.load %arg9[%c0_40, %c0_41] : memref<32x2xbf16, #tpu.memory_space<vmem>>, vector<32x2xbf16>
    %cst_42 = arith.constant dense<0.000000e+00> : vector<8x2xf32>
    %106 = tpu.matmul %104, %105, %cst_42 {dimension_numbers = #tpu.dot_dimension_numbers<[1], [0], [0], [1], [0, 0, 1, 1], [], []>} : vector<8x32xbf16>, vector<32x2xbf16>, vector<8x2xf32> -> vector<8x2xf32>
    %c0_43 = arith.constant 0 : index
    %c0_44 = arith.constant 0 : index
    %107 = vector.load %arg10[%c0_43, %c0_44] : memref<1x2xf32, #tpu.memory_space<vmem>>, vector<1x2xf32>
    %108 = vector.broadcast %107 : vector<1x2xf32> to vector<8x2xf32>
    %109 = arith.addf %106, %108 : vector<8x2xf32>
    %cst_45 = arith.constant dense<0xFF800000> : vector<8xf32>
    %110 = vector.multi_reduction <maximumf>, %109, %cst_45 [1] : vector<8x2xf32> to vector<8xf32>
    %111 = vector.shape_cast %110 : vector<8xf32> to vector<8x1xf32>
    %112 = vector.broadcast %111 : vector<8x1xf32> to vector<8x2xf32>
    %113 = arith.subf %109, %112 : vector<8x2xf32>
    %114 = math.exp %113 : vector<8x2xf32>
    %cst_46 = arith.constant dense<0.000000e+00> : vector<8xf32>
    %115 = vector.multi_reduction <add>, %114, %cst_46 [1] : vector<8x2xf32> to vector<8xf32>
    %116 = vector.shape_cast %115 : vector<8xf32> to vector<8x1xf32>
    %117 = vector.broadcast %116 : vector<8x1xf32> to vector<8x2xf32>
    %118 = arith.divf %114, %117 : vector<8x2xf32>
    %119 = vector.extract_strided_slice %118 {offsets = [0, 0], sizes = [8, 1], strides = [1, 1]} : vector<8x2xf32> to vector<8x1xf32>
    %120 = vector.extract_strided_slice %118 {offsets = [0, 1], sizes = [8, 1], strides = [1, 1]} : vector<8x2xf32> to vector<8x1xf32>
    %121 = arith.cmpf oge, %119, %120 : vector<8x1xf32>
    %122 = arith.select %121, %119, %120 : vector<8x1xi1>, vector<8x1xf32>
    %c0_47 = arith.constant 0 : index
    %c0_48 = arith.constant 0 : index
    %c0_49 = arith.constant 0 : index
    %123 = vector.load %arg11[%c0_47, %c0_48, %c0_49] : memref<2x32x64xbf16, #tpu.memory_space<vmem>>, vector<1x32x64xbf16>
    %124 = vector.shape_cast %123 : vector<1x32x64xbf16> to vector<32x64xbf16>
    %cst_50 = arith.constant dense<0.000000e+00> : vector<8x64xf32>
    %125 = tpu.matmul %104, %124, %cst_50 {dimension_numbers = #tpu.dot_dimension_numbers<[1], [0], [0], [1], [0, 0, 1, 1], [], []>} : vector<8x32xbf16>, vector<32x64xbf16>, vector<8x64xf32> -> vector<8x64xf32>
    %c0_51 = arith.constant 0 : index
    %c0_52 = arith.constant 0 : index
    %c0_53 = arith.constant 0 : index
    %126 = vector.load %arg12[%c0_51, %c0_52, %c0_53] : memref<2x1x64xf32, #tpu.memory_space<vmem>>, vector<1x1x64xf32>
    %127 = vector.shape_cast %126 : vector<1x1x64xf32> to vector<1x64xf32>
    %128 = vector.broadcast %127 : vector<1x64xf32> to vector<8x64xf32>
    %129 = arith.addf %125, %128 : vector<8x64xf32>
    %130 = arith.mulf %129, %129 : vector<8x64xf32>
    %131 = arith.mulf %129, %130 : vector<8x64xf32>
    %cst_54 = arith.constant 4.471500e-02 : f32
    %132 = vector.broadcast %cst_54 : f32 to vector<8x64xf32>
    %133 = arith.mulf %132, %131 : vector<8x64xf32>
    %134 = arith.addf %129, %133 : vector<8x64xf32>
    %cst_55 = arith.constant 0.797884583 : f32
    %135 = vector.broadcast %cst_55 : f32 to vector<8x64xf32>
    %136 = arith.mulf %135, %134 : vector<8x64xf32>
    %137 = math.tanh %136 : vector<8x64xf32>
    %cst_56 = arith.constant 1.000000e+00 : f32
    %138 = vector.broadcast %cst_56 : f32 to vector<8x64xf32>
    %139 = arith.addf %138, %137 : vector<8x64xf32>
    %cst_57 = arith.constant 5.000000e-01 : f32
    %140 = vector.broadcast %cst_57 : f32 to vector<8x64xf32>
    %141 = arith.mulf %140, %139 : vector<8x64xf32>
    %142 = arith.mulf %129, %141 : vector<8x64xf32>
    %143 = arith.truncf %142 : vector<8x64xf32> to vector<8x64xbf16>
    %c0_58 = arith.constant 0 : index
    %c0_59 = arith.constant 0 : index
    %c0_60 = arith.constant 0 : index
    %144 = vector.load %arg13[%c0_58, %c0_59, %c0_60] : memref<2x64x32xbf16, #tpu.memory_space<vmem>>, vector<1x64x32xbf16>
    %145 = vector.shape_cast %144 : vector<1x64x32xbf16> to vector<64x32xbf16>
    %cst_61 = arith.constant dense<0.000000e+00> : vector<8x32xf32>
    %146 = tpu.matmul %143, %145, %cst_61 {dimension_numbers = #tpu.dot_dimension_numbers<[1], [0], [0], [1], [0, 0, 1, 1], [], []>} : vector<8x64xbf16>, vector<64x32xbf16>, vector<8x32xf32> -> vector<8x32xf32>
    %c0_62 = arith.constant 0 : index
    %c0_63 = arith.constant 0 : index
    %c0_64 = arith.constant 0 : index
    %147 = vector.load %arg14[%c0_62, %c0_63, %c0_64] : memref<2x1x32xf32, #tpu.memory_space<vmem>>, vector<1x1x32xf32>
    %148 = vector.shape_cast %147 : vector<1x1x32xf32> to vector<1x32xf32>
    %149 = vector.broadcast %148 : vector<1x32xf32> to vector<8x32xf32>
    %150 = arith.addf %146, %149 : vector<8x32xf32>
    %c1 = arith.constant 1 : index
    %c0_65 = arith.constant 0 : index
    %c0_66 = arith.constant 0 : index
    %151 = vector.load %arg11[%c1, %c0_65, %c0_66] : memref<2x32x64xbf16, #tpu.memory_space<vmem>>, vector<1x32x64xbf16>
    %152 = vector.shape_cast %151 : vector<1x32x64xbf16> to vector<32x64xbf16>
    %cst_67 = arith.constant dense<0.000000e+00> : vector<8x64xf32>
    %153 = tpu.matmul %104, %152, %cst_67 {dimension_numbers = #tpu.dot_dimension_numbers<[1], [0], [0], [1], [0, 0, 1, 1], [], []>} : vector<8x32xbf16>, vector<32x64xbf16>, vector<8x64xf32> -> vector<8x64xf32>
    %c1_68 = arith.constant 1 : index
    %c0_69 = arith.constant 0 : index
    %c0_70 = arith.constant 0 : index
    %154 = vector.load %arg12[%c1_68, %c0_69, %c0_70] : memref<2x1x64xf32, #tpu.memory_space<vmem>>, vector<1x1x64xf32>
    %155 = vector.shape_cast %154 : vector<1x1x64xf32> to vector<1x64xf32>
    %156 = vector.broadcast %155 : vector<1x64xf32> to vector<8x64xf32>
    %157 = arith.addf %153, %156 : vector<8x64xf32>
    %158 = arith.mulf %157, %157 : vector<8x64xf32>
    %159 = arith.mulf %157, %158 : vector<8x64xf32>
    %cst_71 = arith.constant 4.471500e-02 : f32
    %160 = vector.broadcast %cst_71 : f32 to vector<8x64xf32>
    %161 = arith.mulf %160, %159 : vector<8x64xf32>
    %162 = arith.addf %157, %161 : vector<8x64xf32>
    %cst_72 = arith.constant 0.797884583 : f32
    %163 = vector.broadcast %cst_72 : f32 to vector<8x64xf32>
    %164 = arith.mulf %163, %162 : vector<8x64xf32>
    %165 = math.tanh %164 : vector<8x64xf32>
    %cst_73 = arith.constant 1.000000e+00 : f32
    %166 = vector.broadcast %cst_73 : f32 to vector<8x64xf32>
    %167 = arith.addf %166, %165 : vector<8x64xf32>
    %cst_74 = arith.constant 5.000000e-01 : f32
    %168 = vector.broadcast %cst_74 : f32 to vector<8x64xf32>
    %169 = arith.mulf %168, %167 : vector<8x64xf32>
    %170 = arith.mulf %157, %169 : vector<8x64xf32>
    %171 = arith.truncf %170 : vector<8x64xf32> to vector<8x64xbf16>
    %c1_75 = arith.constant 1 : index
    %c0_76 = arith.constant 0 : index
    %c0_77 = arith.constant 0 : index
    %172 = vector.load %arg13[%c1_75, %c0_76, %c0_77] : memref<2x64x32xbf16, #tpu.memory_space<vmem>>, vector<1x64x32xbf16>
    %173 = vector.shape_cast %172 : vector<1x64x32xbf16> to vector<64x32xbf16>
    %cst_78 = arith.constant dense<0.000000e+00> : vector<8x32xf32>
    %174 = tpu.matmul %171, %173, %cst_78 {dimension_numbers = #tpu.dot_dimension_numbers<[1], [0], [0], [1], [0, 0, 1, 1], [], []>} : vector<8x64xbf16>, vector<64x32xbf16>, vector<8x32xf32> -> vector<8x32xf32>
    %c1_79 = arith.constant 1 : index
    %c0_80 = arith.constant 0 : index
    %c0_81 = arith.constant 0 : index
    %175 = vector.load %arg14[%c1_79, %c0_80, %c0_81] : memref<2x1x32xf32, #tpu.memory_space<vmem>>, vector<1x1x32xf32>
    %176 = vector.shape_cast %175 : vector<1x1x32xf32> to vector<1x32xf32>
    %177 = vector.broadcast %176 : vector<1x32xf32> to vector<8x32xf32>
    %178 = arith.addf %174, %177 : vector<8x32xf32>
    %179 = vector.shape_cast %121 : vector<8x1xi1> to vector<8x1xi1>
    %180 = vector.broadcast %179 : vector<8x1xi1> to vector<8x32xi1>
    %181 = arith.select %180, %150, %178 : vector<8x32xi1>, vector<8x32xf32>
    %182 = vector.broadcast %122 : vector<8x1xf32> to vector<8x32xf32>
    %183 = arith.mulf %181, %182 : vector<8x32xf32>
    %184 = arith.addf %103, %183 : vector<8x32xf32>
    %cst_82 = arith.constant dense<0.000000e+00> : vector<8xf32>
    %185 = vector.multi_reduction <add>, %184, %cst_82 [1] : vector<8x32xf32> to vector<8xf32>
    %186 = vector.shape_cast %185 : vector<8xf32> to vector<8x1xf32>
    %cst_83 = arith.constant 3.200000e+01 : f32
    %187 = vector.broadcast %cst_83 : f32 to vector<8x1xf32>
    %188 = arith.divf %186, %187 : vector<8x1xf32>
    %189 = vector.broadcast %188 : vector<8x1xf32> to vector<8x32xf32>
    %190 = arith.subf %184, %189 : vector<8x32xf32>
    %191 = arith.mulf %190, %190 : vector<8x32xf32>
    %cst_84 = arith.constant dense<0.000000e+00> : vector<8xf32>
    %192 = vector.multi_reduction <add>, %191, %cst_84 [1] : vector<8x32xf32> to vector<8xf32>
    %193 = vector.shape_cast %192 : vector<8xf32> to vector<8x1xf32>
    %cst_85 = arith.constant 3.200000e+01 : f32
    %194 = vector.broadcast %cst_85 : f32 to vector<8x1xf32>
    %195 = arith.divf %193, %194 : vector<8x1xf32>
    %196 = vector.broadcast %188 : vector<8x1xf32> to vector<8x32xf32>
    %197 = arith.subf %184, %196 : vector<8x32xf32>
    %cst_86 = arith.constant 9.99999996E-13 : f32
    %198 = vector.broadcast %cst_86 : f32 to vector<8x1xf32>
    %199 = arith.addf %195, %198 : vector<8x1xf32>
    %200 = math.rsqrt %199 : vector<8x1xf32>
    %201 = vector.broadcast %200 : vector<8x1xf32> to vector<8x32xf32>
    %202 = arith.mulf %197, %201 : vector<8x32xf32>
    %203 = vector.broadcast %18 : vector<1x32xf32> to vector<8x32xf32>
    %204 = arith.mulf %202, %203 : vector<8x32xf32>
    %205 = vector.broadcast %19 : vector<1x32xf32> to vector<8x32xf32>
    %206 = arith.addf %204, %205 : vector<8x32xf32>
    %c0_87 = arith.constant 0 : index
    %c0_88 = arith.constant 0 : index
    %c0_89 = arith.constant 0 : index
    %207 = vector.load %arg16[%c0_87, %c0_88, %c0_89] : memref<1x8x32xf32, #tpu.memory_space<vmem>>, vector<1x8x32xf32>
    %208 = vector.shape_cast %207 : vector<1x8x32xf32> to vector<8x32xf32>
    %209 = vector.shape_cast %206 : vector<8x32xf32> to vector<1x8x32xf32>
    tpu.vector_store %arg16[%c0_87, %c0_88, %c0_89], %209 {strides = array<i32>} : memref<1x8x32xf32, #tpu.memory_space<vmem>>, vector<1x8x32xf32>,
    return
  }
  func.func @transform_0(%arg0: i32, %arg1: memref<2xi32, #tpu.memory_space<smem>>) -> (i32, i32, i32) {
    %c0_i32 = arith.constant 0 : i32
    %c0_i32_0 = arith.constant 0 : i32
    %c0_i32_1 = arith.constant 0 : i32
    return %arg0, %c0_i32, %c0_i32_0 : i32, i32, i32
  }
  func.func @transform_1(%arg0: i32, %arg1: memref<2xi32, #tpu.memory_space<smem>>) -> (i32, i32, i32) {
    %c0_i32 = arith.constant 0 : i32
    %c0_i32_0 = arith.constant 0 : i32
    %c0_i32_1 = arith.constant 0 : i32
    return %arg0, %c0_i32, %c0_i32_0 : i32, i32, i32
  }
  func.func @transform_2(%arg0: i32, %arg1: memref<2xi32, #tpu.memory_space<smem>>) -> (i32, i32, i32) {
    %0 = arith.index_cast %arg0 : i32 to index
    %1 = memref.load %arg1[%0] : memref<2xi32, #tpu.memory_space<smem>>
    %c0_i32 = arith.constant 0 : i32
    %c0_i32_0 = arith.constant 0 : i32
    %c0_i32_1 = arith.constant 0 : i32
    return %1, %c0_i32, %c0_i32_0 : i32, i32, i32
  }
  func.func @transform_3(%arg0: i32, %arg1: memref<2xi32, #tpu.memory_space<smem>>) -> (i32, i32, i32) {
    %0 = arith.index_cast %arg0 : i32 to index
    %1 = memref.load %arg1[%0] : memref<2xi32, #tpu.memory_space<smem>>
    %c0_i32 = arith.constant 0 : i32
    %c0_i32_0 = arith.constant 0 : i32
    %c0_i32_1 = arith.constant 0 : i32
    return %1, %c0_i32, %c0_i32_0 : i32, i32, i32
  }
  func.func @transform_4(%arg0: i32, %arg1: memref<2xi32, #tpu.memory_space<smem>>) -> (i32, i32, i32) {
    %0 = arith.index_cast %arg0 : i32 to index
    %1 = memref.load %arg1[%0] : memref<2xi32, #tpu.memory_space<smem>>
    %c0_i32 = arith.constant 0 : i32
    %c0_i32_0 = arith.constant 0 : i32
    %c0_i32_1 = arith.constant 0 : i32
    return %1, %c0_i32, %c0_i32_0 : i32, i32, i32
  }
  func.func @transform_5(%arg0: i32, %arg1: memref<2xi32, #tpu.memory_space<smem>>) -> (i32, i32, i32) {
    %0 = arith.index_cast %arg0 : i32 to index
    %1 = memref.load %arg1[%0] : memref<2xi32, #tpu.memory_space<smem>>
    %c0_i32 = arith.constant 0 : i32
    %c0_i32_0 = arith.constant 0 : i32
    %c0_i32_1 = arith.constant 0 : i32
    return %1, %c0_i32, %c0_i32_0 : i32, i32, i32
  }
  func.func @transform_6(%arg0: i32, %arg1: memref<2xi32, #tpu.memory_space<smem>>) -> (i32, i32, i32) {
    %0 = arith.index_cast %arg0 : i32 to index
    %1 = memref.load %arg1[%0] : memref<2xi32, #tpu.memory_space<smem>>
    %c0_i32 = arith.constant 0 : i32
    %c0_i32_0 = arith.constant 0 : i32
    %c0_i32_1 = arith.constant 0 : i32
    return %1, %c0_i32, %c0_i32_0 : i32, i32, i32
  }
  func.func @transform_7(%arg0: i32, %arg1: memref<2xi32, #tpu.memory_space<smem>>) -> (i32, i32) {
    %c0_i32 = arith.constant 0 : i32
    %c0_i32_0 = arith.constant 0 : i32
    %c0_i32_1 = arith.constant 0 : i32
    return %c0_i32, %c0_i32_0 : i32, i32
  }
  func.func @transform_8(%arg0: i32, %arg1: memref<2xi32, #tpu.memory_space<smem>>) -> (i32, i32) {
    %c0_i32 = arith.constant 0 : i32
    %c0_i32_0 = arith.constant 0 : i32
    %c0_i32_1 = arith.constant 0 : i32
    return %c0_i32, %c0_i32_0 : i32, i32
  }
  func.func @transform_9(%arg0: i32, %arg1: memref<2xi32, #tpu.memory_space<smem>>) -> (i32, i32, i32) {
    %c0_i32 = arith.constant 0 : i32
    %c0_i32_0 = arith.constant 0 : i32
    %c0_i32_1 = arith.constant 0 : i32
    %c0_i32_2 = arith.constant 0 : i32
    return %c0_i32, %c0_i32_0, %c0_i32_1 : i32, i32, i32
  }
  func.func @transform_10(%arg0: i32, %arg1: memref<2xi32, #tpu.memory_space<smem>>) -> (i32, i32, i32) {
    %c0_i32 = arith.constant 0 : i32
    %c0_i32_0 = arith.constant 0 : i32
    %c0_i32_1 = arith.constant 0 : i32
    %c0_i32_2 = arith.constant 0 : i32
    return %c0_i32, %c0_i32_0, %c0_i32_1 : i32, i32, i32
  }
  func.func @transform_11(%arg0: i32, %arg1: memref<2xi32, #tpu.memory_space<smem>>) -> (i32, i32, i32) {
    %c0_i32 = arith.constant 0 : i32
    %c0_i32_0 = arith.constant 0 : i32
    %c0_i32_1 = arith.constant 0 : i32
    %c0_i32_2 = arith.constant 0 : i32
    return %c0_i32, %c0_i32_0, %c0_i32_1 : i32, i32, i32
  }
  func.func @transform_12(%arg0: i32, %arg1: memref<2xi32, #tpu.memory_space<smem>>) -> (i32, i32, i32) {
    %c0_i32 = arith.constant 0 : i32
    %c0_i32_0 = arith.constant 0 : i32
    %c0_i32_1 = arith.constant 0 : i32
    %c0_i32_2 = arith.constant 0 : i32
    return %c0_i32, %c0_i32_0, %c0_i32_1 : i32, i32, i32
  }
  func.func @transform_13(%arg0: i32, %arg1: memref<2xi32, #tpu.memory_space<smem>>) -> (i32, i32) {
    %c0_i32 = arith.constant 0 : i32
    %c0_i32_0 = arith.constant 0 : i32
    %c0_i32_1 = arith.constant 0 : i32
    return %c0_i32, %c0_i32_0 : i32, i32
  }
  func.func @transform_14(%arg0: i32, %arg1: memref<2xi32, #tpu.memory_space<smem>>) -> (i32, i32, i32) {
    %c0_i32 = arith.constant 0 : i32
    %c0_i32_0 = arith.constant 0 : i32
    %c0_i32_1 = arith.constant 0 : i32
    return %arg0, %c0_i32, %c0_i32_0 : i32, i32, i32
  }
}

module attributes {stable_mosaic.version = 11 : i64} {
  func.func @momo_fused_kernel(%arg0: i32, %arg1: memref<2xi32, #tpu.memory_space<smem>>, %arg2: memref<1x8x32xf32, #tpu.memory_space<vmem>>, %arg3: memref<1x1x8xf32, #tpu.memory_space<vmem>>, %arg4: memref<1x32x32xbf16, #tpu.memory_space<vmem>>, %arg5: memref<1x32x32xbf16, #tpu.memory_space<vmem>>, %arg6: memref<1x32x32xbf16, #tpu.memory_space<vmem>>, %arg7: memref<1x32x32xbf16, #tpu.memory_space<vmem>>, %arg8: memref<1x6x32xf32, #tpu.memory_space<vmem>>, %arg9: memref<32x2xbf16, #tpu.memory_space<vmem>>, %arg10: memref<1x2xf32, #tpu.memory_space<vmem>>, %arg11: memref<2x32x64xbf16, #tpu.memory_space<vmem>>, %arg12: memref<2x1x64xf32, #tpu.memory_space<vmem>>, %arg13: memref<2x64x32xbf16, #tpu.memory_space<vmem>>, %arg14: memref<2x1x32xf32, #tpu.memory_space<vmem>>, %arg15: memref<2x32xf32, #tpu.memory_space<vmem>>, %arg16: memref<1x8x32xf32, #tpu.memory_space<vmem>>) attributes {dimension_semantics = [#tpu.dimension_semantics<parallel>], iteration_bounds = array<i64: 2>, scalar_prefetch = 1 : i64, scratch_operands = 0 : i64, tpu.core_type = #tpu.core_type<tc>, window_params = [{transform_indices = @transform_0, window_bounds = array<i64: 1, 8, 32>}, {transform_indices = @transform_1, window_bounds = array<i64: 1, 1, 8>}, {transform_indices = @transform_2, window_bounds = array<i64: 1, 32, 32>}, {transform_indices = @transform_3, window_bounds = array<i64: 1, 32, 32>}, {transform_indices = @transform_4, window_bounds = array<i64: 1, 32, 32>}, {transform_indices = @transform_5, window_bounds = array<i64: 1, 32, 32>}, {transform_indices = @transform_6, window_bounds = array<i64: 1, 6, 32>}, {pipeline_mode = #tpu.pipeline_mode<synchronous>, transform_indices = @transform_7, window_bounds = array<i64: 32, 2>}, {pipeline_mode = #tpu.pipeline_mode<synchronous>, transform_indices = @transform_8, window_bounds = array<i64: 1, 2>}, {pipeline_mode = #tpu.pipeline_mode<synchronous>, transform_indices = @transform_9, window_bounds = array<i64: 2, 32, 64>}, {pipeline_mode = #tpu.pipeline_mode<synchronous>, transform_indices = @transform_10, window_bounds = array<i64: 2, 1, 64>}, {pipeline_mode = #tpu.pipeline_mode<synchronous>, transform_indices = @transform_11, window_bounds = array<i64: 2, 64, 32>}, {pipeline_mode = #tpu.pipeline_mode<synchronous>, transform_indices = @transform_12, window_bounds = array<i64: 2, 1, 32>}, {pipeline_mode = #tpu.pipeline_mode<synchronous>, transform_indices = @transform_13, window_bounds = array<i64: 2, 32>}, {transform_indices = @transform_14, window_bounds = array<i64: 1, 8, 32>}]} {
    %c0 = arith.constant 0 : index
    %c0_0 = arith.constant 0 : index
    %c0_1 = arith.constant 0 : index
    %0 = vector.load %arg2[%c0, %c0_0, %c0_1] : memref<1x8x32xf32, #tpu.memory_space<vmem>>, vector<1x8x32xf32>
    %1 = vector.shape_cast %0 : vector<1x8x32xf32> to vector<8x32xf32>
    %2 = arith.truncf %1 : vector<8x32xf32> to vector<8x32xbf16>
    %c0_2 = arith.constant 0 : index
    %c0_3 = arith.constant 0 : index
    %c0_4 = arith.constant 0 : index
    %3 = vector.load %arg3[%c0_2, %c0_3, %c0_4] : memref<1x1x8xf32, #tpu.memory_space<vmem>>, vector<1x1x8xf32>
    %4 = vector.shape_cast %3 : vector<1x1x8xf32> to vector<1x8xf32>
    %cst = arith.constant 1.000000e+00 : f32
    %5 = vector.broadcast %cst : f32 to vector<1x8xf32>
    %6 = arith.subf %4, %5 : vector<1x8xf32>
    %cst_5 = arith.constant 1.000000e+09 : f32
    %7 = vector.broadcast %cst_5 : f32 to vector<1x8xf32>
    %8 = arith.mulf %6, %7 : vector<1x8xf32>
    %c0_6 = arith.constant 0 : index
    %c0_7 = arith.constant 0 : index
    %c0_8 = arith.constant 0 : index
    %9 = vector.load %arg8[%c0_6, %c0_7, %c0_8] : memref<1x6x32xf32, #tpu.memory_space<vmem>>, vector<1x6x32xf32>
    %10 = vector.shape_cast %9 : vector<1x6x32xf32> to vector<6x32xf32>
    %11 = vector.extract_strided_slice %10 {offsets = [0, 0], sizes = [1, 32], strides = [1, 1]} : vector<6x32xf32> to vector<1x32xf32>
    %12 = vector.extract_strided_slice %10 {offsets = [1, 0], sizes = [1, 32], strides = [1, 1]} : vector<6x32xf32> to vector<1x32xf32>
    %13 = vector.extract_strided_slice %10 {offsets = [2, 0], sizes = [1, 32], strides = [1, 1]} : vector<6x32xf32> to vector<1x32xf32>
    %14 = vector.extract_strided_slice %10 {offsets = [3, 0], sizes = [1, 32], strides = [1, 1]} : vector<6x32xf32> to vector<1x32xf32>
    %15 = vector.extract_strided_slice %10 {offsets = [4, 0], sizes = [1, 32], strides = [1, 1]} : vector<6x32xf32> to vector<1x32xf32>
    %16 = vector.extract_strided_slice %10 {offsets = [5, 0], sizes = [1, 32], strides = [1, 1]} : vector<6x32xf32> to vector<1x32xf32>
    %c0_9 = arith.constant 0 : index
    %c0_10 = arith.constant 0 : index
    %17 = vector.load %arg15[%c0_9, %c0_10] : memref<2x32xf32, #tpu.memory_space<vmem>>, vector<2x32xf32>
    %18 = vector.extract_strided_slice %17 {offsets = [0, 0], sizes = [1, 32], strides = [1, 1]} : vector<2x32xf32> to vector<1x32xf32>
    %19 = vector.extract_strided_slice %17 {offsets = [1, 0], sizes = [1, 32], strides = [1, 1]} : vector<2x32xf32> to vector<1x32xf32>
    %c0_11 = arith.constant 0 : index
    %c0_12 = arith.constant 0 : index
    %c0_13 = arith.constant 0 : index
    %20 = vector.load %arg4[%c0_11, %c0_12, %c0_13] : memref<1x32x32xbf16, #tpu.memory_space<vmem>>, vector<1x32x32xbf16>
    %21 = vector.shape_cast %20 : vector<1x32x32xbf16> to vector<32x32xbf16>
    %cst_14 = arith.constant dense<0.000000e+00> : vector<8x32xf32>
    %22 = tpu.matmul %2, %21, %cst_14 {dimension_numbers = #tpu.dot_dimension_numbers<[1], [0], [0], [1], [0, 0, 1, 1], [], []>} : vector<8x32xbf16>, vector<32x32xbf16>, vector<8x32xf32> -> vector<8x32xf32>
    %23 = vector.broadcast %11 : vector<1x32xf32> to vector<8x32xf32>
    %24 = arith.addf %22, %23 : vector<8x32xf32>
    %c0_15 = arith.constant 0 : index
    %c0_16 = arith.constant 0 : index
    %c0_17 = arith.constant 0 : index
    %25 = vector.load %arg5[%c0_15, %c0_16, %c0_17] : memref<1x32x32xbf16, #tpu.memory_space<vmem>>, vector<1x32x32xbf16>
    %26 = vector.shape_cast %25 : vector<1x32x32xbf16> to vector<32x32xbf16>
    %cst_18 = arith.constant dense<0.000000e+00> : vector<8x32xf32>
    %27 = tpu.matmul %2, %26, %cst_18 {dimension_numbers = #tpu.dot_dimension_numbers<[1], [0], [0], [1], [0, 0, 1, 1], [], []>} : vector<8x32xbf16>, vector<32x32xbf16>, vector<8x32xf32> -> vector<8x32xf32>
    %28 = vector.broadcast %12 : vector<1x32xf32> to vector<8x32xf32>
    %29 = arith.addf %27, %28 : vector<8x32xf32>
    %c0_19 = arith.constant 0 : index
    %c0_20 = arith.constant 0 : index
    %c0_21 = arith.constant 0 : index
    %30 = vector.load %arg6[%c0_19, %c0_20, %c0_21] : memref<1x32x32xbf16, #tpu.memory_space<vmem>>, vector<1x32x32xbf16>
    %31 = vector.shape_cast %30 : vector<1x32x32xbf16> to vector<32x32xbf16>
    %cst_22 = arith.constant dense<0.000000e+00> : vector<8x32xf32>
    %32 = tpu.matmul %2, %31, %cst_22 {dimension_numbers = #tpu.dot_dimension_numbers<[1], [0], [0], [1], [0, 0, 1, 1], [], []>} : vector<8x32xbf16>, vector<32x32xbf16>, vector<8x32xf32> -> vector<8x32xf32>
    %33 = vector.broadcast %13 : vector<1x32xf32> to vector<8x32xf32>
    %34 = arith.addf %32, %33 : vector<8x32xf32>
    %cst_23 = arith.constant 2.500000e-01 : f32
    %35 = vector.broadcast %cst_23 : f32 to vector<8x32xf32>
    %36 = arith.mulf %24, %35 : vector<8x32xf32>
    %37 = arith.truncf %36 : vector<8x32xf32> to vector<8x32xbf16>
    %38 = vector.shape_cast %37 : vector<8x32xbf16> to vector<8x2x16xbf16>
    %39 = tpu.transpose %38, [1, 0, 2] : vector<8x2x16xbf16> -> vector<2x8x16xbf16>
    %40 = arith.truncf %29 : vector<8x32xf32> to vector<8x32xbf16>
    %41 = vector.shape_cast %40 : vector<8x32xbf16> to vector<8x2x16xbf16>
    %42 = tpu.transpose %41, [1, 0, 2] : vector<8x2x16xbf16> -> vector<2x8x16xbf16>
    %43 = arith.truncf %34 : vector<8x32xf32> to vector<8x32xbf16>
    %44 = vector.shape_cast %43 : vector<8x32xbf16> to vector<8x2x16xbf16>
    %45 = tpu.transpose %44, [1, 0, 2] : vector<8x2x16xbf16> -> vector<2x8x16xbf16>
    %cst_24 = arith.constant 0xFF800000 : f32
    %46 = vector.broadcast %cst_24 : f32 to vector<2x8x1xf32>
    %cst_25 = arith.constant 0.000000e+00 : f32
    %47 = vector.broadcast %cst_25 : f32 to vector<2x8x1xf32>
    %cst_26 = arith.constant 0.000000e+00 : f32
    %48 = vector.broadcast %cst_26 : f32 to vector<2x8x16xf32>
    "tpu.trace_start"() <{level = 10 : i32, message = "nqd,nkd->nqk"}> : () -> ()
    %cst_27 = arith.constant dense<0.000000e+00> : vector<2x8x8xf32>
    %49 = tpu.matmul %39, %42, %cst_27 {dimension_numbers = #tpu.dot_dimension_numbers<[2], [2], [1], [1], [0, 0, 0, 1, 1, 1], [0], [0]>} : vector<2x8x16xbf16>, vector<2x8x16xbf16>, vector<2x8x8xf32> -> vector<2x8x8xf32>
    "tpu.trace_stop"() : () -> ()
    %50 = vector.shape_cast %8 : vector<1x8xf32> to vector<1x1x8xf32>
    %51 = vector.broadcast %50 : vector<1x1x8xf32> to vector<2x8x8xf32>
    %52 = arith.addf %49, %51 : vector<2x8x8xf32>
    %cst_28 = arith.constant dense<0xFF800000> : vector<2x8xf32>
    %53 = vector.multi_reduction <maximumf>, %52, %cst_28 [2] : vector<2x8x8xf32> to vector<2x8xf32>
    %54 = vector.shape_cast %53 : vector<2x8xf32> to vector<2x8x1xf32>
    %55 = arith.maximumf %46, %54 : vector<2x8x1xf32>
    %56 = arith.subf %46, %55 : vector<2x8x1xf32>
    %57 = math.exp %56 : vector<2x8x1xf32>
    %58 = vector.broadcast %55 : vector<2x8x1xf32> to vector<2x8x8xf32>
    %59 = arith.subf %52, %58 : vector<2x8x8xf32>
    %60 = math.exp %59 : vector<2x8x8xf32>
    %61 = arith.mulf %57, %47 : vector<2x8x1xf32>
    %cst_29 = arith.constant dense<0.000000e+00> : vector<2x8xf32>
    %62 = vector.multi_reduction <add>, %60, %cst_29 [2] : vector<2x8x8xf32> to vector<2x8xf32>
    %63 = vector.shape_cast %62 : vector<2x8xf32> to vector<2x8x1xf32>
    %64 = arith.addf %61, %63 : vector<2x8x1xf32>
    %65 = vector.broadcast %57 : vector<2x8x1xf32> to vector<2x8x16xf32>
    %66 = arith.mulf %65, %48 : vector<2x8x16xf32>
    %67 = arith.truncf %60 : vector<2x8x8xf32> to vector<2x8x8xbf16>
    "tpu.trace_start"() <{level = 10 : i32, message = "nqk,nkd->nqd"}> : () -> ()
    %cst_30 = arith.constant dense<0.000000e+00> : vector<2x8x16xf32>
    %68 = tpu.matmul %67, %45, %cst_30 {dimension_numbers = #tpu.dot_dimension_numbers<[2], [1], [1], [2], [0, 0, 0, 1, 1, 2], [0], [0]>} : vector<2x8x8xbf16>, vector<2x8x16xbf16>, vector<2x8x16xf32> -> vector<2x8x16xf32>
    "tpu.trace_stop"() : () -> ()
    %69 = arith.addf %66, %68 : vector<2x8x16xf32>
    %70 = tpu.reciprocal %64 {approx = true} : vector<2x8x1xf32> -> vector<2x8x1xf32>
    %71 = vector.broadcast %70 : vector<2x8x1xf32> to vector<2x8x16xf32>
    %72 = arith.mulf %69, %71 : vector<2x8x16xf32>
    %73 = tpu.transpose %72, [1, 0, 2] : vector<2x8x16xf32> -> vector<8x2x16xf32>
    %74 = vector.shape_cast %73 : vector<8x2x16xf32> to vector<8x32xf32>
    %75 = arith.truncf %74 : vector<8x32xf32> to vector<8x32xbf16>
    %c0_31 = arith.constant 0 : index
    %c0_32 = arith.constant 0 : index
    %c0_33 = arith.constant 0 : index
    %76 = vector.load %arg7[%c0_31, %c0_32, %c0_33] : memref<1x32x32xbf16, #tpu.memory_space<vmem>>, vector<1x32x32xbf16>
    %77 = vector.shape_cast %76 : vector<1x32x32xbf16> to vector<32x32xbf16>
    %cst_34 = arith.constant dense<0.000000e+00> : vector<8x32xf32>
    %78 = tpu.matmul %75, %77, %cst_34 {dimension_numbers = #tpu.dot_dimension_numbers<[1], [0], [0], [1], [0, 0, 1, 1], [], []>} : vector<8x32xbf16>, vector<32x32xbf16>, vector<8x32xf32> -> vector<8x32xf32>
    %79 = vector.broadcast %14 : vector<1x32xf32> to vector<8x32xf32>
    %80 = arith.addf %78, %79 : vector<8x32xf32>
    %81 = arith.addf %80, %1 : vector<8x32xf32>
    %cst_35 = arith.constant dense<0.000000e+00> : vector<8xf32>
    %82 = vector.multi_reduction <add>, %81, %cst_35 [1] : vector<8x32xf32> to vector<8xf32>
    %83 = vector.shape_cast %82 : vector<8xf32> to vector<8x1xf32>
    %cst_36 = arith.constant 3.200000e+01 : f32
    %84 = vector.broadcast %cst_36 : f32 to vector<8x1xf32>
    %85 = arith.divf %83, %84 : vector<8x1xf32>
    %86 = vector.broadcast %85 : vector<8x1xf32> to vector<8x32xf32>
    %87 = arith.subf %81, %86 : vector<8x32xf32>
    %88 = arith.mulf %87, %87 : vector<8x32xf32>
    %cst_37 = arith.constant dense<0.000000e+00> : vector<8xf32>
    %89 = vector.multi_reduction <add>, %88, %cst_37 [1] : vector<8x32xf32> to vector<8xf32>
    %90 = vector.shape_cast %89 : vector<8xf32> to vector<8x1xf32>
    %cst_38 = arith.constant 3.200000e+01 : f32
    %91 = vector.broadcast %cst_38 : f32 to vector<8x1xf32>
    %92 = arith.divf %90, %91 : vector<8x1xf32>
    %93 = vector.broadcast %85 : vector<8x1xf32> to vector<8x32xf32>
    %94 = arith.subf %81, %93 : vector<8x32xf32>
    %cst_39 = arith.constant 9.99999996E-13 : f32
    %95 = vector.broadcast %cst_39 : f32 to vector<8x1xf32>
    %96 = arith.addf %92, %95 : vector<8x1xf32>
    %97 = math.rsqrt %96 : vector<8x1xf32>
    %98 = vector.broadcast %97 : vector<8x1xf32> to vector<8x32xf32>
    %99 = arith.mulf %94, %98 : vector<8x32xf32>
    %100 = vector.broadcast %15 : vector<1x32xf32> to vector<8x32xf32>
    %101 = arith.mulf %99, %100 : vector<8x32xf32>
    %102 = vector.broadcast %16 : vector<1x32xf32> to vector<8x32xf32>
    %103 = arith.addf %101, %102 : vector<8x32xf32>
    %104 = arith.truncf %103 : vector<8x32xf32> to vector<8x32xbf16>
    %c0_40 = arith.constant 0 : index
    %c0_41 = arith.constant 0 : index
    %105 = vector.load %arg9[%c0_40, %c0_41] : memref<32x2xbf16, #tpu.memory_space<vmem>>, vector<32x2xbf16>
    %cst_42 = arith.constant dense<0.000000e+00> : vector<8x2xf32>
    %106 = tpu.matmul %104, %105, %cst_42 {dimension_numbers = #tpu.dot_dimension_numbers<[1], [0], [0], [1], [0, 0, 1, 1], [], []>} : vector<8x32xbf16>, vector<32x2xbf16>, vector<8x2xf32> -> vector<8x2xf32>
    %c0_43 = arith.constant 0 : index
    %c0_44 = arith.constant 0 : index
    %107 = vector.load %arg10[%c0_43, %c0_44] : memref<1x2xf32, #tpu.memory_space<vmem>>, vector<1x2xf32>
    %108 = vector.broadcast %107 : vector<1x2xf32> to vector<8x2xf32>
    %109 = arith.addf %106, %108 : vector<8x2xf32>
    %cst_45 = arith.constant dense<0xFF800000> : vector<8xf32>
    %110 = vector.multi_reduction <maximumf>, %109, %cst_45 [1] : vector<8x2xf32> to vector<8xf32>
    %111 = vector.shape_cast %110 : vector<8xf32> to vector<8x1xf32>
    %112 = vector.broadcast %111 : vector<8x1xf32> to vector<8x2xf32>
    %113 = arith.subf %109, %112 : vector<8x2xf32>
    %114 = math.exp %113 : vector<8x2xf32>
    %cst_46 = arith.constant dense<0.000000e+00> : vector<8xf32>
    %115 = vector.multi_reduction <add>, %114, %cst_46 [1] : vector<8x2xf32> to vector<8xf32>
    %116 = vector.shape_cast %115 : vector<8xf32> to vector<8x1xf32>
    %117 = vector.broadcast %116 : vector<8x1xf32> to vector<8x2xf32>
    %118 = arith.divf %114, %117 : vector<8x2xf32>
    %119 = vector.extract_strided_slice %118 {offsets = [0, 0], sizes = [8, 1], strides = [1, 1]} : vector<8x2xf32> to vector<8x1xf32>
    %120 = vector.extract_strided_slice %118 {offsets = [0, 1], sizes = [8, 1], strides = [1, 1]} : vector<8x2xf32> to vector<8x1xf32>
    %121 = arith.cmpf oge, %119, %120 : vector<8x1xf32>
    %122 = arith.select %121, %119, %120 : vector<8x1xi1>, vector<8x1xf32>
    %c0_47 = arith.constant 0 : index
    %c0_48 = arith.constant 0 : index
    %c0_49 = arith.constant 0 : index
    %123 = vector.load %arg11[%c0_47, %c0_48, %c0_49] : memref<2x32x64xbf16, #tpu.memory_space<vmem>>, vector<1x32x64xbf16>
    %124 = vector.shape_cast %123 : vector<1x32x64xbf16> to vector<32x64xbf16>
    %cst_50 = arith.constant dense<0.000000e+00> : vector<8x64xf32>
    %125 = tpu.matmul %104, %124, %cst_50 {dimension_numbers = #tpu.dot_dimension_numbers<[1], [0], [0], [1], [0, 0, 1, 1], [], []>} : vector<8x32xbf16>, vector<32x64xbf16>, vector<8x64xf32> -> vector<8x64xf32>
    %c0_51 = arith.constant 0 : index
    %c0_52 = arith.constant 0 : index
    %c0_53 = arith.constant 0 : index
    %126 = vector.load %arg12[%c0_51, %c0_52, %c0_53] : memref<2x1x64xf32, #tpu.memory_space<vmem>>, vector<1x1x64xf32>
    %127 = vector.shape_cast %126 : vector<1x1x64xf32> to vector<1x64xf32>
    %128 = vector.broadcast %127 : vector<1x64xf32> to vector<8x64xf32>
    %129 = arith.addf %125, %128 : vector<8x64xf32>
    %130 = arith.mulf %129, %129 : vector<8x64xf32>
    %131 = arith.mulf %129, %130 : vector<8x64xf32>
    %cst_54 = arith.constant 4.471500e-02 : f32
    %132 = vector.broadcast %cst_54 : f32 to vector<8x64xf32>
    %133 = arith.mulf %132, %131 : vector<8x64xf32>
    %134 = arith.addf %129, %133 : vector<8x64xf32>
    %cst_55 = arith.constant 0.797884583 : f32
    %135 = vector.broadcast %cst_55 : f32 to vector<8x64xf32>
    %136 = arith.mulf %135, %134 : vector<8x64xf32>
    %137 = math.tanh %136 : vector<8x64xf32>
    %cst_56 = arith.constant 1.000000e+00 : f32
    %138 = vector.broadcast %cst_56 : f32 to vector<8x64xf32>
    %139 = arith.addf %138, %137 : vector<8x64xf32>
    %cst_57 = arith.constant 5.000000e-01 : f32
    %140 = vector.broadcast %cst_57 : f32 to vector<8x64xf32>
    %141 = arith.mulf %140, %139 : vector<8x64xf32>
    %142 = arith.mulf %129, %141 : vector<8x64xf32>
    %143 = arith.truncf %142 : vector<8x64xf32> to vector<8x64xbf16>
    %c0_58 = arith.constant 0 : index
    %c0_59 = arith.constant 0 : index
    %c0_60 = arith.constant 0 : index
    %144 = vector.load %arg13[%c0_58, %c0_59, %c0_60] : memref<2x64x32xbf16, #tpu.memory_space<vmem>>, vector<1x64x32xbf16>
    %145 = vector.shape_cast %144 : vector<1x64x32xbf16> to vector<64x32xbf16>
    %cst_61 = arith.constant dense<0.000000e+00> : vector<8x32xf32>
    %146 = tpu.matmul %143, %145, %cst_61 {dimension_numbers = #tpu.dot_dimension_numbers<[1], [0], [0], [1], [0, 0, 1, 1], [], []>} : vector<8x64xbf16>, vector<64x32xbf16>, vector<8x32xf32> -> vector<8x32xf32>
    %c0_62 = arith.constant 0 : index
    %c0_63 = arith.constant 0 : index
    %c0_64 = arith.constant 0 : index
    %147 = vector.load %arg14[%c0_62, %c0_63, %c0_64] : memref<2x1x32xf32, #tpu.memory_space<vmem>>, vector<1x1x32xf32>
    %148 = vector.shape_cast %147 : vector<1x1x32xf32> to vector<1x32xf32>
    %149 = vector.broadcast %148 : vector<1x32xf32> to vector<8x32xf32>
    %150 = arith.addf %146, %149 : vector<8x32xf32>
    %c1 = arith.constant 1 : index
    %c0_65 = arith.constant 0 : index
    %c0_66 = arith.constant 0 : index
    %151 = vector.load %arg11[%c1, %c0_65, %c0_66] : memref<2x32x64xbf16, #tpu.memory_space<vmem>>, vector<1x32x64xbf16>
    %152 = vector.shape_cast %151 : vector<1x32x64xbf16> to vector<32x64xbf16>
    %cst_67 = arith.constant dense<0.000000e+00> : vector<8x64xf32>
    %153 = tpu.matmul %104, %152, %cst_67 {dimension_numbers = #tpu.dot_dimension_numbers<[1], [0], [0], [1], [0, 0, 1, 1], [], []>} : vector<8x32xbf16>, vector<32x64xbf16>, vector<8x64xf32> -> vector<8x64xf32>
    %c1_68 = arith.constant 1 : index
    %c0_69 = arith.constant 0 : index
    %c0_70 = arith.constant 0 : index
    %154 = vector.load %arg12[%c1_68, %c0_69, %c0_70] : memref<2x1x64xf32, #tpu.memory_space<vmem>>, vector<1x1x64xf32>
    %155 = vector.shape_cast %154 : vector<1x1x64xf32> to vector<1x64xf32>
    %156 = vector.broadcast %155 : vector<1x64xf32> to vector<8x64xf32>
    %157 = arith.addf %153, %156 : vector<8x64xf32>
    %158 = arith.mulf %157, %157 : vector<8x64xf32>
    %159 = arith.mulf %157, %158 : vector<8x64xf32>
    %cst_71 = arith.constant 4.471500e-02 : f32
    %160 = vector.broadcast %cst_71 : f32 to vector<8x64xf32>
    %161 = arith.mulf %160, %159 : vector<8x64xf32>
    %162 = arith.addf %157, %161 : vector<8x64xf32>
    %cst_72 = arith.constant 0.797884583 : f32
    %163 = vector.broadcast %cst_72 : f32 to vector<8x64xf32>
    %164 = arith.mulf %163, %162 : vector<8x64xf32>
    %165 = math.tanh %164 : vector<8x64xf32>
    %cst_73 = arith.constant 1.000000e+00 : f32
    %166 = vector.broadcast %cst_73 : f32 to vector<8x64xf32>
    %167 = arith.addf %166, %165 : vector<8x64xf32>
    %cst_74 = arith.constant 5.000000e-01 : f32
    %168 = vector.broadcast %cst_74 : f32 to vector<8x64xf32>
    %169 = arith.mulf %168, %167 : vector<8x64xf32>
    %170 = arith.mulf %157, %169 : vector<8x64xf32>
    %171 = arith.truncf %170 : vector<8x64xf32> to vector<8x64xbf16>
    %c1_75 = arith.constant 1 : index
    %c0_76 = arith.constant 0 : index
    %c0_77 = arith.constant 0 : index
    %172 = vector.load %arg13[%c1_75, %c0_76, %c0_77] : memref<2x64x32xbf16, #tpu.memory_space<vmem>>, vector<1x64x32xbf16>
    %173 = vector.shape_cast %172 : vector<1x64x32xbf16> to vector<64x32xbf16>
    %cst_78 = arith.constant dense<0.000000e+00> : vector<8x32xf32>
    %174 = tpu.matmul %171, %173, %cst_78 {dimension_numbers = #tpu.dot_dimension_numbers<[1], [0], [0], [1], [0, 0, 1, 1], [], []>} : vector<8x64xbf16>, vector<64x32xbf16>, vector<8x32xf32> -> vector<8x32xf32>
    %c1_79 = arith.constant 1 : index
    %c0_80 = arith.constant 0 : index
    %c0_81 = arith.constant 0 : index
    %175 = vector.load %arg14[%c1_79, %c0_80, %c0_81] : memref<2x1x32xf32, #tpu.memory_space<vmem>>, vector<1x1x32xf32>
    %176 = vector.shape_cast %175 : vector<1x1x32xf32> to vector<1x32xf32>
    %177 = vector.broadcast %176 : vector<1x32xf32> to vector<8x32xf32>
    %178 = arith.addf %174, %177 : vector<8x32xf32>
    %179 = vector.shape_cast %121 : vector<8x1xi1> to vector<8x1xi1>
    %180 = vector.broadcast %179 : vector<8x1xi1> to vector<8x32xi1>
    %181 = arith.select %180, %150, %178 : vector<8x32xi1>, vector<8x32xf32>
    %182 = vector.broadcast %122 : vector<8x1xf32> to vector<8x32xf32>
    %183 = arith.mulf %181, %182 : vector<8x32xf32>
    %184 = arith.addf %103, %183 : vector<8x32xf32>
    %cst_82 = arith.constant dense<0.000000e+00> : vector<8xf32>
    %185 = vector.multi_reduction <add>, %184, %cst_82 [1] : vector<8x32xf32> to vector<8xf32>
    %186 = vector.shape_cast %185 : vector<8xf32> to vector<8x1xf32>
    %cst_83 = arith.constant 3.200000e+01 : f32
    %187 = vector.broadcast %cst_83 : f32 to vector<8x1xf32>
    %188 = arith.divf %186, %187 : vector<8x1xf32>
    %189 = vector.broadcast %188 : vector<8x1xf32> to vector<8x32xf32>
    %190 = arith.subf %184, %189 : vector<8x32xf32>
    %191 = arith.mulf %190, %190 : vector<8x32xf32>
    %cst_84 = arith.constant dense<0.000000e+00> : vector<8xf32>
    %192 = vector.multi_reduction <add>, %191, %cst_84 [1] : vector<8x32xf32> to vector<8xf32>
    %193 = vector.shape_cast %192 : vector<8xf32> to vector<8x1xf32>
    %cst_85 = arith.constant 3.200000e+01 : f32
    %194 = vector.broadcast %cst_85 : f32 to vector<8x1xf32>
    %195 = arith.divf %193, %194 : vector<8x1xf32>
    %196 = vector.broadcast %188 : vector<8x1xf32> to vector<8x32xf32>
    %197 = arith.subf %184, %196 : vector<8x32xf32>
    %cst_86 = arith.constant 9.99999996E-13 : f32
    %198 = vector.broadcast %cst_86 : f32 to vector<8x1xf32>
    %199 = arith.addf %195, %198 : vector<8x1xf32>
    %200 = math.rsqrt %199 : vector<8x1xf32>
    %201 = vector.broadcast %200 : vector<8x1xf32> to vector<8x32xf32>
    %202 = arith.mulf %197, %201 : vector<8x32xf32>
    %203 = vector.broadcast %18 : vector<1x32xf32> to vector<8x32xf32>
    %204 = arith.mulf %202, %203 : vector<8x32xf32>
    %205 = vector.broadcast %19 : vector<1x32xf32> to vector<8x32xf32>
    %206 = arith.addf %204, %205 : vector<8x32xf32>
    %c0_87 = arith.constant 0 : index
    %c0_88 = arith.constant 0 : index
    %c0_89 = arith.constant 0 : index
    %207 = vector.load %arg16[%c0_87, %c0_88, %c0_89] : memref<1x8x32xf32, #tpu.memory_space<vmem>>, vector<1x8x32xf32>
    %208 = vector.shape_cast %207 : vector<1x8x32xf32> to vector<8x32xf32>
    %209 = vector.shape_cast %206 : vector<8x32xf32> to vector<1x8x32xf32>
    tpu.vector_store %arg16[%c0_87, %c0_88, %c0_89], %209 {strides = array<i32>} : memref<1x8x32xf32, #tpu.memory_space<vmem>>, vector<1x8x32xf32>,
    return
  }
  func.func @transform_0(%arg0: i32, %arg1: memref<2xi32, #tpu.memory_space<smem>>) -> (i32, i32, i32) {
    %c0_i32 = arith.constant 0 : i32
    %c0_i32_0 = arith.constant 0 : i32
    %c0_i32_1 = arith.constant 0 : i32
    return %arg0, %c0_i32, %c0_i32_0 : i32, i32, i32
  }
  func.func @transform_1(%arg0: i32, %arg1: memref<2xi32, #tpu.memory_space<smem>>) -> (i32, i32, i32) {
    %c0_i32 = arith.constant 0 : i32
    %c0_i32_0 = arith.constant 0 : i32
    %c0_i32_1 = arith.constant 0 : i32
    return %arg0, %c0_i32, %c0_i32_0 : i32, i32, i32
  }
  func.func @transform_2(%arg0: i32, %arg1: memref<2xi32, #tpu.memory_space<smem>>) -> (i32, i32, i32) {
    %0 = arith.index_cast %arg0 : i32 to index
    %1 = memref.load %arg1[%0] : memref<2xi32, #tpu.memory_space<smem>>
    %c0_i32 = arith.constant 0 : i32
    %c0_i32_0 = arith.constant 0 : i32
    %c0_i32_1 = arith.constant 0 : i32
    return %1, %c0_i32, %c0_i32_0 : i32, i32, i32
  }
  func.func @transform_3(%arg0: i32, %arg1: memref<2xi32, #tpu.memory_space<smem>>) -> (i32, i32, i32) {
    %0 = arith.index_cast %arg0 : i32 to index
    %1 = memref.load %arg1[%0] : memref<2xi32, #tpu.memory_space<smem>>
    %c0_i32 = arith.constant 0 : i32
    %c0_i32_0 = arith.constant 0 : i32
    %c0_i32_1 = arith.constant 0 : i32
    return %1, %c0_i32, %c0_i32_0 : i32, i32, i32
  }
  func.func @transform_4(%arg0: i32, %arg1: memref<2xi32, #tpu.memory_space<smem>>) -> (i32, i32, i32) {
    %0 = arith.index_cast %arg0 : i32 to index
    %1 = memref.load %arg1[%0] : memref<2xi32, #tpu.memory_space<smem>>
    %c0_i32 = arith.constant 0 : i32
    %c0_i32_0 = arith.constant 0 : i32
    %c0_i32_1 = arith.constant 0 : i32
    return %1, %c0_i32, %c0_i32_0 : i32, i32, i32
  }
  func.func @transform_5(%arg0: i32, %arg1: memref<2xi32, #tpu.memory_space<smem>>) -> (i32, i32, i32) {
    %0 = arith.index_cast %arg0 : i32 to index
    %1 = memref.load %arg1[%0] : memref<2xi32, #tpu.memory_space<smem>>
    %c0_i32 = arith.constant 0 : i32
    %c0_i32_0 = arith.constant 0 : i32
    %c0_i32_1 = arith.constant 0 : i32
    return %1, %c0_i32, %c0_i32_0 : i32, i32, i32
  }
  func.func @transform_6(%arg0: i32, %arg1: memref<2xi32, #tpu.memory_space<smem>>) -> (i32, i32, i32) {
    %0 = arith.index_cast %arg0 : i32 to index
    %1 = memref.load %arg1[%0] : memref<2xi32, #tpu.memory_space<smem>>
    %c0_i32 = arith.constant 0 : i32
    %c0_i32_0 = arith.constant 0 : i32
    %c0_i32_1 = arith.constant 0 : i32
    return %1, %c0_i32, %c0_i32_0 : i32, i32, i32
  }
  func.func @transform_7(%arg0: i32, %arg1: memref<2xi32, #tpu.memory_space<smem>>) -> (i32, i32) {
    %c0_i32 = arith.constant 0 : i32
    %c0_i32_0 = arith.constant 0 : i32
    %c0_i32_1 = arith.constant 0 : i32
    return %c0_i32, %c0_i32_0 : i32, i32
  }
  func.func @transform_8(%arg0: i32, %arg1: memref<2xi32, #tpu.memory_space<smem>>) -> (i32, i32) {
    %c0_i32 = arith.constant 0 : i32
    %c0_i32_0 = arith.constant 0 : i32
    %c0_i32_1 = arith.constant 0 : i32
    return %c0_i32, %c0_i32_0 : i32, i32
  }
  func.func @transform_9(%arg0: i32, %arg1: memref<2xi32, #tpu.memory_space<smem>>) -> (i32, i32, i32) {
    %c0_i32 = arith.constant 0 : i32
    %c0_i32_0 = arith.constant 0 : i32
    %c0_i32_1 = arith.constant 0 : i32
    %c0_i32_2 = arith.constant 0 : i32
    return %c0_i32, %c0_i32_0, %c0_i32_1 : i32, i32, i32
  }
  func.func @transform_10(%arg0: i32, %arg1: memref<2xi32, #tpu.memory_space<smem>>) -> (i32, i32, i32) {
    %c0_i32 = arith.constant 0 : i32
    %c0_i32_0 = arith.constant 0 : i32
    %c0_i32_1 = arith.constant 0 : i32
    %c0_i32_2 = arith.constant 0 : i32
    return %c0_i32, %c0_i32_0, %c0_i32_1 : i32, i32, i32
  }
  func.func @transform_11(%arg0: i32, %arg1: memref<2xi32, #tpu.memory_space<smem>>) -> (i32, i32, i32) {
    %c0_i32 = arith.constant 0 : i32
    %c0_i32_0 = arith.constant 0 : i32
    %c0_i32_1 = arith.constant 0 : i32
    %c0_i32_2 = arith.constant 0 : i32
    return %c0_i32, %c0_i32_0, %c0_i32_1 : i32, i32, i32
  }
  func.func @transform_12(%arg0: i32, %arg1: memref<2xi32, #tpu.memory_space<smem>>) -> (i32, i32, i32) {
    %c0_i32 = arith.constant 0 : i32
    %c0_i32_0 = arith.constant 0 : i32
    %c0_i32_1 = arith.constant 0 : i32
    %c0_i32_2 = arith.constant 0 : i32
    return %c0_i32, %c0_i32_0, %c0_i32_1 : i32, i32, i32
  }
  func.func @transform_13(%arg0: i32, %arg1: memref<2xi32, #tpu.memory_space<smem>>) -> (i32, i32) {
    %c0_i32 = arith.constant 0 : i32
    %c0_i32_0 = arith.constant 0 : i32
    %c0_i32_1 = arith.constant 0 : i32
    return %c0_i32, %c0_i32_0 : i32, i32
  }
  func.func @transform_14(%arg0: i32, %arg1: memref<2xi32, #tpu.memory_space<smem>>) -> (i32, i32, i32) {
    %c0_i32 = arith.constant 0 : i32
    %c0_i32_0 = arith.constant 0 : i32
    %c0_i32_1 = arith.constant 0 : i32
    return %arg0, %c0_i32, %c0_i32_0 : i32, i32, i32
  }
}

</mosaic_0001>

<bundles_post_ra>
// kernel: tpu_custom_call.1
= control target key start
LH: loop header
LB: loop body
LE: loop exit
PB: predicated region body
PF: predicated region fallthrough
CT: control target
= control target key end

     0   :  { %s3368_s0 = inlined_call_operand.vmem [shape: s32[2], index: 0, kind: input, shape index: {}]   ;;  %s3369_s1 = inlined_call_operand.vmem [shape: f32[2,8,32], index: 1, kind: input, shape index: {}]   ;;  %s3370_s2 = inlined_call_operand.vmem [shape: f32[2,1,8], index: 2, kind: input, shape index: {}]   ;;  %s3371_s3 = inlined_call_operand.vmem [shape: bf16[2,32,32], index: 3, kind: input, shape index: {}]   ;;  %s3372_s4 = inlined_call_operand.vmem [shape: bf16[2,32,32], index: 4, kind: input, shape index: {}]   ;;  %s3373_s5 = inlined_call_operand.vmem [shape: bf16[2,32,32], index: 5, kind: input, shape index: {}]   ;;  %s3374_s6 = inlined_call_operand.hbm [shape: bf16[2,32,32], index: 6, kind: input, shape index: {}]   ;;  %s3375_s7 = inlined_call_operand.vmem [shape: f32[2,6,32], index: 7, kind: input, shape index: {}]   ;;  %s3376_s8 = inlined_call_operand.vmem [shape: bf16[32,2], index: 8, kind: input, shape index: {}]   ;;  %s3377_s9 = inlined_call_operand.vmem [shape: f32[1,2], index: 9, kind: input, shape index: {}]   ;;  %s3378_s10 = inlined_call_operand.hbm [shape: bf16[2,32,64], index: 10, kind: input, shape index: {}]   ;;  %s3379_s11 = inlined_call_operand.vmem [shape: f32[2,1,64], index: 11, kind: input, shape index: {}]   ;;  %s3380_s12 = inlined_call_operand.vmem [shape: bf16[2,64,32], index: 12, kind: input, shape index: {}]   ;;  %s3381_s13 = inlined_call_operand.vmem [shape: f32[2,1,32], index: 13, kind: input, shape index: {}]   ;;  %s3382_s14 = inlined_call_operand.vmem [shape: f32[2,32], index: 14, kind: input, shape index: {}]   ;;  %s3383_s15 = inlined_call_operand.hbm [shape: f32[2,8,32], index: 15, kind: output, shape index: {}]  }
   0x1   :  { %3402 = sst [smem:[#allocation27_spill]] %s3382_s14  ;;  %s20_s20 = sshll.u32 %s3368_s0, 4  ;;  %s21_s20 = int_to_ptr.vmem [resolvable:$true] %s20_s20 }
   0x2   :  { %3403 = sst [smem:[#allocation28_spill]] %s3383_s15  ;;  %s2649_s21 = scalar_lea.vmem %s21_s20, 16 }
   0x3   :  { %p2650_p0 = scmp.ne.s32.totalorder %s21_s20, %s2649_s21  ;;  %p2654_p1 = scmp.lt.s32.totalorder %s21_s20, %s21_s20 }
   0x4   :  { %p2655_p2 = scmp.lt.s32.totalorder %s2649_s21, %s2649_s21 }
   0x6   :  { %p2656_p3 = por %p2655_p2, %p2654_p1 }
   0x8   :  { %p2657_p4 = pnand %p2656_p3, %p2650_p0 }
   0xa   :  { %2660 = shalt.err (!%p2657_p4)  }
   0xb   :  { %s2811_s22 = smov [#allocation3]  }
   0xc   :  { %23 = dma.vmem_to_smem %s21_s20, 16, %s2811_s22, [#allocation2] }
   0xd   :  { %2769 = dma.done.wait [#allocation2], 16 }
   0xe   :  { %2770 = vsyncadd [#allocation2], 4294967280 }
   0xf   :  { %25 = sfence }
  0x10   :  { %26 = vsyncpa [#allocation5], 0 }
  0x11   :  { %27 = vsyncpa [#allocation8], 0 }
  0x12   :  { %28 = vsyncpa [#allocation6], 0 }
  0x13   :  { %30 = vsyncpa [#allocation6 + $0x1], 0  ;;  %s2908_s23 = smov 0   ;;  %s2910_s0 = smov 0  }
  0x14   :  { %s2912_s24 = smov 0   ;;  %s2914_s25 = smov 0  }
  0x15   :  { %s2916_s26 = smov 0   ;;  %s2918_s27 = smov 0  }
  0x16   :  { %s2920_s28 = smov 0  }
  0x17 LB: > { %3404 = sst [smem:[#allocation16_spill]] %s2785_s23  ;;  %s2942_s29 = sadd.s32 4294967295, %s2809_s28   ;;  %s2809_s28 = sphi %s2920_s28, %s3435_s28   ;;  %s2805_s27 = sphi %s2918_s27, %s3441_s27   ;;  %s2801_s26 = sphi %s2916_s26, %s3440_s26   ;;  %s2797_s25 = sphi %s2914_s25, %s3439_s25   ;;  %s2793_s24 = sphi %s2912_s24, %s3438_s24   ;;  %s2789_s0 = sphi %s2910_s0, %s3437_s0   ;;  %s2785_s23 = sphi %s2908_s23, %s3436_s23  }
  0x18   : > { %3405 = sst [smem:[#allocation17_spill]] %s2789_s0  ;;  %s2283_s30 = sadd.s32 4294967294, %s2809_s28  }
  0x19   : > { %3406 = sst [smem:[#allocation18_spill]] %s2793_s24  ;;  %s2946_s16 = sadd.s32 1, %s2809_s28  }
  0x1a   : > { %3407 = sst [smem:[#allocation19_spill]] %s2801_s26  ;;  %s181_s19 = sadd.s32 1, %s2805_s27 }
  0x1b   : > { %3408 = sst [smem:[#allocation20_spill]] %s2805_s27  ;;  %p194_p5 = scmp.ne.s32.totalorder %s2801_s26, %s2797_s25 }
  0x1c   : > { %3409 = sst [smem:[#allocation21_spill]] %s2809_s28  ;;  %p3396_p6 = scmp.eq.s32.totalorder %s2942_s29, 0 }
  0x1d   : > { %3410 = sst [smem:[#allocation22_spill]] %s2946_s16  ;;  %s379_s20 = ssub.s32 %s2809_s28, %s2946_s16 }
  0x1e   : > { %s176_s17 = sld [smem:[#allocation3 + %s2809_s28]]  ;;  %s382_s21 = sadd.s32 1, %s2793_s24 }
  0x1f   : > { %s177_s18 = sld [smem:[#allocation3 + %s2946_s16]]  ;;  %p2958_p7 = por %p3396_p6, %p194_p5 }
  0x20   : > { %p380_p8 = scmp.eq.s32.totalorder %s379_s20, 0  ;;  %p392_p9 = scmp.ne.s32.totalorder %s2793_s24, %s2789_s0 }
  0x21   : > { %s3411_s22 = scalar_select %p2958_p7, 1, 0 }
  0x22   : > { %p393_p10 = scmp.eq.s32.totalorder %s2942_s29, 1  ;;  %p398_p13 = scmp.ne.s32.totalorder %s2789_s0, %s2785_s23 }
  0x23   : > { %s2966_s15 = scalar_select %p380_p8, %s2793_s24, %s382_s21  }
  0x24   : > { %p2968_p11 = por %p393_p10, %p392_p9  ;;  %p399_p0 = scmp.eq.s32.totalorder %s2283_s30, 1 }
  0x25   : > { %3412 = sst [smem:[#allocation23_spill]] %s2966_s15  ;;  %s178_s14 = ssub.s32 %s176_s17, %s177_s18 }
  0x26   : > { %s3413_s25 = scalar_select %p2968_p11, 1, 0 }
  0x27   : > { %p179_p12 = scmp.eq.s32.totalorder %s178_s14, 0  ;;  %p2284_p1 = scmp.ge.s32.totalorder %s2809_s28, 1 }
  0x28   : > { %3414 = sst [smem:[#allocation24_spill]] %s3413_s25  ;;  %p2978_p2 = por %p399_p0, %p398_p13 }
  0x29   : > { %s2976_s26 = scalar_select %p179_p12, %s2805_s27, %s181_s19  }
  0x2a   : > { %s3416_s16 = scalar_select %p2978_p2, 1, 0 }
  0x2b   : > { %3415 = sst [smem:[#allocation25_spill]] %s2976_s26  ;;  %p406_p3 = scmp.lt.s32.totalorder %s2809_s28, 3 }
  0x2c   : > { %3417 = sst [smem:[#allocation26_spill]] %s3416_s16  ;;  %s2812_s19 = smov [#allocation4]  }
  0x2d   : > { %s2504_s20 = scalar_select %p2958_p7, [#allocation3], [#allocation10] }
  0x2e   : > { %p2985_p4 = pnand %p2284_p1, %p406_p3  ;;  %s452_s21 = sshll.u32 %s2812_s19, 4  ;;  %s3010_s21 = int_to_ptr.vmem [resolvable:$true] %s452_s21 }
  0x2f   : > { %s2505_s14 = scalar_select %p2958_p7, %s2942_s29, 0 }
  0x30   : > { %s3418_s17 = scalar_select %p2985_p4, 1, 0 }
  0x31   : > { %p2514_p5 = pneg %p2985_p4  ;;  %s3443_s20 = smov (%p2985_p4, %s2504_s20), [#allocation11] }
  0x32   : > { %s3445_s14 = smov (%p2985_p4, %s2505_s14), 0  ;;  %s2813_s26 = smov [#allocation7]  }
  0x33   : > { %p3000_p8 = pnand %p2514_p5, %p2958_p7  ;;  %s445_s18 = sld [smem:[%s3443_s20 + %s3445_s14]] }
  0x34   : > { %s480_s27 = sshll.u32 %s2813_s26, 4  ;;  %p3006_p9 = pnand %p2514_p5, %p3396_p6  ;;  %s3012_s27 = int_to_ptr.vmem [resolvable:$true] %s480_s27 }
  0x35   : > { %p2663_p12 = pneg %p3000_p8  ;;  %s2666_s14 = scalar_lea.hbm %s3374_s6, 512 }
  0x36   : > { %s3420_s15 = scalar_select %p3006_p9, 1, 0 }
  0x39   : > { %s2357_s24 = sshll.u32 %s445_s18, 8 }
  0x3a   : > { %s451_s28 = scalar_lea.hbm %s3374_s6, %s2357_s24 }
  0x3b   : > { %s2661_s25 = scalar_lea.hbm %s451_s28, 256  ;;  %p2667_p1 = scmp.lt.s32.totalorder %s451_s28, %s3374_s6 }
  0x3c   : > { %p2662_p10 = scmp.ne.s32.totalorder %s451_s28, %s2661_s25  ;;  %p2668_p3 = scmp.lt.s32.totalorder %s2666_s14, %s2661_s25 }
  0x3e   : > { %p2664_p13 = pnand %p2663_p12, %p2662_p10  ;;  %p2669_p5 = por %p2668_p3, %p2667_p1 }
  0x40   : > { %p2665_p0 = pneg %p2664_p13 }
  0x42   : > { %p2670_p6 = pnand %p2669_p5, %p2665_p0 }
  0x44   : > { %2673 = shalt.err (!%p2670_p6)
}
  0x45   : > { %s2674_s23 = scalar_lea.vmem %s3010_s21, 256  ;;  %p2682_p13 = scmp.lt.s32.totalorder %s3010_s21, %s3010_s21 }
  0x46   : > { %p2675_p2 = scmp.ne.s32.totalorder %s3010_s21, %s2674_s23  ;;  %p2683_p7 = scmp.lt.s32.totalorder %s2674_s23, %s2674_s23 }
  0x48   : > { %p2677_p11 = pnand %p2675_p2, %p2663_p12  ;;  %p2684_p4 = por %p2683_p7, %p2682_p13 }
  0x4a   : > { %p2678_p10 = pneg %p2677_p11 }
  0x4c   : > { %p2685_p9 = pnand %p2684_p4, %p2678_p10 }
  0x4e   : > { %2688 = shalt.err (!%p2685_p9)
}
  0x4f   : > { %s2814_s24 = smov 64   ;;  %s2815_s0 = smov 4  }
  0x50   : > { %2519 = dma.hbm_to_vmem [thread:$0]  (!%p3000_p8), %s451_s28, 256, %s3010_s21, [#allocation5], %s2814_s24, %s2814_s24, %s2815_s0  }
  0x51   : > { %p3421_p6 = scmp.ne.s32.totalorder %s3420_s15, 0  ;;  %s2700_s16 = scalar_lea.vmem %s3012_s27, 512 }
  0x52   : > { %p2701_p11 = scmp.ne.s32.totalorder %s3012_s27, %s2700_s16  ;;  %p2708_p7 = scmp.lt.s32.totalorder %s3012_s27, %s3012_s27 }
  0x53   : > { %p2691_p0 = pneg %p3421_p6  ;;  %p2709_p4 = scmp.lt.s32.totalorder %s2700_s16, %s2700_s16 }
  0x55   : > { %p2703_p2 = pnand %p2701_p11, %p2691_p0  ;;  %p2710_p9 = por %p2709_p4, %p2708_p7 }
  0x57   : > { %p2704_p12 = pneg %p2703_p2 }
  0x59   : > { %p2711_p1 = pnand %p2710_p9, %p2704_p12 }
  0x5b   : > { %2714 = shalt.err (!%p2711_p1)
}
  0x5c   : > { %2522 = dma.hbm_to_vmem [thread:$0]  (!%p3421_p6), %s3378_s10, 512, %s3012_s27, [#allocation8], %s2814_s24, %s2814_s24, %s2815_s0  }
  0x5d   : > { %p3422_p8 = scmp.ne.s32.totalorder %s3418_s17, 0 }
  0x5e   : > { %p3423_p3 = scmp.ne.s32.totalorder (!%p3422_p8), %s3411_s22, 0 }
  0x5f   : > { %521 = sbr.rel (%p3422_p8) target bundleno = 2738 (0xab2), region = 76 }
  0x64   : > { %2772 = dma.done.wait (%p3423_p3), [#allocation5], 256  }
  0x65   : > { %2774 = vsyncadd (%p3423_p3), [#allocation5], 4294967040  ;;  %p3424_p5 = scmp.eq.s32.totalorder %s2942_s29, 0 }
  0x67   : > { %2776 = dma.done.wait (%p3424_p5), [#allocation8], 512   ;;  %p3425_p10 = pmov %p3424_p5 }
  0x68   : > { %p596_p13 = scmp.lt.s32.totalorder %s2942_s29, 1  ;;  %v2816_v0 = vmov 0.0   ;;  %s610_s15 = sld [smem:[#allocation3 + %s2942_s29]]  ;;  %vm2817_vm0 = vmmov 0   ;;  %vm659_vm1 = vcmask 261120   ;;  %v2818_v7 = vmov 0  }
  0x69   : > { %2778 = vsyncadd (%p3425_p10), [#allocation8], 4294966784  ;;  %2408 = vmatprep.subr.bf16.mxu1 %v2816_v0  ;;  %2400 = vmatprep.subr.bf16.mxu0 %v2816_v0  ;;  %s603_s27 = sld [smem:[#allocation3 + %s2942_s29]]  ;;  %v643_v10 = vlaneseq  ;;  %s2819_s14 = smov 112   ;;  %v2820_v37 = vmov 1983009808  }
  0x6a   : > { %2412 = vmatprep.mubr.msk.bf16.mxu1 %vm2817_vm0, %v2816_v0  ;;  %2404 = vmatprep.mubr.msk.bf16.mxu0 %vm2817_vm0, %v2816_v0  ;;  %s3064_s28 = scalar_select %p596_p13, %s2942_s29, 1  ;;  %v829_v38 = vunpack.c.l.s4 %v2820_v37  ;;  %v2821_v41 = vmov 1934713408   ;;  %vm1247_vm2 = vcmask 130048   ;;  %vm1374_vm3 = vcmask 1043456  }
  0x6b   : > { %2602 = vset.pattern.permute.xlu0 %v2818_v7  ;;  %2601 = vset.pattern.permute.xlu1 %v2818_v7  ;;  %s617_s25 = sld [smem:[#allocation3 + %s2942_s29]]  ;;  %v3102_v11 = vshrl.u32 %v643_v10, 7  ;;  %v837_v42 = vunpack.c.l.s4 %v2821_v41  ;;  %vm1340_vm4 = vcmask 64512   ;;  %vm1747_vm5 = vcmask 15360  }
  0x6c   : > { %s2292_s22 = sshll.u32 %s3064_s28, 3  ;;  %s625_s17 = sld [smem:[#allocation3 + %s2942_s29]]  ;;  %v830_v40 = vunpack.c.0.s8 %v829_v38  ;;  %vm1877_vm6 = vcmask 523264  }
  0x6d   : > { %s599_s21 = scalar_lea.vmem %s3369_s1, %s2292_s22  ;;  %v709_v12 = vsub.s32 1, %v3102_v11  ;;  %v3111_v14 = vsub.s32 0, %v3102_v11  ;;  %v769_v30 = vsub.s32 2, %v3102_v11  ;;  %v838_v44 = vunpack.c.0.s8 %v837_v42  ;;  %s602_s24 = scalar_lea.vmem %s3370_s2, %s3064_s28 }
  0x6e   : > { %p611_p6 = scmp.lt.s32.totalorder %s610_s15, 1  ;;  %v3076_v2 = vld [vmem:[%s599_s21] sm:$0xff]  ;;  %v3124_v43 = vsub.s32 %v830_v40, %v3102_v11  ;;  %s2822_s28 = smov 16  }
  0x6f   : > { %p604_p0 = scmp.lt.s32.totalorder %s603_s27, 1  ;;  %v633_v6 = vpack.c.bf16 %v3076_v2, %v3076_v2  ;;  %v3129_v47 = vsub.s32 %v838_v44, %v3102_v11  ;;  %s2823_s21 = smov 127  }
  0x70   : > { %s3447_s15 = smov (!%p611_p6, %s610_s15), 1 }
  0x71   : > { %s3449_s27 = smov (!%p604_p0, %s603_s27), 1  ;;  %s2359_s26 = sshll.u32 %s3447_s15, 4 }
  0x72   : > { %s615_s19 = scalar_lea.vmem %s3372_s4, %s2359_s26  ;;  %s2358_s23 = sshll.u32 %s3449_s27, 4 }
  0x73   : > { %v2603_v1 = vld [vmem:[%s615_s19 + $0x8] sm:$0xff]   ;;  %s608_s16 = scalar_lea.vmem %s3371_s3, %s2358_s23  ;;  %v2605_v4 = vld [vmem:[%s615_s19] sm:$0xff]   ;;  %p618_p11 = scmp.lt.s32.totalorder %s617_s25, 1 }
  0x74   : > { %v2604_v3 = vld [vmem:[%s608_s16 + $0x8] sm:$0xff]   ;;  %2409 = vmatpush3.bf16.msra.mxu1 %v2603_v1  ;;  %v2606_v5 = vld [vmem:[%s608_s16] sm:$0xff]   ;;  %p626_p2 = scmp.lt.s32.totalorder %s625_s17, 1  ;;  %s3426_s23 = sld [smem:[#allocation17_spill]] }
  0x75   : > { %2401 = vmatpush3.bf16.msra.mxu0 %v2604_v3  ;;  %2410 = vmatprep.subr.bf16.mxu1 %v2816_v0  ;;  %s3451_s25 = smov (!%p618_p11, %s617_s25), 1  ;;  %s3427_s16 = sld [smem:[#allocation27_spill]] }
  0x76   : > { %2402 = vmatprep.subr.bf16.mxu0 %v2816_v0  ;;  %s2360_s18 = sshll.u32 %s3451_s25, 4  ;;  %s3453_s17 = smov (!%p626_p2, %s625_s17), 1 }
  0x77   : > { %s622_s22 = scalar_lea.vmem %s3373_s5, %s2360_s18  ;;  %s2299_s30 = sshll.u32 %s3453_s17, 3 }
  0x78   : > { %2411 = vmatpush3.bf16.msra.mxu1 %v2605_v4  ;;  %v2607_v8 = vld [vmem:[%s622_s22 + $0x8] sm:$0xff]   ;;  %v2608_v9 = vld [vmem:[%s622_s22] sm:$0xff]   ;;  %s629_s20 = scalar_lea.vmem %s3375_s7, %s2299_s30  ;;  %s3428_s18 = sld [smem:[#allocation24_spill]] }
  0x79   : > { %2403 = vmatpush3.bf16.msra.mxu0 %v2606_v5  ;;  %2424 = vmatprep.subr.bf16.mxu1 %v2816_v0  ;;  %v3108_v13 = vld [vmem:[%s629_s20] sm:$0x3f]  ;;  %s2354_s15 = sshll.u32 %s2942_s29, 7  ;;  %s2824_s19 = smov [#allocation9]  }
  0x7a   : > { %2416 = vmatprep.subr.bf16.mxu0 %v2816_v0  ;;  %v710_v15 = vrot.slane %v3108_v13, %v709_v12  ;;  %v646_v16 = vrot.slane %v3108_v13, %v3111_v14  ;;  %v770_v31 = vrot.slane %v3108_v13, %v769_v30 }
  0x7b   : > { %2413 = vmatmul.mubr.msk.bf16.vlgmr.msra.gmra.mxu1 %vm659_vm1, %v633_v6 }
  0x7c   : > { %2405 = vmatmul.mubr.msk.bf16.vlgmr.msra.gmra.mxu0 %vm659_vm1, %v633_v6  ;;  %2426 = vmatprep.mubr.msk.bf16.mxu1 %vm2817_vm0, %v2816_v0 }
  0x7d   : > { %2420 = vmatprep.mubr.msk.bf16.mxu0 %vm2817_vm0, %v2816_v0  ;;  %2417 = vmatpush3.bf16.msra.mxu0 %v2607_v8 }
  0x7e   : > { %2418 = vmatprep.subr.bf16.mxu0 %v2816_v0  ;;  %p3430_p7 = scmp.ne.s32.totalorder %s3428_s18, 0 }
  0x81   : > { %2419 = vmatpush3.bf16.msra.mxu0 %v2608_v9 }
  0x82   : > { %2430 = vmatprep.subr.bf16.mxu0 %v2816_v0 }
  0x84   : > { %2421 = vmatmul.mubr.msk.bf16.vlgmr.msra.gmra.mxu0 %vm659_vm1, %v633_v6 }
  0x85   : > { %2432 = vmatprep.mubr.msk.bf16.mxu0 %vm2817_vm0, %v2816_v0 }
 0x13b   : > { %v757_v17 = vpop.f32.mrf.mxu1 }
 0x13c   : > { %v758_v18 = vadd.f32 %v757_v17, %v710_v15  ;;  %v697_v19 = vpop.f32.mrf.mxu0 }
 0x13d   : > { %v698_v20 = vadd.f32 %v697_v19, %v646_v16  ;;  %v2414_v21 = vpop.f32.mrf.mxu1 }
 0x13e   : > { %v963_v22 = vpack.c.bf16 %v758_v18, %v758_v18  ;;  %v2406_v23 = vpop.f32.mrf.mxu0 }
 0x13f   : > { %v823_v24 = vmul.f32 0.25, %v698_v20  ;;  %v760_v25 = vpop.f32.mrf.mxu1 }
 0x140   : > { %965 = vrot.lane.b32.xlu0 %v963_v22, %s2819_s14  ;;  %v700_v26 = vpop.f32.mrf.mxu0  ;;  %v973_v45 = vrot.slane %v963_v22, %v3124_v43 }
 0x141   : > { %v824_v27 = vpack.c.bf16 %v823_v24, %v823_v24  ;;  %v2415_v28 = vpop.f32.mrf.mxu1 }
 0x142   : > { %v2407_v29 = vpop.f32.mrf.mxu0  ;;  %v974_v48 = vcombine.high %v973_v45, %v2818_v7  ;;  %v981_v50 = vrot.slane %v973_v45, %v3129_v47 }
 0x143   : > { %v834_v46 = vrot.slane %v824_v27, %v3124_v43 }
 0x144   : > { %826 = vrot.lane.b32.xlu0 %v824_v27, %s2819_s14  ;;  %v817_v32 = vpop.f32.mrf.mxu0  ;;  %v988_v51 = vrot.slane %v974_v48, %v3129_v47  ;;  %v989_v54 = vcombine.high %v981_v50, %v2818_v7  ;;  %v1020_v62 = vshrl.u32 %v981_v50, 16 }
 0x145   : > { %v818_v33 = vadd.f32 %v817_v32, %v770_v31  ;;  %v835_v49 = vcombine.high %v834_v46, %v2818_v7  ;;  %v842_v52 = vrot.slane %v834_v46, %v3129_v47 }
 0x146   : > { %v2422_v34 = vpop.f32.mrf.mxu0  ;;  %v990_v56 = vcombine.high %v988_v51, %v2818_v7  ;;  %v1028_v63 = vshrl.u32 %v989_v54, 16  ;;  %v1036_v1 = vshrl.u32 %v988_v51, 16 }
 0x147   : > { %v3120_v35 = vpack.c.bf16 %v818_v33, %v818_v33  ;;  %v849_v53 = vrot.slane %v835_v49, %v3129_v47  ;;  %v850_v58 = vcombine.high %v842_v52, %v2818_v7  ;;  %v881_v3 = vshrl.u32 %v842_v52, 16 }
 0x148   : > { %v820_v36 = vpop.f32.mrf.mxu0  ;;  %v1044_v5 = vshrl.u32 %v990_v56, 16 }
 0x149   : > { %1104 = vrot.lane.b32.xlu0 %v3120_v35, %s2819_s14  ;;  %v851_v59 = vcombine.high %v849_v53, %v2818_v7  ;;  %v889_v10 = vshrl.u32 %v850_v58, 16  ;;  %v897_v15 = vshrl.u32 %v849_v53, 16 }
 0x14a   : > { %v2423_v39 = vpop.f32.mrf.mxu0 }
 0x14b   : > { %v905_v16 = vshrl.u32 %v851_v59, 16 }
 0x1b2   : > { %v966_v55 = vpop.permute.xlu0 %965 }
 0x1b3   : > { %v998_v57 = vrot.slane %v966_v55, %v3124_v43 }
 0x1b5   : > { %v999_v60 = vcombine.high %v998_v57, %v2818_v7  ;;  %v1006_v61 = vrot.slane %v998_v57, %v3129_v47 }
 0x1b6   : > { %v827_v4 = vpop.permute.xlu0 %826 }
 0x1b7   : > { %v1013_v6 = vrot.slane %v999_v60, %v3129_v47  ;;  %v1014_v8 = vcombine.high %v1006_v61, %v2818_v7  ;;  %v1021_v9 = vshrl.u32 %v1006_v61, 16  ;;  %v859_v17 = vrot.slane %v827_v4, %v3124_v43 }
 0x1b8   : > { %v1018_v19 = vpack.i.b16 %v1006_v61, %v981_v50 }
 0x1b9   : > { %v1015_v18 = vcombine.high %v1013_v6, %v2818_v7  ;;  %v1022_v20 = vpack.i.b16 %v1021_v9, %v1020_v62  ;;  %v1029_v21 = vshrl.u32 %v1014_v8, 16  ;;  %v1034_v22 = vpack.i.b16 %v1013_v6, %v988_v51 }
 0x1ba   : > { %v1037_v23 = vshrl.u32 %v1013_v6, 16  ;;  %v860_v24 = vcombine.high %v859_v17, %v2818_v7  ;;  %v867_v25 = vrot.slane %v859_v17, %v3129_v47  ;;  %v1026_v26 = vpack.i.b16 %v1014_v8, %v989_v54 }
 0x1bb   : > { %v1030_v27 = vpack.i.b16 %v1029_v21, %v1028_v63  ;;  %v1042_v28 = vpack.i.b16 %v1015_v18, %v990_v56  ;;  %v1045_v29 = vshrl.u32 %v1015_v18, 16  ;;  %v1048_v31 = vcombine.low %v1018_v19, %v1034_v22 }
 0x1bc   : > { %v1038_v30 = vpack.i.b16 %v1037_v23, %v1036_v1  ;;  %v874_v32 = vrot.slane %v860_v24, %v3129_v47  ;;  %v875_v33 = vcombine.high %v867_v25, %v2818_v7  ;;  %v879_v37 = vpack.i.b16 %v867_v25, %v842_v52 }
 0x1bd   : > { %v1046_v34 = vpack.i.b16 %v1045_v29, %v1044_v5  ;;  %v1056_v36 = vcombine.low %v1026_v26, %v1042_v28  ;;  %v882_v38 = vshrl.u32 %v867_v25, 16  ;;  %v1055_v39 = vrot.slane %v1048_v31, %v3124_v43  ;;  %v1105_v31 = vpop.permute.xlu0 %1104 }
 0x1be   : > { %v1072_v40 = vcombine.low %v1022_v20, %v1038_v30  ;;  %v876_v41 = vcombine.high %v874_v32, %v2818_v7  ;;  %v887_v42 = vpack.i.b16 %v875_v33, %v850_v58  ;;  %v890_v46 = vshrl.u32 %v875_v33, 16 }
 0x1bf   : > { %v1080_v44 = vcombine.low %v1030_v27, %v1046_v34  ;;  %v883_v45 = vpack.i.b16 %v882_v38, %v881_v3  ;;  %v895_v48 = vpack.i.b16 %v874_v32, %v849_v53  ;;  %v898_v49 = vshrl.u32 %v874_v32, 16 }
 0x1c0   : > { %v903_v50 = vpack.i.b16 %v876_v41, %v851_v59  ;;  %v906_v51 = vshrl.u32 %v876_v41, 16  ;;  %v1063_v54 = vrot.slane %v1056_v36, %v3124_v43  ;;  %v891_v55 = vpack.i.b16 %v890_v46, %v889_v10 }
 0x1c1   : > { %v909_v56 = vcombine.low %v879_v37, %v895_v48  ;;  %v1079_v52 = vrot.slane %v1072_v40, %v3124_v43  ;;  %v1087_v57 = vrot.slane %v1080_v44, %v3124_v43  ;;  %v899_v60 = vpack.i.b16 %v898_v49, %v897_v15 }
 0x1c2   : > { %v907_v61 = vpack.i.b16 %v906_v51, %v905_v16  ;;  %v917_v62 = vcombine.low %v887_v42, %v903_v50  ;;  %v1064_v63 = vcombine.low %v1055_v39, %v1063_v54  ;;  %v1112_v27 = vrot.slane %v3120_v35, %v3124_v43 }
 0x1c3   : > { %v1088_v58 = vcombine.low %v1079_v52, %v1087_v57  ;;  %v933_v3 = vcombine.low %v883_v45, %v899_v60  ;;  %v916_v4 = vrot.slane %v909_v56, %v3124_v43  ;;  %v1137_v33 = vrot.slane %v1105_v31, %v3124_v43 }
 0x1c4   : > { %v924_v1 = vrot.slane %v917_v62, %v3124_v43  ;;  %v941_v53 = vcombine.low %v891_v55, %v907_v61  ;;  %v1071_v59 = vrot.slane %v1064_v63, %v3129_v47  ;;  %v1113_v28 = vcombine.high %v1112_v27, %v2818_v7 }
 0x1c5   : > { %v1095_v5 = vrot.slane %v1088_v58, %v3129_v47  ;;  %v940_v6 = vrot.slane %v933_v3, %v3124_v43  ;;  %v1120_v29 = vrot.slane %v1112_v27, %v3129_v47  ;;  %v1138_v36 = vcombine.high %v1137_v33, %v2818_v7 }
 0x1c6   : > { %v948_v8 = vrot.slane %v941_v53, %v3124_v43  ;;  %v925_v9 = vcombine.low %v916_v4, %v924_v1  ;;  %v1099_v15 = vshrl.u32 %v1071_v59, 16  ;;  %v1127_v30 = vrot.slane %v1113_v28, %v3129_v47 }
 0x1c7   : > { %v1098_v10 = vpack.i.b16 %v1095_v5, %v1071_v59  ;;  %v1100_v16 = vshrl.u32 %v1095_v5, 16  ;;  %v1128_v32 = vcombine.high %v1120_v29, %v2818_v7  ;;  %v1145_v37 = vrot.slane %v1137_v33, %v3129_v47 }
 0x1c8   : > { %v949_v17 = vcombine.low %v940_v6, %v948_v8  ;;  %v932_v22 = vrot.slane %v925_v9, %v3129_v47  ;;  %v1129_v34 = vcombine.high %v1127_v30, %v2818_v7  ;;  %v1159_v38 = vshrl.u32 %v1120_v29, 16 }
 0x1c9   : > { %v1252_v18 = vsel %vm1247_vm2, %v1098_v10, 0  ;;  %v1101_v19 = vpack.i.b16 %v1100_v16, %v1099_v15  ;;  %v1167_v39 = vshrl.u32 %v1128_v32, 16  ;;  %v1152_v35 = vrot.slane %v1138_v36, %v3129_v47 }
 0x1ca   : > { %2425 = vmatpush3.bf16.xpose.msra.mxu1 %v1252_v18  ;;  %v956_v20 = vrot.slane %v949_v17, %v3129_v47  ;;  %v960_v25 = vshrl.u32 %v932_v22, 16  ;;  %v1153_v40 = vcombine.high %v1145_v37, %v2818_v7  ;;  %v1160_v41 = vshrl.u32 %v1145_v37, 16 }
 0x1cb   : > { %v1298_v21 = vsel %vm1247_vm2, %v1101_v19, 0  ;;  %2436 = vmatprep.subr.bf16.mxu1 %v2816_v0  ;;  %v1175_v42 = vshrl.u32 %v1127_v30, 16  ;;  %v1157_v44 = vpack.i.b16 %v1145_v37, %v1120_v29  ;;  %v1183_v45 = vshrl.u32 %v1129_v34, 16  ;;  %v634_v19 = vld [vmem:[%s602_s24] sm:$0x1]  ;;  %s593_s24 = sand.u32 1, %s3426_s23  }
 0x1cc   : > { %2431 = vmatpush3.bf16.xpose.msra.mxu0 %v1298_v21  ;;  %v961_v23 = vshrl.u32 %v956_v20, 16  ;;  %v959_v24 = vpack.i.b16 %v956_v20, %v932_v22  ;;  %v1154_v46 = vcombine.high %v1152_v35, %v2818_v7  ;;  %v1165_v48 = vpack.i.b16 %v1153_v40, %v1128_v32  ;;  %s2291_s25 = sshll.u32 %s593_s24, 3  ;;  %s2118_s20 = scalar_lea.sflag [#allocation6], %s593_s24 }
 0x1cd   : > { %2442 = vmatprep.subr.bf16.mxu0 %v2816_v0  ;;  %v1168_v49 = vshrl.u32 %v1153_v40, 16  ;;  %v1161_v50 = vpack.i.b16 %v1160_v41, %v1159_v38  ;;  %v1173_v51 = vpack.i.b16 %v1152_v35, %v1127_v30  ;;  %v1176_v54 = vshrl.u32 %v1152_v35, 16  ;;  %s595_s27 = scalar_lea.vmem [#allocation9], %s2291_s25  ;;  %s2719_s23 = sshll.u32 %s2824_s19, 4  ;;  %s2720_s23 = int_to_ptr.vmem [resolvable:$false] %s2719_s23 }
 0x1ce   : > { %v962_v26 = vpack.i.b16 %v961_v23, %v960_v25  ;;  %v1181_v56 = vpack.i.b16 %v1154_v46, %v1129_v34  ;;  %v1184_v52 = vshrl.u32 %v1154_v46, 16  ;;  %v2300_v20 = vadd.f32 -1.0, %v634_v19  ;;  %s2131_s22 = sshll.u32 %s595_s27, 4  ;;  %s2721_s29 = scalar_lea.vmem %s2720_s23, 256  ;;  %s2132_s22 = int_to_ptr.vmem [resolvable:$true] %s2131_s22 }
 0x1cf   : > { %v1169_v55 = vpack.i.b16 %v1168_v49, %v1167_v39  ;;  %v1177_v57 = vpack.i.b16 %v1176_v54, %v1175_v42  ;;  %v1187_v60 = vcombine.low %v1157_v44, %v1173_v51  ;;  %v2609_v49 = vld [vmem:[#allocation4 + $0x8] sm:$0xff]   ;;  %s2715_s14 = scalar_lea.vmem %s2132_s22, 128  ;;  %p2722_p1 = scmp.lt.s32.totalorder %s2132_s22, %s2720_s23 }
 0x1d0   : > { %v1185_v61 = vpack.i.b16 %v1184_v52, %v1183_v45  ;;  %v1195_v62 = vcombine.low %v1165_v48, %v1181_v56  ;;  %v636_v21 = vmul.f32 1e+09, %v2300_v20  ;;  %p2716_p12 = scmp.ne.s32.totalorder %s2132_s22, %s2715_s14  ;;  %p2723_p8 = scmp.lt.s32.totalorder %s2721_s29, %s2715_s14 }
 0x1d1   : > { %2427 = vmatmul.mubr.msk.bf16.vlgmr.msra.gmra.mxu1 %vm1247_vm2, %v959_v24  ;;  %v1194_v63 = vrot.slane %v1187_v60, %v3124_v43  ;;  %v1211_v58 = vcombine.low %v1161_v50, %v1177_v57 }
 0x1d2   : > { %2438 = vmatprep.mubr.msk.bf16.mxu1 %vm2817_vm0, %v2816_v0  ;;  %v1219_v1 = vcombine.low %v1169_v55, %v1185_v61  ;;  %v1202_v3 = vrot.slane %v1195_v62, %v3124_v43  ;;  %v1245_v22 = vrot.slane %v636_v21, %v3111_v14  ;;  %p2717_p4 = pnand %p2716_p12, %p3430_p7  ;;  %p2724_p3 = por %p2723_p8, %p2722_p1 }
 0x1d3   : > { %2433 = vmatmul.mubr.msk.bf16.vlgmr.msra.gmra.mxu0 %vm1247_vm2, %v962_v26  ;;  %v1218_v53 = vrot.slane %v1211_v58, %v3124_v43 }
 0x1d4   : > { %2444 = vmatprep.mubr.msk.bf16.mxu0 %vm2817_vm0, %v2816_v0  ;;  %v1203_v59 = vcombine.low %v1194_v63, %v1202_v3  ;;  %v1226_v4 = vrot.slane %v1219_v1, %v3124_v43  ;;  %p2718_p9 = pneg %p2717_p4 }
 0x1d6   : > { %v1210_v5 = vrot.slane %v1203_v59, %v3129_v47  ;;  %v1227_v6 = vcombine.low %v1218_v53, %v1226_v4  ;;  %p2725_p5 = pnand %p2724_p3, %p2718_p9 }
 0x1d8   : > { %v1234_v8 = vrot.slane %v1227_v6, %v3129_v47  ;;  %v1238_v9 = vshrl.u32 %v1210_v5, 16 }
 0x1da   : > { %v1237_v10 = vpack.i.b16 %v1234_v8, %v1210_v5  ;;  %v1239_v15 = vshrl.u32 %v1234_v8, 16 }
 0x1dc   : > { %v1376_v16 = vsel %vm1374_vm3, %v1237_v10, 0  ;;  %v1240_v17 = vpack.i.b16 %v1239_v15, %v1238_v9 }
 0x1dd   : > { %2437 = vmatpush3.bf16.msra.mxu1 %v1376_v16 }
 0x1de   : > { %v1422_v18 = vsel %vm1374_vm3, %v1240_v17, 0  ;;  %2448 = vmatprep.subr.bf16.mxu1 %v2816_v0 }
 0x1df   : > { %2443 = vmatpush3.bf16.msra.mxu0 %v1422_v18 }
 0x1e0   : > { %2456 = vmatprep.subr.bf16.mxu0 %v2816_v0 }
 0x291   : > { %v1288_v23 = vpop.f32.mrf.mxu1 }
 0x292   : > { %v1289_v24 = vadd.f32 %v1288_v23, %v1245_v22 }
 0x293   : > { %v2428_v25 = vpop.f32.mrf.mxu1  ;;  %v1334_v26 = vpop.f32.mrf.mxu0 }
 0x294   : > { %v1335_v27 = vadd.f32 %v1334_v26, %v1245_v22  ;;  %v1341_v28 = vsel %vm1340_vm4, %v1289_v24, -inf }
 0x295   : > { %1342 = vmax.xlane.f32.xlu1 %v1341_v28  ;;  %v1291_v29 = vpop.f32.mrf.mxu1  ;;  %v2434_v30 = vpop.f32.mrf.mxu0 }
 0x296   : > { %v1344_v33 = vsel %vm1340_vm4, %v1335_v27, -inf }
 0x297   : > { %v2429_v31 = vpop.f32.mrf.mxu1  ;;  %v1337_v32 = vpop.f32.mrf.mxu0 }
 0x298   : > { %v2610_v31 = vld [vmem:[#allocation4] sm:$0xff]  }
 0x299   : > { %1345 = vmax.xlane.f32.xlu1 %v1344_v33  ;;  %v2435_v34 = vpop.f32.mrf.mxu0 }
 0x31e   : > { %v1343_v36 = vpop.xlane.xlu1 %1342 }
 0x31f   : > { %v1353_v37 = vsub.f32 %v1289_v24, %v1343_v36  ;;  %v1347_v50 = vsub.f32 -inf, %v1343_v36 }
 0x321   : > { %v1355_v38 = vmul.f32 1.442695, %v1353_v37  ;;  %v1349_v51 = vmul.f32 1.442695, %v1347_v50 }
 0x322   : > { %v1346_v39 = vpop.xlane.xlu1 %1345 }
 0x323   : > { %v1354_v35 = vsub.f32 %v1335_v27, %v1346_v39  ;;  %2625 = vpow2.f32 %v1355_v38  ;;  %v1348_v54 = vsub.f32 -inf, %v1346_v39 }
 0x325   : > { %v1357_v40 = vmul.f32 1.442695, %v1354_v35  ;;  %v1351_v55 = vmul.f32 1.442695, %v1348_v54 }
 0x327   : > { %2627 = vpow2.f32 %v1357_v40 }
 0x328   : > { %2629 = vpow2.f32 %v1349_v51 }
 0x329   : > { %2631 = vpow2.f32 %v1351_v55 }
 0x330   : > { %v2626_v41 = vpop.eup %2625 }
 0x331   : > { %v1361_v42 = vsel %vm1340_vm4, %v2626_v41, 0.0  ;;  %v1369_v44 = vpack.c.bf16 %v2626_v41, %v2626_v41 }
 0x332   : > { %1362 = vadd.xlane.f32.xlu1 %v1361_v42 }
 0x333   : > { %2439 = vmatmul.mubr.msk.bf16.vlgmr.msra.gmra.mxu1 %vm1340_vm4, %v1369_v44 }
 0x334   : > { %v2628_v45 = vpop.eup %2627  ;;  %2452 = vmatprep.mubr.msk.bf16.mxu1 %vm2817_vm0, %v2816_v0  ;;  %2449 = vmatpush3.bf16.msra.mxu1 %v2609_v49 }
 0x335   : > { %v1364_v46 = vsel %vm1340_vm4, %v2628_v45, 0.0  ;;  %v1370_v48 = vpack.c.bf16 %v2628_v45, %v2628_v45  ;;  %2450 = vmatprep.subr.bf16.mxu1 %v2816_v0  ;;  %v2630_v56 = vpop.eup %2629 }
 0x336   : > { %1365 = vadd.xlane.f32.xlu0 %v1364_v46  ;;  %v1359_v57 = vmul.f32 0.0, %v2630_v56  ;;  %v2632_v60 = vpop.eup %2631 }
 0x337   : > { %2445 = vmatmul.mubr.msk.bf16.vlgmr.msra.gmra.mxu0 %vm1340_vm4, %v1370_v48  ;;  %v1360_v63 = vmul.f32 0.0, %v2632_v60 }
 0x338   : > { %2460 = vmatprep.mubr.msk.bf16.mxu0 %vm2817_vm0, %v2816_v0  ;;  %2451 = vmatpush3.bf16.msra.mxu1 %v2610_v31  ;;  %v2624_v31 = vld [vmem:[%s3380_s12 + $0x20] sm:$0xff]  }
 0x339   : > { %2464 = vmatprep.subr.bf16.mxu1 %v2816_v0 }
 0x3bb   : > { %v1363_v52 = vpop.xlane.xlu1 %1362 }
 0x3bc   : > { %v1367_v61 = vadd.f32 %v1363_v52, %v1359_v57 }
 0x3be   : > { %2633 = vrcp.f32 %v1367_v61 }
 0x3bf   : > { %v1366_v62 = vpop.xlane.xlu0 %1365 }
 0x3c0   : > { %v1368_v58 = vadd.f32 %v1366_v62, %v1360_v63 }
 0x3c2   : > { %2635 = vrcp.f32 %v1368_v58 }
 0x3cb   : > { %v2634_v53 = vpop.eup %2633 }
 0x3cf   : > { %v2636_v9 = vpop.eup %2635 }
 0x3f3   : > { %v1412_v1 = vpop.f32.mrf.mxu1 }
 0x3f4   : > { %v1464_v3 = vadd.f32 %v1412_v1, %v1359_v57 }
 0x3f5   : > { %v2440_v59 = vpop.f32.mrf.mxu1 }
 0x3f6   : > { %v1468_v4 = vmul.f32 %v2634_v53, %v1464_v3  ;;  %v2611_v59 = vld [vmem:[%s3376_s8 + $0x8] sm:$0xff]  }
 0x3f7   : > { %v1415_v5 = vpop.f32.mrf.mxu1  ;;  %v1458_v6 = vpop.f32.mrf.mxu0  ;;  %2457 = vmatpush3.bf16.msra.mxu0 %v2611_v59 }
 0x3f8   : > { %v1465_v8 = vadd.f32 %v1458_v6, %v1360_v63  ;;  %v1470_v16 = vcombine.high %v1468_v4, %v2816_v0  ;;  %v1477_v19 = vrot.slane %v1468_v4, %v3124_v43  ;;  %v2612_v4 = vld [vmem:[#allocation7 + $0x8] sm:$0xff]   ;;  %v2614_v5 = vld [vmem:[#allocation7] sm:$0xff]   ;;  %2458 = vmatprep.subr.bf16.mxu0 %v2816_v0 }
 0x3f9   : > { %v2441_v10 = vpop.f32.mrf.mxu1  ;;  %v2446_v15 = vpop.f32.mrf.mxu0 }
 0x3fa   : > { %v1469_v17 = vmul.f32 %v2636_v9, %v1465_v8  ;;  %v1484_v23 = vrot.slane %v1470_v16, %v3124_v43  ;;  %v1672_v10 = vsub.s32 4, %v3102_v11  ;;  %v1677_v15 = vsub.s32 5, %v3102_v11 }
 0x3fb   : > { %v1461_v18 = vpop.f32.mrf.mxu0 }
 0x3fc   : > { %v1485_v20 = vcombine.high %v1469_v17, %v2816_v0  ;;  %v1492_v21 = vrot.slane %v1469_v17, %v3124_v43  ;;  %v1673_v16 = vrot.slane %v3108_v13, %v1672_v10 }
 0x3fd   : > { %v2447_v22 = vpop.f32.mrf.mxu0 }
 0x3fe   : > { %v1499_v24 = vrot.slane %v1485_v20, %v3124_v43  ;;  %v1500_v25 = vcombine.low %v1477_v19, %v1492_v21  ;;  %v1501_v26 = vcombine.high %v1477_v19, %v1492_v21  ;;  %v1678_v19 = vrot.slane %v3108_v13, %v1677_v15  ;;  %v2615_v22 = vld [vmem:[#allocation7 + $0x18] sm:$0xff]  }
 0x400   : > { %v1508_v27 = vrot.slane %v1500_v25, %v3129_v47  ;;  %v1515_v28 = vrot.slane %v1501_v26, %v3129_v47  ;;  %v1516_v29 = vcombine.low %v1484_v23, %v1499_v24  ;;  %v1517_v30 = vcombine.high %v1484_v23, %v1499_v24  ;;  %v2616_v24 = vld [vmem:[#allocation7 + $0x10] sm:$0xff]   ;;  %v2618_v25 = vld [vmem:[%s3380_s12 + $0x10] sm:$0xff]   ;;  %v2619_v26 = vld [vmem:[%s3380_s12 + $0x8] sm:$0xff]  }
 0x402   : > { %v1524_v32 = vrot.slane %v1516_v29, %v3129_v47  ;;  %v1531_v33 = vrot.slane %v1517_v30, %v3129_v47  ;;  %v1536_v34 = vcombine.low %v1508_v27, %v1515_v28  ;;  %v2314_v36 = vcombine.high %v1508_v27, %v1515_v28  ;;  %v2620_v27 = vld [vmem:[%s3380_s12 + $0x38] sm:$0xff]   ;;  %v2621_v28 = vld [vmem:[%s3380_s12] sm:$0xff]   ;;  %v2622_v29 = vld [vmem:[%s3380_s12 + $0x30] sm:$0xff]  }
 0x403   : > { %v2623_v30 = vld [vmem:[%s3380_s12 + $0x28] sm:$0xff]  }
 0x404   : > { %v1543_v37 = vrot.slane %v1536_v34, %v3124_v43  ;;  %v1551_v38 = vrot.slane %v2314_v36, %v3124_v43  ;;  %v1552_v39 = vcombine.low %v1524_v32, %v1531_v33  ;;  %v2315_v35 = vcombine.high %v1524_v32, %v1531_v33  ;;  %v2319_v32 = vld [vmem:[%s3377_s9] ss:$0 sm:$0xff] }
 0x405   : > { %v2323_v33 = vld [vmem:[%s3379_s11] ss:$0 sm:$0xff] }
 0x406   : > { %v1559_v40 = vrot.slane %v1552_v39, %v3124_v43  ;;  %v1567_v41 = vrot.slane %v2315_v35, %v3124_v43  ;;  %v1568_v42 = vcombine.low %v1543_v37, %v1551_v38  ;;  %v1598_v43 = vsub.s32 3, %v3102_v11 }
 0x408   : > { %v1576_v44 = vcombine.low %v1559_v40, %v1567_v41  ;;  %v1575_v45 = vrot.slane %v1568_v42, %v3129_v47  ;;  %v1599_v55 = vrot.slane %v3108_v13, %v1598_v43  ;;  %v2617_v13 = vld [vmem:[%s3380_s12 + $0x18] sm:$0xff]  }
 0x40a   : > { %v1583_v46 = vrot.slane %v1576_v44, %v3129_v47 }
 0x40c   : > { %v1585_v48 = vcombine.high %v1575_v45, %v1583_v46  ;;  %v1584_v49 = vcombine.low %v1575_v45, %v1583_v46 }
 0x40e   : > { %1587 = vrot.lane.b32.xlu1 %v1585_v48, %s2822_s28  ;;  %v2334_v48 = vld [vmem:[%s3379_s11 + $0x1] ss:$0 sm:$0xff] }
 0x480   : > { %v1588_v50 = vpop.permute.xlu1 %1587 }
 0x481   : > { %v1590_v51 = vsel %vm1247_vm2, %v1584_v49, %v1588_v50 }
 0x482   : > { %v1591_v54 = vpack.c.bf16 %v1590_v51, %v1590_v51 }
 0x484   : > { %2453 = vmatmul.mubr.msk.bf16.vlgmr.msra.gmra.mxu1 %vm659_vm1, %v1591_v54 }
 0x485   : > { %2468 = vmatprep.mubr.msk.bf16.mxu1 %vm2817_vm0, %v2816_v0  ;;  %2465 = vmatpush3.bf16.msra.mxu1 %v2612_v4 }
 0x486   : > { %2466 = vmatprep.subr.bf16.mxu1 %v2816_v0 }
 0x489   : > { %2467 = vmatpush3.bf16.msra.mxu1 %v2614_v5 }
 0x48a   : > { %2484 = vmatprep.subr.bf16.mxu1 %v2816_v0 }
 0x544   : > { %v1649_v56 = vpop.f32.mrf.mxu1 }
 0x545   : > { %v1650_v52 = vadd.f32 %v1649_v56, %v1599_v55 }
 0x546   : > { %v2454_v47 = vpop.f32.mrf.mxu1 }
 0x547   : > { %v1655_v57 = vadd.f32 %v1650_v52, %v3076_v2  ;;  %v2613_v2 = vld [vmem:[%s3376_s8] sm:$0xff]  }
 0x548   : > { %v1652_v60 = vpop.f32.mrf.mxu1  ;;  %2459 = vmatpush3.bf16.msra.mxu0 %v2613_v2 }
 0x549   : > { %v1656_v61 = vsel %vm659_vm1, %v1655_v57, 0.0  ;;  %2472 = vmatprep.subr.bf16.mxu0 %v2816_v0 }
 0x54a   : > { %1657 = vadd.xlane.f32.xlu1 %v1656_v61  ;;  %v2455_v62 = vpop.f32.mrf.mxu1 }
 0x5d3   : > { %v1658_v63 = vpop.xlane.xlu1 %1657 }
 0x5d4   : > { %v1660_v58 = vmul.f32 0.03125, %v1658_v63 }
 0x5d6   : > { %v1661_v1 = vsub.f32 %v1655_v57, %v1660_v58 }
 0x5d8   : > { %v1662_v3 = vmul.f32 %v1661_v1, %v1661_v1 }
 0x5da   : > { %v1663_v53 = vsel %vm659_vm1, %v1662_v3, 0.0 }
 0x5db   : > { %1664 = vadd.xlane.f32.xlu0 %v1663_v53 }
 0x664   : > { %v1665_v6 = vpop.xlane.xlu0 %1664 }
 0x665   : > { %v1666_v8 = vmul.f32 0.03125, %v1665_v6 }
 0x667   : > { %v1667_v9 = vadd.f32 1e-12, %v1666_v8 }
 0x669   : > { %2637 = vrsqrt.f32 %v1667_v9 }
 0x676   : > { %v2638_v17 = vpop.eup %2637 }
 0x677   : > { %v1669_v18 = vmul.f32 %v2638_v17, %v1661_v1 }
 0x679   : > { %v1674_v20 = vmul.f32 %v1673_v16, %v1669_v18 }
 0x67b   : > { %v3252_v21 = vadd.f32 %v1678_v19, %v1674_v20 }
 0x67d   : > { %v1680_v23 = vpack.c.bf16 %v3252_v21, %v3252_v21 }
 0x67f   : > { %2461 = vmatmul.mubr.msk.bf16.vlgmr.msra.gmra.mxu0 %vm659_vm1, %v1680_v23  ;;  %2469 = vmatmul.mubr.msk.bf16.vlgmr.msra.gmra.mxu1 %vm659_vm1, %v1680_v23 }
 0x680   : > { %2485 = vmatpush3.bf16.msra.mxu1 %v2615_v22  ;;  %2488 = vmatprep.mubr.msk.bf16.mxu1 %vm2817_vm0, %v2816_v0 }
 0x681   : > { %2486 = vmatprep.subr.bf16.mxu1 %v2816_v0  ;;  %2480 = vmatprep.mubr.msk.bf16.mxu0 %vm2817_vm0, %v2816_v0 }
 0x682   : > { %2473 = vmatpush3.bf16.msra.mxu0 %v2617_v13 }
 0x683   : > { %2474 = vmatprep.subr.bf16.mxu0 %v2816_v0 }
 0x684   : > { %2487 = vmatpush3.bf16.msra.mxu1 %v2616_v24 }
 0x685   : > { %2492 = vmatprep.subr.bf16.mxu1 %v2816_v0 }
 0x686   : > { %2475 = vmatpush3.bf16.msra.mxu0 %v2618_v25 }
 0x687   : > { %2489 = vmatmul.mubr.msk.bf16.vlgmr.msra.gmra.mxu1 %vm659_vm1, %v1680_v23  ;;  %2476 = vmatprep.subr.bf16.mxu0 %v2816_v0 }
 0x688   : > { %2500 = vmatprep.mubr.msk.bf16.mxu1 %vm2817_vm0, %v2816_v0  ;;  %2493 = vmatpush3.bf16.msra.mxu1 %v2620_v27 }
 0x689   : > { %2494 = vmatprep.subr.bf16.mxu1 %v2816_v0 }
 0x68a   : > { %2477 = vmatpush3.bf16.msra.mxu0 %v2619_v26 }
 0x68b   : > { %2478 = vmatprep.subr.bf16.mxu0 %v2816_v0 }
 0x68c   : > { %2495 = vmatpush3.bf16.msra.mxu1 %v2622_v29 }
 0x68d   : > { %2496 = vmatprep.subr.bf16.mxu1 %v2816_v0 }
 0x68e   : > { %2479 = vmatpush3.bf16.msra.mxu0 %v2621_v28 }
 0x690   : > { %2497 = vmatpush3.bf16.msra.mxu1 %v2623_v30 }
 0x691   : > { %2498 = vmatprep.subr.bf16.mxu1 %v2816_v0 }
 0x694   : > { %2499 = vmatpush3.bf16.msra.mxu1 %v2624_v31  ;;  %v2327_v31 = vld [vmem:[%s3381_s13] ss:$0 sm:$0xff] }
 0x73f   : > { %v1741_v34 = vpop.f32.mrf.mxu0  ;;  %v1822_v36 = vpop.f32.mrf.mxu1 }
 0x740   : > { %v1742_v37 = vadd.f32 %v2319_v32, %v1741_v34  ;;  %v1823_v38 = vadd.f32 %v2323_v33, %v1822_v36  ;;  %v2347_v32 = vld [vmem:[%s3381_s13 + $0x1] ss:$0 sm:$0xff] }
 0x741   : > { %v2462_v39 = vpop.f32.mrf.mxu0  ;;  %v2470_v0 = vpop.f32.mrf.mxu1 }
 0x742   : > { %v1828_v35 = vmul.f32 %v1823_v38, %v1823_v38  ;;  %v1748_v40 = vsel %vm1747_vm5, %v1742_v37, -inf }
 0x743   : > { %v1825_v41 = vpop.f32.mrf.mxu1  ;;  %1749 = vmax.xlane.f32.xlu0 %v1748_v40  ;;  %v1744_v42 = vpop.f32.mrf.mxu0 }
 0x744   : > { %v1829_v44 = vmul.f32 %v1828_v35, %v1823_v38 }
 0x745   : > { %v2463_v45 = vpop.f32.mrf.mxu0  ;;  %v2471_v46 = vpop.f32.mrf.mxu1 }
 0x746   : > { %v1830_v49 = vmul.f32 0.044715, %v1829_v44 }
 0x747   : > { %v1980_v50 = vpop.f32.mrf.mxu1 }
 0x748   : > { %v1831_v51 = vadd.f32 %v1830_v49, %v1823_v38  ;;  %v1981_v54 = vadd.f32 %v2334_v48, %v1980_v50 }
 0x749   : > { %v2490_v43 = vpop.f32.mrf.mxu1 }
 0x74a   : > { %v1832_v55 = vmul.f32 0.7978846, %v1831_v51  ;;  %v1986_v56 = vmul.f32 %v1981_v54, %v1981_v54 }
 0x74b   : > { %v1983_v52 = vpop.f32.mrf.mxu1 }
 0x74c   : > { %2639 = vtanh.f32 %v1832_v55  ;;  %v1987_v47 = vmul.f32 %v1986_v56, %v1981_v54 }
 0x74d   : > { %v2491_v57 = vpop.f32.mrf.mxu1 }
 0x74e   : > { %v1988_v60 = vmul.f32 0.044715, %v1987_v47 }
 0x750   : > { %v1989_v61 = vadd.f32 %v1988_v60, %v1981_v54 }
 0x752   : > { %v1990_v62 = vmul.f32 0.7978846, %v1989_v61 }
 0x754   : > { %2641 = vtanh.f32 %v1990_v62 }
 0x759   : > { %v2640_v63 = vpop.eup %2639 }
 0x75a   : > { %v1834_v58 = vadd.f32 1.0, %v2640_v63 }
 0x75c   : > { %v1835_v1 = vmul.f32 0.5, %v1834_v58 }
 0x75e   : > { %v1836_v3 = vmul.f32 %v1835_v1, %v1823_v38 }
 0x760   : > { %v1837_v53 = vpack.c.bf16 %v1836_v3, %v1836_v3 }
 0x761   : > { %v2642_v59 = vpop.eup %2641 }
 0x762   : > { %v1992_v4 = vadd.f32 1.0, %v2642_v59  ;;  %2481 = vmatmul.mubr.msk.bf16.vlgmr.msra.gmra.mxu0 %vm1877_vm6, %v1837_v53 }
 0x764   : > { %v1993_v2 = vmul.f32 0.5, %v1992_v4 }
 0x766   : > { %v1994_v5 = vmul.f32 %v1993_v2, %v1981_v54 }
 0x768   : > { %v1995_v6 = vpack.c.bf16 %v1994_v5, %v1994_v5 }
 0x76a   : > { %2501 = vmatmul.mubr.msk.bf16.vlgmr.msra.gmra.mxu1 %vm1877_vm6, %v1995_v6 }
 0x7cc   : > { %v1750_v8 = vpop.xlane.xlu0 %1749 }
 0x7cd   : > { %v1751_v9 = vsub.f32 %v1742_v37, %v1750_v8 }
 0x7cf   : > { %v1752_v10 = vmul.f32 1.442695, %v1751_v9 }
 0x7d1   : > { %2643 = vpow2.f32 %v1752_v10 }
 0x7de   : > { %v2644_v15 = vpop.eup %2643 }
 0x7df   : > { %v1754_v16 = vsel %vm1747_vm5, %v2644_v15, 0.0 }
 0x7e0   : > { %1755 = vadd.xlane.f32.xlu0 %v1754_v16 }
 0x822   : > { %v1915_v17 = vpop.f32.mrf.mxu0 }
 0x823   : > { %v1916_v33 = vadd.f32 %v2327_v31, %v1915_v17 }
 0x824   : > { %v2482_v18 = vpop.f32.mrf.mxu0 }
 0x826   : > { %v1918_v19 = vpop.f32.mrf.mxu0 }
 0x828   : > { %v2483_v20 = vpop.f32.mrf.mxu0 }
 0x82a   : > { %v2074_v22 = vpop.f32.mrf.mxu1 }
 0x82b   : > { %v2075_v34 = vadd.f32 %v2347_v32, %v2074_v22 }
 0x82c   : > { %v2502_v23 = vpop.f32.mrf.mxu1 }
 0x82e   : > { %v2077_v24 = vpop.f32.mrf.mxu1 }
 0x830   : > { %v2503_v13 = vpop.f32.mrf.mxu1 }
 0x869   : > { %v1756_v25 = vpop.xlane.xlu0 %1755 }
 0x86a   : > { %2645 = vrcp.f32 %v1756_v25 }
 0x877   : > { %v2646_v26 = vpop.eup %2645 }
 0x878   : > { %v1758_v27 = vmul.f32 %v2646_v26, %v2644_v15 }
 0x87a   : > { %1760 = vrot.lane.b32.xlu0 %v1758_v27, %s2823_s21  ;;  %s3429_s21 = sld [smem:[#allocation28_spill]] }
 0x880   : > { %s2129_s26 = scalar_lea.hbm %s3429_s21, %s2354_s15 }
 0x8ec   : > { %v1761_v28 = vpop.permute.xlu0 %1760 }
 0x8ed   : > { %vm1763_vm7 = vcmp.ge.f32.partialorder %v1758_v27, %v1761_v28 }
 0x8ee   : > { %v2080_v29 = vsel %vm1763_vm7, 1, %v2818_v7  ;;  %v1764_v30 = vsel %vm1763_vm7, %v1758_v27, %v1761_v28 }
 0x8ef   : > { %2082 = vperm.xlu1 %2601, %v2080_v29   ;;  %2088 = vperm.xlu0 %2602, %v1764_v30  }
 0x96a   : > { %v2083_v36 = vpop.permute.xlu1 %2082  ;;  %v2089_v37 = vpop.permute.xlu0 %2088 }
 0x96b   : > { %vm2084_vm8 = vcmp.eq.s32.totalorder %v2083_v36, 1 }
 0x96c   : > { %v2085_v38 = vsel %vm2084_vm8, %v1916_v33, %v2075_v34 }
 0x96d   : > { %v2091_v39 = vmul.f32 %v2089_v37, %v2085_v38 }
 0x96f   : > { %v2092_v7 = vadd.f32 %v2091_v39, %v3252_v21  ;;  %v638_v21 = vld [vmem:[%s3427_s16] sm:$0x3] }
 0x970   : > { %v2109_v49 = vrot.slane %v638_v21, %v3111_v14  ;;  %v2114_v51 = vrot.slane %v638_v21, %v709_v12 }
 0x971   : > { %v2093_v0 = vsel %vm659_vm1, %v2092_v7, 0.0 }
 0x972   : > { %2094 = vadd.xlane.f32.xlu1 %v2093_v0 }
 0x9fb   : > { %v2095_v35 = vpop.xlane.xlu1 %2094 }
 0x9fc   : > { %v2096_v40 = vmul.f32 0.03125, %v2095_v35 }
 0x9fe   : > { %v2097_v41 = vsub.f32 %v2092_v7, %v2096_v40 }
 0xa00   : > { %v2098_v42 = vmul.f32 %v2097_v41, %v2097_v41 }
 0xa02   : > { %v2099_v44 = vsel %vm659_vm1, %v2098_v42, 0.0 }
 0xa03   : > { %2100 = vadd.xlane.f32.xlu0 %v2099_v44 }
 0xa8c   : > { %v2101_v45 = vpop.xlane.xlu0 %2100 }
 0xa8d   : > { %v2102_v46 = vmul.f32 0.03125, %v2101_v45 }
 0xa8f   : > { %v2103_v48 = vadd.f32 1e-12, %v2102_v46 }
 0xa91   : > { %2647 = vrsqrt.f32 %v2103_v48 }
 0xa9e   : > { %v2648_v50 = vpop.eup %2647 }
 0xa9f   : > { %v2105_v54 = vmul.f32 %v2648_v50, %v2097_v41 }
 0xaa1   : > { %v2110_v43 = vmul.f32 %v2109_v49, %v2105_v54 }
 0xaa3   : > { %v2115_v55 = vadd.f32 %v2114_v51, %v2110_v43 }
 0xaa5   : > { %2116 = vst.msk [vmem:[%s595_s27] sm:$0xff] %vm659_vm1, %v2115_v55 }
 0xaa6   : > { %2728 = shalt.err (!%p2725_p5)
}
 0xaa7   : > { %s2729_s28 = scalar_lea.hbm %s2129_s26, 128  ;;  %s2733_s16 = scalar_lea.hbm %s3429_s21, 256 }
 0xaa8   : > { %p2730_p10 = scmp.ne.s32.totalorder %s2129_s26, %s2729_s28  ;;  %p2734_p0 = scmp.lt.s32.totalorder %s2129_s26, %s3429_s21 }
 0xaa9   : > { %p2735_p11 = scmp.lt.s32.totalorder %s2733_s16, %s2729_s28 }
 0xaaa   : > { %p2731_p13 = pnand %p2730_p10, %p3430_p7 }
 0xaab   : > { %p2736_p2 = por %p2735_p11, %p2734_p0 }
 0xaac   : > { %p2732_p6 = pneg %p2731_p13 }
 0xaae   : > { %p2737_p12 = pnand %p2736_p2, %p2732_p6 }
 0xab0   : > { %2740 = shalt.err (!%p2737_p12)
}
 0xab1   : > { %2512 = dma.vmem_to_hbm [thread:$0]  (%p3430_p7), %s2132_s22, 128, %s2129_s26, %s2118_s20  }
 0xab2 PF: > { %s3431_s27 = sld [smem:[#allocation21_spill]] }
 0xab3   : > { %s3432_s17 = sld [smem:[#allocation16_spill]] }
 0xab4   : > { %s3433_s30 = sld [smem:[#allocation26_spill]] }
 0xab8   : > { %p2531_p4 = scmp.ge.s32.totalorder %s3431_s27, 2 }
 0xab9   : > { %s2143_s14 = sand.u32 1, %s3432_s17  }
 0xaba   : > { %p3434_p9 = scmp.ne.s32.totalorder %s3433_s30, 0  ;;  %s2144_s19 = scalar_lea.sflag [#allocation6], %s2143_s14 }
 0xabc   : > { %p2524_p1 = pnand %p2531_p4, %p3434_p9 }
 0xabe   : > { %p2525_p8 = pneg %p2524_p1 }
 0xac0   : > { %2780 = dma.done.wait (%p2525_p8), %s2144_s19, 128  }
 0xac1   : > { %2782 = vsyncadd (%p2525_p8), %s2144_s19, 4294967168  ;;  %s3435_s28 = sld [smem:[#allocation22_spill]] }
 0xac2   : > { %s3436_s23 = sld [smem:[#allocation17_spill]] }
 0xac3   : > { %s3437_s0 = sld [smem:[#allocation18_spill]] }
 0xac4   : > { %s3438_s24 = sld [smem:[#allocation23_spill]] }
 0xac5   : > { %s3439_s25 = sld [smem:[#allocation19_spill]] }
 0xac6   : > { %s3440_s26 = sld [smem:[#allocation20_spill]] }
 0xac7   : > { %s3441_s27 = sld [smem:[#allocation25_spill]]  ;;  %p33_p7 = scmp.ge.s32.totalorder %s3435_s28, 4  }
 0xac9   :  { %35 = sbr.rel (!%p33_p7) target bundleno = 23 (0x17), region = 140 }
 0xace   :  { %2149 = vsyncpa [#allocation5], 1 }
 0xacf   :  { %2151 = vsyncpa [#allocation5 + $0x1], 1 }
 0xad0   :  { %2152 = vsyncpa [#allocation8], 1 }
 0xad1   :  { %2153 = vsyncpa [#allocation6], 1 }
 0xad2   :  { %2155 = vsyncpa [#allocation6 + $0x1], 1 }

// kernel: tpu_custom_call.1
= control target key start
LH: loop header
LB: loop body
LE: loop exit
PB: predicated region body
PF: predicated region fallthrough
CT: control target
= control target key end

     0   :  { %s3395_s0 = inlined_call_operand.vmem [shape: s32[2], index: 0, kind: input, shape index: {}]   ;;  %s3396_s1 = inlined_call_operand.vmem [shape: f32[2,8,32], index: 1, kind: input, shape index: {}]   ;;  %s3397_s2 = inlined_call_operand.vmem [shape: f32[2,1,8], index: 2, kind: input, shape index: {}]   ;;  %s3398_s3 = inlined_call_operand.vmem [shape: bf16[2,32,32], index: 3, kind: input, shape index: {}]   ;;  %s3399_s4 = inlined_call_operand.vmem [shape: bf16[2,32,32], index: 4, kind: input, shape index: {}]   ;;  %s3400_s5 = inlined_call_operand.vmem [shape: bf16[2,32,32], index: 5, kind: input, shape index: {}]   ;;  %s3401_s6 = inlined_call_operand.hbm [shape: bf16[2,32,32], index: 6, kind: input, shape index: {}]   ;;  %s3402_s7 = inlined_call_operand.vmem [shape: f32[2,6,32], index: 7, kind: input, shape index: {}]   ;;  %s3403_s8 = inlined_call_operand.vmem [shape: bf16[32,2], index: 8, kind: input, shape index: {}]   ;;  %s3404_s9 = inlined_call_operand.vmem [shape: f32[1,2], index: 9, kind: input, shape index: {}]   ;;  %s3405_s10 = inlined_call_operand.hbm [shape: bf16[2,32,64], index: 10, kind: input, shape index: {}]   ;;  %s3406_s11 = inlined_call_operand.vmem [shape: f32[2,1,64], index: 11, kind: input, shape index: {}]   ;;  %s3407_s12 = inlined_call_operand.vmem [shape: bf16[2,64,32], index: 12, kind: input, shape index: {}]   ;;  %s3408_s13 = inlined_call_operand.vmem [shape: f32[2,1,32], index: 13, kind: input, shape index: {}]   ;;  %s3409_s14 = inlined_call_operand.vmem [shape: f32[2,32], index: 14, kind: input, shape index: {}]   ;;  %s3410_s15 = inlined_call_operand.hbm [shape: f32[2,8,32], index: 15, kind: output, shape index: {}]  }
   0x1   :  { %3428 = sst [smem:[#allocation23_spill]] %s3404_s9  ;;  %s20_s20 = sshll.u32 %s3395_s0, 4  ;;  %s21_s20 = int_to_ptr.vmem [resolvable:$true] %s20_s20 }
   0x2   :  { %3429 = sst [smem:[#allocation24_spill]] %s3406_s11  ;;  %s2664_s21 = scalar_lea.vmem %s21_s20, 16 }
   0x3   :  { %3430 = sst [smem:[#allocation25_spill]] %s3408_s13  ;;  %p2665_p0 = scmp.ne.s32.totalorder %s21_s20, %s2664_s21 }
   0x4   :  { %3431 = sst [smem:[#allocation26_spill]] %s3409_s14  ;;  %p2669_p1 = scmp.lt.s32.totalorder %s21_s20, %s21_s20 }
   0x5   :  { %3432 = sst [smem:[#allocation27_spill]] %s3410_s15  ;;  %p2670_p2 = scmp.lt.s32.totalorder %s2664_s21, %s2664_s21 }
   0x7   :  { %p2671_p3 = por %p2670_p2, %p2669_p1 }
   0x9   :  { %p2672_p4 = pnand %p2671_p3, %p2665_p0 }
   0xb   :  { %2675 = shalt.err (!%p2672_p4)  }
   0xc   :  { %s2826_s22 = smov [#allocation3]  }
   0xd   :  { %23 = dma.vmem_to_smem %s21_s20, 16, %s2826_s22, [#allocation2] }
   0xe   :  { %2784 = dma.done.wait [#allocation2], 16 }
   0xf   :  { %2785 = vsyncadd [#allocation2], 4294967280 }
  0x10   :  { %25 = sfence }
  0x11   :  { %26 = vsyncpa [#allocation5], 0 }
  0x12   :  { %28 = vsyncpa [#allocation5 + $0x1], 0 }
  0x13   :  { %29 = vsyncpa [#allocation8], 0 }
  0x14   :  { %30 = vsyncpa [#allocation6], 0 }
  0x15   :  { %32 = vsyncpa [#allocation6 + $0x1], 0  ;;  %s2923_s23 = smov 0   ;;  %s2925_s0 = smov 0  }
  0x16   :  { %s2927_s24 = smov 0   ;;  %s2929_s25 = smov 0  }
  0x17   :  { %s2931_s26 = smov 0   ;;  %s2933_s27 = smov 0  }
  0x18   :  { %s2935_s28 = smov 0  }
  0x19 LB: > { %3433 = sst [smem:[#allocation16_spill]] %s2800_s23  ;;  %s2957_s29 = sadd.s32 4294967295, %s2824_s28   ;;  %s2824_s28 = sphi %s2935_s28, %s3466_s28   ;;  %s2820_s27 = sphi %s2933_s27, %s3472_s27   ;;  %s2816_s26 = sphi %s2931_s26, %s3471_s26   ;;  %s2812_s25 = sphi %s2929_s25, %s3470_s25   ;;  %s2808_s24 = sphi %s2927_s24, %s3469_s24   ;;  %s2804_s0 = sphi %s2925_s0, %s3468_s0   ;;  %s2800_s23 = sphi %s2923_s23, %s3467_s23  }
  0x1a   : > { %3434 = sst [smem:[#allocation17_spill]] %s2804_s0  ;;  %s2297_s30 = sadd.s32 4294967294, %s2824_s28  }
  0x1b   : > { %3435 = sst [smem:[#allocation18_spill]] %s2808_s24  ;;  %s2961_s16 = sadd.s32 1, %s2824_s28  }
  0x1c   : > { %3436 = sst [smem:[#allocation19_spill]] %s2961_s16  ;;  %p196_p5 = scmp.ne.s32.totalorder %s2816_s26, %s2812_s25 }
  0x1d   : > { %p3425_p6 = scmp.eq.s32.totalorder %s2957_s29, 0  ;;  %s381_s17 = ssub.s32 %s2824_s28, %s2961_s16 }
  0x1e   : > { %p382_p7 = scmp.eq.s32.totalorder %s381_s17, 0  ;;  %s384_s18 = sadd.s32 1, %s2808_s24 }
  0x1f   : > { %p2970_p8 = por %p3425_p6, %p196_p5  ;;  %p394_p9 = scmp.ne.s32.totalorder %s2808_s24, %s2804_s0 }
  0x20   : > { %s2977_s20 = scalar_select %p382_p7, %s2808_s24, %s384_s18  }
  0x21   : > { %s3437_s19 = scalar_select %p2970_p8, 1, 0 }
  0x22   : > { %3438 = sst [smem:[#allocation20_spill]] %s2977_s20  ;;  %p395_p10 = scmp.eq.s32.totalorder %s2957_s29, 1 }
  0x23   : > { %p400_p11 = scmp.ne.s32.totalorder %s2804_s0, %s2800_s23  ;;  %p401_p12 = scmp.eq.s32.totalorder %s2297_s30, 1 }
  0x24   : > { %p2298_p13 = scmp.ge.s32.totalorder %s2824_s28, 1  ;;  %p2983_p0 = por %p395_p10, %p394_p9 }
  0x25   : > { %p408_p1 = scmp.lt.s32.totalorder %s2824_s28, 3  ;;  %p2988_p2 = por %p401_p12, %p400_p11 }
  0x26   : > { %s3439_s21 = scalar_select %p2983_p0, 1, 0 }
  0x27   : > { %s3441_s22 = scalar_select %p2988_p2, 1, 0 }
  0x28   : > { %3440 = sst [smem:[#allocation21_spill]] %s3439_s21  ;;  %p2992_p3 = pnand %p2298_p13, %p408_p1 }
  0x29   : > { %3442 = sst [smem:[#allocation22_spill]] %s3441_s22  ;;  %s2827_s17 = smov [#allocation7]  }
  0x2a   : > { %s3443_s25 = scalar_select %p2992_p3, 1, 0 }
  0x2b   : > { %s426_s18 = sshll.u32 %s2827_s17, 4  ;;  %p2530_p4 = pneg %p2992_p3  ;;  %s427_s18 = int_to_ptr.vmem [resolvable:$true] %s426_s18 }
  0x2c   : > { %s178_s20 = sld [smem:[#allocation3 + %s2824_s28]]  ;;  %s2687_s22 = scalar_lea.vmem %s427_s18, 512 }
  0x2d   : > { %p3001_p7 = pnand %p2530_p4, %p3425_p6  ;;  %s179_s24 = sld [smem:[#allocation3 + %s2961_s16]] }
  0x2e   : > { %p2688_p10 = scmp.ne.s32.totalorder %s427_s18, %s2687_s22  ;;  %p2695_p13 = scmp.lt.s32.totalorder %s427_s18, %s427_s18 }
  0x2f   : > { %p2678_p9 = pneg %p3001_p7  ;;  %p2696_p1 = scmp.lt.s32.totalorder %s2687_s22, %s2687_s22 }
  0x31   : > { %p2690_p11 = pnand %p2688_p10, %p2678_p9  ;;  %p2697_p2 = por %p2696_p1, %p2695_p13 }
  0x33   : > { %p2691_p12 = pneg %p2690_p11 }
  0x35   : > { %p2698_p0 = pnand %p2697_p2, %p2691_p12 }
  0x37   : > { %2701 = shalt.err (!%p2698_p0)
}
  0x38   : > { %s3423_s17 = smov 64   ;;  %s3424_s16 = smov 4  }
  0x39   : > { %2533 = dma.hbm_to_vmem [thread:$0]  (!%p3001_p7), %s3405_s10, 512, %s427_s18, [#allocation8], %s3423_s17, %s3423_s17, %s3424_s16  }
  0x3a   : > { %p190_p0 = scmp.ne.s32.totalorder %s2820_s27, %s2816_s26  ;;  %p191_p2 = scmp.eq.s32.totalorder %s2824_s28, 0 }
  0x3b   : > { %s495_s15 = sand.u32 1, %s2820_s27   ;;  %s183_s21 = sadd.s32 1, %s2820_s27 }
  0x3c   : > { %p192_p4 = por %p191_p2, %p190_p0  ;;  %s180_s14 = ssub.s32 %s178_s20, %s179_s24 }
  0x3d   : > { %p2545_p9 = scmp.lt.s32.totalorder %s2824_s28, 2  ;;  %p181_p10 = scmp.eq.s32.totalorder %s180_s14, 0 }
  0x3e   : > { %s2301_s0 = sshll.u32 %s495_s15, 4 }
  0x3f   : > { %s2522_s13 = scalar_select %p192_p4, [#allocation3], [#allocation10] }
  0x40   : > { %s3024_s11 = scalar_select %p181_p10, %s2820_s27, %s183_s21  }
  0x41   : > { %s2523_s30 = scalar_select %p192_p4, %s2824_s28, 0 }
  0x42   : > { %s3474_s13 = smov (!%p2545_p9, %s2522_s13), [#allocation11]  ;;  %p3027_p11 = pnand %p2545_p9, %p192_p4 }
  0x43   : > { %s3476_s30 = smov (!%p2545_p9, %s2523_s30), 0  ;;  %s499_s18 = scalar_lea.vmem [#allocation4], %s2301_s0 }
  0x44   : > { %s500_s23 = sld [smem:[%s3474_s13 + %s3476_s30]]  ;;  %s507_s22 = sshll.u32 %s499_s18, 4  ;;  %s3031_s22 = int_to_ptr.vmem [resolvable:$true] %s507_s22 }
  0x45   : > { %s3038_s21 = scalar_lea.sflag [#allocation5], %s495_s15  ;;  %p2704_p12 = pneg %p3027_p11 }
  0x46   : > { %s2707_s30 = scalar_lea.hbm %s3401_s6, 512 }
  0x4a   : > { %s2373_s24 = sshll.u32 %s500_s23, 8 }
  0x4b   : > { %s3036_s17 = scalar_lea.hbm %s3401_s6, %s2373_s24 }
  0x4c   : > { %s2702_s16 = scalar_lea.hbm %s3036_s17, 256  ;;  %p2708_p0 = scmp.lt.s32.totalorder %s3036_s17, %s3401_s6 }
  0x4d   : > { %p2703_p7 = scmp.ne.s32.totalorder %s3036_s17, %s2702_s16  ;;  %p2709_p2 = scmp.lt.s32.totalorder %s2707_s30, %s2702_s16 }
  0x4f   : > { %p2705_p13 = pnand %p2704_p12, %p2703_p7  ;;  %p2710_p4 = por %p2709_p2, %p2708_p0 }
  0x51   : > { %p2706_p1 = pneg %p2705_p13 }
  0x53   : > { %p2711_p9 = pnand %p2710_p4, %p2706_p1 }
  0x55   : > { %2714 = shalt.err (!%p2711_p9)
}
  0x56   : > { %s2715_s15 = scalar_lea.vmem %s3031_s22, 256  ;;  %s2830_s24 = smov [#allocation4]  }
  0x57   : > { %p2716_p10 = scmp.ne.s32.totalorder %s3031_s22, %s2715_s15  ;;  %s2720_s20 = sshll.u32 %s2830_s24, 4  ;;  %s2721_s20 = int_to_ptr.vmem [resolvable:$false] %s2720_s20 }
  0x58   : > { %s2722_s14 = scalar_lea.vmem %s2721_s20, 512  ;;  %p2723_p13 = scmp.lt.s32.totalorder %s3031_s22, %s2721_s20 }
  0x59   : > { %p2718_p5 = pnand %p2716_p10, %p2704_p12  ;;  %p2724_p6 = scmp.lt.s32.totalorder %s2722_s14, %s2715_s15 }
  0x5b   : > { %p2719_p7 = pneg %p2718_p5  ;;  %p2725_p8 = por %p2724_p6, %p2723_p13 }
  0x5d   : > { %p2726_p3 = pnand %p2725_p8, %p2719_p7 }
  0x5f   : > { %2729 = shalt.err (!%p2726_p3)
}
  0x60   : > { %s3446_s16 = smov 4   ;;  %s3447_s13 = smov 64  }
  0x61   : > { %2539 = dma.hbm_to_vmem [thread:$0]  (!%p3027_p11), %s3036_s17, 256, %s3031_s22, %s3038_s21, %s3447_s13, %s3447_s13, %s3446_s16  }
  0x62   : > { %p3448_p5 = scmp.ne.s32.totalorder %s3443_s25, 0 }
  0x63   : > { %s530_s0 = sand.u32 (!%p3448_p5), 1, %s2816_s26   ;;  %p3449_p6 = scmp.ne.s32.totalorder (!%p3448_p5), %s3437_s19, 0 }
  0x64   : > { %528 = sbr.rel (%p3448_p5) target bundleno = 2743 (0xab7), region = 76  ;;  %s3065_s30 = sshll.u32 (!%p3448_p5), %s530_s0, 4 }
  0x65   : > { %s531_s23 = scalar_lea.sflag (!%p3448_p5), [#allocation5], %s530_s0 }
  0x69   : > { %2787 = dma.done.wait (%p3449_p6), %s531_s23, 256  }
  0x6a   : > { %2789 = vsyncadd (%p3449_p6), %s531_s23, 4294967040  ;;  %p3450_p8 = scmp.eq.s32.totalorder %s2957_s29, 0 }
  0x6c   : > { %2791 = dma.done.wait (%p3450_p8), [#allocation8], 512   ;;  %p3451_p3 = pmov %p3450_p8 }
  0x6d   : > { %p613_p11 = scmp.lt.s32.totalorder %s2957_s29, 1  ;;  %v2831_v0 = vmov 0.0   ;;  %s627_s9 = sld [smem:[#allocation3 + %s2957_s29]]  ;;  %vm2832_vm0 = vmmov 0   ;;  %vm676_vm1 = vcmask 261120   ;;  %v2833_v7 = vmov 0  }
  0x6e   : > { %2793 = vsyncadd (%p3451_p3), [#allocation8], 4294966784  ;;  %2424 = vmatprep.subr.bf16.mxu1 %v2831_v0  ;;  %2416 = vmatprep.subr.bf16.mxu0 %v2831_v0  ;;  %s620_s25 = sld [smem:[#allocation3 + %s2957_s29]]  ;;  %v660_v10 = vlaneseq  ;;  %v2835_v37 = vmov 1983009808   ;;  %vm1264_vm2 = vcmask 130048  }
  0x6f   : > { %2428 = vmatprep.mubr.msk.bf16.mxu1 %vm2832_vm0, %v2831_v0  ;;  %2420 = vmatprep.mubr.msk.bf16.mxu0 %vm2832_vm0, %v2831_v0  ;;  %s3086_s19 = scalar_select %p613_p11, %s2957_s29, 1  ;;  %v846_v38 = vunpack.c.l.s4 %v2835_v37  ;;  %v2836_v41 = vmov 1934713408   ;;  %vm1391_vm3 = vcmask 1043456   ;;  %vm1357_vm4 = vcmask 64512  }
  0x70   : > { %2617 = vset.pattern.permute.xlu0 %v2833_v7  ;;  %2616 = vset.pattern.permute.xlu1 %v2833_v7  ;;  %s642_s21 = sld [smem:[#allocation3 + %s2957_s29]]  ;;  %v3124_v11 = vshrl.u32 %v660_v10, 7  ;;  %v854_v42 = vunpack.c.l.s4 %v2836_v41  ;;  %vm1764_vm5 = vcmask 15360   ;;  %vm1894_vm6 = vcmask 523264  }
  0x71   : > { %s2308_s17 = sshll.u32 %s3086_s19, 3  ;;  %v847_v40 = vunpack.c.0.s8 %v846_v38  ;;  %s619_s23 = scalar_lea.vmem %s3397_s2, %s3086_s19 }
  0x72   : > { %s616_s15 = scalar_lea.vmem %s3396_s1, %s2308_s17  ;;  %v726_v12 = vsub.s32 1, %v3124_v11  ;;  %v3133_v14 = vsub.s32 0, %v3124_v11  ;;  %v786_v30 = vsub.s32 2, %v3124_v11  ;;  %v855_v44 = vunpack.c.0.s8 %v854_v42  ;;  %s3452_s19 = scalar_lea.vmem [#allocation4], %s3065_s30 }
  0x73   : > { %p628_p12 = scmp.lt.s32.totalorder %s627_s9, 1  ;;  %v3098_v2 = vld [vmem:[%s616_s15] sm:$0xff]  ;;  %v3146_v43 = vsub.s32 %v847_v40, %v3124_v11  ;;  %s2837_s30 = smov 16  }
  0x74   : > { %p621_p1 = scmp.lt.s32.totalorder %s620_s25, 1  ;;  %v650_v6 = vpack.c.bf16 %v3098_v2, %v3098_v2  ;;  %v3151_v47 = vsub.s32 %v855_v44, %v3124_v11  ;;  %s3457_s17 = sld [smem:[#allocation17_spill]] }
  0x75   : > { %s3478_s9 = smov (!%p628_p12, %s627_s9), 1 }
  0x76   : > { %s3480_s25 = smov (!%p621_p1, %s620_s25), 1  ;;  %s2375_s24 = sshll.u32 %s3478_s9, 4 }
  0x77   : > { %s632_s16 = scalar_lea.vmem %s3399_s4, %s2375_s24  ;;  %s2374_s13 = sshll.u32 %s3480_s25, 4 }
  0x78   : > { %v2618_v1 = vld [vmem:[%s632_s16 + $0x8] sm:$0xff]   ;;  %s625_s18 = scalar_lea.vmem %s3398_s3, %s2374_s13  ;;  %v2620_v4 = vld [vmem:[%s632_s16] sm:$0xff]   ;;  %p643_p2 = scmp.lt.s32.totalorder %s642_s21, 1 }
  0x79   : > { %v2619_v3 = vld [vmem:[%s625_s18 + $0x8] sm:$0xff]   ;;  %2425 = vmatpush3.bf16.msra.mxu1 %v2618_v1  ;;  %v2621_v5 = vld [vmem:[%s625_s18] sm:$0xff]   ;;  %s634_s18 = sld [smem:[#allocation3 + %s2957_s29]]  ;;  %s2834_s16 = smov 112  }
  0x7a   : > { %2417 = vmatpush3.bf16.msra.mxu0 %v2619_v3  ;;  %2426 = vmatprep.subr.bf16.mxu1 %v2831_v0  ;;  %s3484_s21 = smov (!%p643_p2, %s642_s21), 1  ;;  %s3454_s24 = sld [smem:[#allocation23_spill]] }
  0x7b   : > { %2418 = vmatprep.subr.bf16.mxu0 %v2831_v0  ;;  %s2315_s15 = sshll.u32 %s3484_s21, 3  ;;  %s2370_s13 = sshll.u32 %s2957_s29, 7 }
  0x7c   : > { %s646_s14 = scalar_lea.vmem %s3402_s7, %s2315_s15  ;;  %s2839_s15 = smov [#allocation9]  }
  0x7d   : > { %2427 = vmatpush3.bf16.msra.mxu1 %v2620_v4  ;;  %v3130_v13 = vld [vmem:[%s646_s14] sm:$0x3f]  ;;  %s3459_s14 = sld [smem:[#allocation21_spill]] }
  0x7e   : > { %2419 = vmatpush3.bf16.msra.mxu0 %v2621_v5  ;;  %2440 = vmatprep.subr.bf16.mxu1 %v2831_v0  ;;  %v727_v15 = vrot.slane %v3130_v13, %v726_v12  ;;  %v663_v16 = vrot.slane %v3130_v13, %v3133_v14  ;;  %v787_v31 = vrot.slane %v3130_v13, %v786_v30 }
  0x7f   : > { %2432 = vmatprep.subr.bf16.mxu0 %v2831_v0  ;;  %p635_p0 = scmp.lt.s32.totalorder %s634_s18, 1 }
  0x80   : > { %2429 = vmatmul.mubr.msk.bf16.vlgmr.msra.gmra.mxu1 %vm676_vm1, %v650_v6 }
  0x81   : > { %2421 = vmatmul.mubr.msk.bf16.vlgmr.msra.gmra.mxu0 %vm676_vm1, %v650_v6  ;;  %2442 = vmatprep.mubr.msk.bf16.mxu1 %vm2832_vm0, %v2831_v0  ;;  %s3482_s18 = smov (!%p635_p0, %s634_s18), 1 }
  0x82   : > { %2436 = vmatprep.mubr.msk.bf16.mxu0 %vm2832_vm0, %v2831_v0  ;;  %s2376_s9 = sshll.u32 %s3482_s18, 4  ;;  %s3453_s18 = smov %s3452_s19 }
  0x83   : > { %s639_s22 = scalar_lea.vmem %s3400_s5, %s2376_s9  ;;  %s3460_s9 = sld [smem:[#allocation27_spill]] }
  0x84   : > { %v2622_v8 = vld [vmem:[%s639_s22 + $0x8] sm:$0xff]   ;;  %v2623_v9 = vld [vmem:[%s639_s22] sm:$0xff]   ;;  %s610_s22 = sand.u32 1, %s3457_s17   ;;  %p3461_p9 = scmp.ne.s32.totalorder %s3459_s14, 0 }
  0x85   : > { %2433 = vmatpush3.bf16.msra.mxu0 %v2622_v8  ;;  %s2307_s20 = sshll.u32 %s610_s22, 3  ;;  %s2135_s17 = scalar_lea.sflag [#allocation6], %s610_s22 }
  0x86   : > { %2434 = vmatprep.subr.bf16.mxu0 %v2831_v0  ;;  %s612_s0 = scalar_lea.vmem [#allocation9], %s2307_s20 }
  0x89   : > { %2435 = vmatpush3.bf16.msra.mxu0 %v2623_v9  ;;  %s2146_s25 = scalar_lea.hbm %s3460_s9, %s2370_s13 }
  0x8a   : > { %2446 = vmatprep.subr.bf16.mxu0 %v2831_v0 }
  0x8c   : > { %2437 = vmatmul.mubr.msk.bf16.vlgmr.msra.gmra.mxu0 %vm676_vm1, %v650_v6 }
  0x8d   : > { %2448 = vmatprep.mubr.msk.bf16.mxu0 %vm2832_vm0, %v2831_v0 }
 0x140   : > { %v774_v17 = vpop.f32.mrf.mxu1 }
 0x141   : > { %v775_v18 = vadd.f32 %v774_v17, %v727_v15  ;;  %v714_v19 = vpop.f32.mrf.mxu0 }
 0x142   : > { %v715_v20 = vadd.f32 %v714_v19, %v663_v16  ;;  %v2430_v21 = vpop.f32.mrf.mxu1 }
 0x143   : > { %v980_v22 = vpack.c.bf16 %v775_v18, %v775_v18  ;;  %v2422_v23 = vpop.f32.mrf.mxu0 }
 0x144   : > { %v840_v24 = vmul.f32 0.25, %v715_v20  ;;  %v777_v25 = vpop.f32.mrf.mxu1 }
 0x145   : > { %982 = vrot.lane.b32.xlu0 %v980_v22, %s2834_s16  ;;  %v717_v26 = vpop.f32.mrf.mxu0  ;;  %v990_v45 = vrot.slane %v980_v22, %v3146_v43 }
 0x146   : > { %v841_v27 = vpack.c.bf16 %v840_v24, %v840_v24  ;;  %v2431_v28 = vpop.f32.mrf.mxu1 }
 0x147   : > { %v2423_v29 = vpop.f32.mrf.mxu0  ;;  %v991_v48 = vcombine.high %v990_v45, %v2833_v7  ;;  %v998_v50 = vrot.slane %v990_v45, %v3151_v47 }
 0x148   : > { %v851_v46 = vrot.slane %v841_v27, %v3146_v43 }
 0x149   : > { %843 = vrot.lane.b32.xlu0 %v841_v27, %s2834_s16  ;;  %v1005_v51 = vrot.slane %v991_v48, %v3151_v47  ;;  %v1006_v54 = vcombine.high %v998_v50, %v2833_v7  ;;  %v1037_v62 = vshrl.u32 %v998_v50, 16 }
 0x14a   : > { %v852_v49 = vcombine.high %v851_v46, %v2833_v7  ;;  %v859_v52 = vrot.slane %v851_v46, %v3151_v47 }
 0x14b   : > { %v1007_v56 = vcombine.high %v1005_v51, %v2833_v7  ;;  %v1045_v63 = vshrl.u32 %v1006_v54, 16  ;;  %v1053_v1 = vshrl.u32 %v1005_v51, 16 }
 0x14c   : > { %v834_v32 = vpop.f32.mrf.mxu0  ;;  %v866_v53 = vrot.slane %v852_v49, %v3151_v47  ;;  %v867_v58 = vcombine.high %v859_v52, %v2833_v7  ;;  %v898_v3 = vshrl.u32 %v859_v52, 16 }
 0x14d   : > { %v835_v33 = vadd.f32 %v834_v32, %v787_v31  ;;  %v1061_v5 = vshrl.u32 %v1007_v56, 16 }
 0x14e   : > { %v2438_v34 = vpop.f32.mrf.mxu0  ;;  %v868_v59 = vcombine.high %v866_v53, %v2833_v7  ;;  %v906_v10 = vshrl.u32 %v867_v58, 16  ;;  %v914_v15 = vshrl.u32 %v866_v53, 16 }
 0x14f   : > { %v3142_v35 = vpack.c.bf16 %v835_v33, %v835_v33 }
 0x150   : > { %v837_v36 = vpop.f32.mrf.mxu0  ;;  %v922_v16 = vshrl.u32 %v868_v59, 16 }
 0x151   : > { %1121 = vrot.lane.b32.xlu0 %v3142_v35, %s2834_s16  ;;  %s3455_s16 = sld [smem:[#allocation24_spill]] }
 0x152   : > { %v2439_v39 = vpop.f32.mrf.mxu0 }
 0x1b7   : > { %v983_v55 = vpop.permute.xlu0 %982 }
 0x1b8   : > { %v1015_v57 = vrot.slane %v983_v55, %v3146_v43 }
 0x1ba   : > { %v1016_v60 = vcombine.high %v1015_v57, %v2833_v7  ;;  %v1023_v61 = vrot.slane %v1015_v57, %v3151_v47 }
 0x1bb   : > { %v844_v4 = vpop.permute.xlu0 %843 }
 0x1bc   : > { %v1030_v6 = vrot.slane %v1016_v60, %v3151_v47  ;;  %v1031_v8 = vcombine.high %v1023_v61, %v2833_v7  ;;  %v1038_v9 = vshrl.u32 %v1023_v61, 16  ;;  %v876_v17 = vrot.slane %v844_v4, %v3146_v43 }
 0x1bd   : > { %v1035_v19 = vpack.i.b16 %v1023_v61, %v998_v50 }
 0x1be   : > { %v1032_v18 = vcombine.high %v1030_v6, %v2833_v7  ;;  %v1039_v20 = vpack.i.b16 %v1038_v9, %v1037_v62  ;;  %v1046_v21 = vshrl.u32 %v1031_v8, 16  ;;  %v1051_v22 = vpack.i.b16 %v1030_v6, %v1005_v51 }
 0x1bf   : > { %v1054_v23 = vshrl.u32 %v1030_v6, 16  ;;  %v877_v24 = vcombine.high %v876_v17, %v2833_v7  ;;  %v884_v25 = vrot.slane %v876_v17, %v3151_v47  ;;  %v1043_v26 = vpack.i.b16 %v1031_v8, %v1006_v54 }
 0x1c0   : > { %v1047_v27 = vpack.i.b16 %v1046_v21, %v1045_v63  ;;  %v1059_v28 = vpack.i.b16 %v1032_v18, %v1007_v56  ;;  %v1062_v29 = vshrl.u32 %v1032_v18, 16  ;;  %v1065_v31 = vcombine.low %v1035_v19, %v1051_v22 }
 0x1c1   : > { %v1055_v30 = vpack.i.b16 %v1054_v23, %v1053_v1  ;;  %v891_v32 = vrot.slane %v877_v24, %v3151_v47  ;;  %v892_v33 = vcombine.high %v884_v25, %v2833_v7  ;;  %v896_v37 = vpack.i.b16 %v884_v25, %v859_v52 }
 0x1c2   : > { %v1063_v34 = vpack.i.b16 %v1062_v29, %v1061_v5  ;;  %v1073_v36 = vcombine.low %v1043_v26, %v1059_v28  ;;  %v899_v38 = vshrl.u32 %v884_v25, 16  ;;  %v1072_v39 = vrot.slane %v1065_v31, %v3146_v43 }
 0x1c3   : > { %v1089_v40 = vcombine.low %v1039_v20, %v1055_v30  ;;  %v893_v41 = vcombine.high %v891_v32, %v2833_v7  ;;  %v904_v42 = vpack.i.b16 %v892_v33, %v867_v58  ;;  %v907_v46 = vshrl.u32 %v892_v33, 16  ;;  %v1122_v31 = vpop.permute.xlu0 %1121 }
 0x1c4   : > { %v1097_v44 = vcombine.low %v1047_v27, %v1063_v34  ;;  %v900_v45 = vpack.i.b16 %v899_v38, %v898_v3  ;;  %v912_v48 = vpack.i.b16 %v891_v32, %v866_v53  ;;  %v915_v49 = vshrl.u32 %v891_v32, 16 }
 0x1c5   : > { %v920_v50 = vpack.i.b16 %v893_v41, %v868_v59  ;;  %v923_v51 = vshrl.u32 %v893_v41, 16  ;;  %v1080_v54 = vrot.slane %v1073_v36, %v3146_v43  ;;  %v908_v55 = vpack.i.b16 %v907_v46, %v906_v10 }
 0x1c6   : > { %v926_v56 = vcombine.low %v896_v37, %v912_v48  ;;  %v1096_v52 = vrot.slane %v1089_v40, %v3146_v43  ;;  %v1104_v57 = vrot.slane %v1097_v44, %v3146_v43  ;;  %v916_v60 = vpack.i.b16 %v915_v49, %v914_v15 }
 0x1c7   : > { %v924_v61 = vpack.i.b16 %v923_v51, %v922_v16  ;;  %v934_v62 = vcombine.low %v904_v42, %v920_v50  ;;  %v1081_v63 = vcombine.low %v1072_v39, %v1080_v54  ;;  %v1129_v27 = vrot.slane %v3142_v35, %v3146_v43 }
 0x1c8   : > { %v1105_v58 = vcombine.low %v1096_v52, %v1104_v57  ;;  %v950_v3 = vcombine.low %v900_v45, %v916_v60  ;;  %v933_v4 = vrot.slane %v926_v56, %v3146_v43  ;;  %v1154_v33 = vrot.slane %v1122_v31, %v3146_v43 }
 0x1c9   : > { %v941_v1 = vrot.slane %v934_v62, %v3146_v43  ;;  %v958_v53 = vcombine.low %v908_v55, %v924_v61  ;;  %v1088_v59 = vrot.slane %v1081_v63, %v3151_v47  ;;  %v1130_v28 = vcombine.high %v1129_v27, %v2833_v7 }
 0x1ca   : > { %v1112_v5 = vrot.slane %v1105_v58, %v3151_v47  ;;  %v957_v6 = vrot.slane %v950_v3, %v3146_v43  ;;  %v1137_v29 = vrot.slane %v1129_v27, %v3151_v47  ;;  %v1155_v36 = vcombine.high %v1154_v33, %v2833_v7 }
 0x1cb   : > { %v965_v8 = vrot.slane %v958_v53, %v3146_v43  ;;  %v942_v9 = vcombine.low %v933_v4, %v941_v1  ;;  %v1116_v15 = vshrl.u32 %v1088_v59, 16  ;;  %v1144_v30 = vrot.slane %v1130_v28, %v3151_v47 }
 0x1cc   : > { %v1115_v10 = vpack.i.b16 %v1112_v5, %v1088_v59  ;;  %v1117_v16 = vshrl.u32 %v1112_v5, 16  ;;  %v1145_v32 = vcombine.high %v1137_v29, %v2833_v7  ;;  %v1162_v37 = vrot.slane %v1154_v33, %v3151_v47 }
 0x1cd   : > { %v966_v17 = vcombine.low %v957_v6, %v965_v8  ;;  %v949_v22 = vrot.slane %v942_v9, %v3151_v47  ;;  %v1146_v34 = vcombine.high %v1144_v30, %v2833_v7  ;;  %v1176_v38 = vshrl.u32 %v1137_v29, 16 }
 0x1ce   : > { %v1269_v18 = vsel %vm1264_vm2, %v1115_v10, 0  ;;  %v1118_v19 = vpack.i.b16 %v1117_v16, %v1116_v15  ;;  %v1184_v39 = vshrl.u32 %v1145_v32, 16  ;;  %v1169_v35 = vrot.slane %v1155_v36, %v3151_v47 }
 0x1cf   : > { %2441 = vmatpush3.bf16.xpose.msra.mxu1 %v1269_v18  ;;  %v973_v20 = vrot.slane %v966_v17, %v3151_v47  ;;  %v977_v25 = vshrl.u32 %v949_v22, 16  ;;  %v1170_v40 = vcombine.high %v1162_v37, %v2833_v7  ;;  %v1177_v41 = vshrl.u32 %v1162_v37, 16 }
 0x1d0   : > { %v1315_v21 = vsel %vm1264_vm2, %v1118_v19, 0  ;;  %2452 = vmatprep.subr.bf16.mxu1 %v2831_v0  ;;  %v1192_v42 = vshrl.u32 %v1144_v30, 16  ;;  %v1174_v44 = vpack.i.b16 %v1162_v37, %v1137_v29  ;;  %v1200_v45 = vshrl.u32 %v1146_v34, 16  ;;  %v651_v19 = vld [vmem:[%s619_s23] sm:$0x1]  ;;  %s2838_s23 = smov 127  }
 0x1d1   : > { %2447 = vmatpush3.bf16.xpose.msra.mxu0 %v1315_v21  ;;  %v978_v23 = vshrl.u32 %v973_v20, 16  ;;  %v976_v24 = vpack.i.b16 %v973_v20, %v949_v22  ;;  %v1171_v46 = vcombine.high %v1169_v35, %v2833_v7  ;;  %v1182_v48 = vpack.i.b16 %v1170_v40, %v1145_v32 }
 0x1d2   : > { %2458 = vmatprep.subr.bf16.mxu0 %v2831_v0  ;;  %v1185_v49 = vshrl.u32 %v1170_v40, 16  ;;  %v1178_v50 = vpack.i.b16 %v1177_v41, %v1176_v38  ;;  %v1190_v51 = vpack.i.b16 %v1169_v35, %v1144_v30  ;;  %v1193_v54 = vshrl.u32 %v1169_v35, 16 }
 0x1d3   : > { %v979_v26 = vpack.i.b16 %v978_v23, %v977_v25  ;;  %v1198_v56 = vpack.i.b16 %v1171_v46, %v1146_v34  ;;  %v1201_v52 = vshrl.u32 %v1171_v46, 16  ;;  %v2316_v20 = vadd.f32 -1.0, %v651_v19 }
 0x1d4   : > { %v1186_v55 = vpack.i.b16 %v1185_v49, %v1184_v39  ;;  %v1194_v57 = vpack.i.b16 %v1193_v54, %v1192_v42  ;;  %v1204_v60 = vcombine.low %v1174_v44, %v1190_v51  ;;  %v2624_v49 = vld [vmem:[%s3452_s19 + $0x8] sm:$0xff]  }
 0x1d5   : > { %v1202_v61 = vpack.i.b16 %v1201_v52, %v1200_v45  ;;  %v1212_v62 = vcombine.low %v1182_v48, %v1198_v56  ;;  %v653_v21 = vmul.f32 1e+09, %v2316_v20 }
 0x1d6   : > { %2443 = vmatmul.mubr.msk.bf16.vlgmr.msra.gmra.mxu1 %vm1264_vm2, %v976_v24  ;;  %v1211_v63 = vrot.slane %v1204_v60, %v3146_v43  ;;  %v1228_v58 = vcombine.low %v1178_v50, %v1194_v57 }
 0x1d7   : > { %2454 = vmatprep.mubr.msk.bf16.mxu1 %vm2832_vm0, %v2831_v0  ;;  %v1236_v1 = vcombine.low %v1186_v55, %v1202_v61  ;;  %v1219_v3 = vrot.slane %v1212_v62, %v3146_v43  ;;  %v1262_v22 = vrot.slane %v653_v21, %v3133_v14 }
 0x1d8   : > { %2449 = vmatmul.mubr.msk.bf16.vlgmr.msra.gmra.mxu0 %vm1264_vm2, %v979_v26  ;;  %v1235_v53 = vrot.slane %v1228_v58, %v3146_v43 }
 0x1d9   : > { %2460 = vmatprep.mubr.msk.bf16.mxu0 %vm2832_vm0, %v2831_v0  ;;  %v1220_v59 = vcombine.low %v1211_v63, %v1219_v3  ;;  %v1243_v4 = vrot.slane %v1236_v1, %v3146_v43 }
 0x1db   : > { %v1227_v5 = vrot.slane %v1220_v59, %v3151_v47  ;;  %v1244_v6 = vcombine.low %v1235_v53, %v1243_v4 }
 0x1dd   : > { %v1251_v8 = vrot.slane %v1244_v6, %v3151_v47  ;;  %v1255_v9 = vshrl.u32 %v1227_v5, 16 }
 0x1df   : > { %v1254_v10 = vpack.i.b16 %v1251_v8, %v1227_v5  ;;  %v1256_v15 = vshrl.u32 %v1251_v8, 16 }
 0x1e1   : > { %v1393_v16 = vsel %vm1391_vm3, %v1254_v10, 0  ;;  %v1257_v17 = vpack.i.b16 %v1256_v15, %v1255_v9 }
 0x1e2   : > { %2453 = vmatpush3.bf16.msra.mxu1 %v1393_v16 }
 0x1e3   : > { %v1439_v18 = vsel %vm1391_vm3, %v1257_v17, 0  ;;  %2464 = vmatprep.subr.bf16.mxu1 %v2831_v0 }
 0x1e4   : > { %2459 = vmatpush3.bf16.msra.mxu0 %v1439_v18 }
 0x1e5   : > { %2472 = vmatprep.subr.bf16.mxu0 %v2831_v0 }
 0x296   : > { %v1305_v23 = vpop.f32.mrf.mxu1 }
 0x297   : > { %v1306_v24 = vadd.f32 %v1305_v23, %v1262_v22 }
 0x298   : > { %v2444_v25 = vpop.f32.mrf.mxu1  ;;  %v1351_v26 = vpop.f32.mrf.mxu0 }
 0x299   : > { %v1352_v27 = vadd.f32 %v1351_v26, %v1262_v22  ;;  %v1358_v28 = vsel %vm1357_vm4, %v1306_v24, -inf }
 0x29a   : > { %1359 = vmax.xlane.f32.xlu1 %v1358_v28  ;;  %v1308_v29 = vpop.f32.mrf.mxu1  ;;  %v2450_v30 = vpop.f32.mrf.mxu0 }
 0x29b   : > { %v1361_v33 = vsel %vm1357_vm4, %v1352_v27, -inf }
 0x29c   : > { %v2445_v31 = vpop.f32.mrf.mxu1  ;;  %v1354_v32 = vpop.f32.mrf.mxu0 }
 0x29d   : > { %v2625_v31 = vld [vmem:[%s3453_s18] sm:$0xff]  }
 0x29e   : > { %1362 = vmax.xlane.f32.xlu1 %v1361_v33  ;;  %v2451_v34 = vpop.f32.mrf.mxu0 }
 0x323   : > { %v1360_v36 = vpop.xlane.xlu1 %1359 }
 0x324   : > { %v1370_v37 = vsub.f32 %v1306_v24, %v1360_v36  ;;  %v1364_v50 = vsub.f32 -inf, %v1360_v36 }
 0x326   : > { %v1372_v38 = vmul.f32 1.442695, %v1370_v37  ;;  %v1366_v51 = vmul.f32 1.442695, %v1364_v50 }
 0x327   : > { %v1363_v39 = vpop.xlane.xlu1 %1362 }
 0x328   : > { %v1371_v35 = vsub.f32 %v1352_v27, %v1363_v39  ;;  %2640 = vpow2.f32 %v1372_v38  ;;  %v1365_v54 = vsub.f32 -inf, %v1363_v39 }
 0x32a   : > { %v1374_v40 = vmul.f32 1.442695, %v1371_v35  ;;  %v1368_v55 = vmul.f32 1.442695, %v1365_v54 }
 0x32c   : > { %2642 = vpow2.f32 %v1374_v40 }
 0x32d   : > { %2644 = vpow2.f32 %v1366_v51 }
 0x32e   : > { %2646 = vpow2.f32 %v1368_v55 }
 0x335   : > { %v2641_v41 = vpop.eup %2640 }
 0x336   : > { %v1378_v42 = vsel %vm1357_vm4, %v2641_v41, 0.0  ;;  %v1386_v44 = vpack.c.bf16 %v2641_v41, %v2641_v41 }
 0x337   : > { %1379 = vadd.xlane.f32.xlu1 %v1378_v42 }
 0x338   : > { %2455 = vmatmul.mubr.msk.bf16.vlgmr.msra.gmra.mxu1 %vm1357_vm4, %v1386_v44 }
 0x339   : > { %v2643_v45 = vpop.eup %2642  ;;  %2468 = vmatprep.mubr.msk.bf16.mxu1 %vm2832_vm0, %v2831_v0  ;;  %2465 = vmatpush3.bf16.msra.mxu1 %v2624_v49 }
 0x33a   : > { %v1381_v46 = vsel %vm1357_vm4, %v2643_v45, 0.0  ;;  %v1387_v48 = vpack.c.bf16 %v2643_v45, %v2643_v45  ;;  %2466 = vmatprep.subr.bf16.mxu1 %v2831_v0  ;;  %v2645_v56 = vpop.eup %2644 }
 0x33b   : > { %1382 = vadd.xlane.f32.xlu0 %v1381_v46  ;;  %v1376_v57 = vmul.f32 0.0, %v2645_v56  ;;  %v2647_v60 = vpop.eup %2646 }
 0x33c   : > { %2461 = vmatmul.mubr.msk.bf16.vlgmr.msra.gmra.mxu0 %vm1357_vm4, %v1387_v48  ;;  %v1377_v63 = vmul.f32 0.0, %v2647_v60 }
 0x33d   : > { %2476 = vmatprep.mubr.msk.bf16.mxu0 %vm2832_vm0, %v2831_v0  ;;  %2467 = vmatpush3.bf16.msra.mxu1 %v2625_v31  ;;  %v2639_v31 = vld [vmem:[%s3407_s12 + $0x20] sm:$0xff]  }
 0x33e   : > { %2480 = vmatprep.subr.bf16.mxu1 %v2831_v0 }
 0x3c0   : > { %v1380_v52 = vpop.xlane.xlu1 %1379 }
 0x3c1   : > { %v1384_v61 = vadd.f32 %v1380_v52, %v1376_v57 }
 0x3c3   : > { %2648 = vrcp.f32 %v1384_v61 }
 0x3c4   : > { %v1383_v62 = vpop.xlane.xlu0 %1382 }
 0x3c5   : > { %v1385_v58 = vadd.f32 %v1383_v62, %v1377_v63 }
 0x3c7   : > { %2650 = vrcp.f32 %v1385_v58 }
 0x3d0   : > { %v2649_v53 = vpop.eup %2648 }
 0x3d4   : > { %v2651_v9 = vpop.eup %2650 }
 0x3f8   : > { %v1429_v1 = vpop.f32.mrf.mxu1 }
 0x3f9   : > { %v1481_v3 = vadd.f32 %v1429_v1, %v1376_v57 }
 0x3fa   : > { %v2456_v59 = vpop.f32.mrf.mxu1 }
 0x3fb   : > { %v1485_v4 = vmul.f32 %v2649_v53, %v1481_v3  ;;  %v2626_v59 = vld [vmem:[%s3403_s8 + $0x8] sm:$0xff]  }
 0x3fc   : > { %v1432_v5 = vpop.f32.mrf.mxu1  ;;  %v1475_v6 = vpop.f32.mrf.mxu0  ;;  %2473 = vmatpush3.bf16.msra.mxu0 %v2626_v59 }
 0x3fd   : > { %v1482_v8 = vadd.f32 %v1475_v6, %v1377_v63  ;;  %v1487_v16 = vcombine.high %v1485_v4, %v2831_v0  ;;  %v1494_v19 = vrot.slane %v1485_v4, %v3146_v43  ;;  %v2627_v4 = vld [vmem:[#allocation7 + $0x8] sm:$0xff]   ;;  %v2629_v5 = vld [vmem:[#allocation7] sm:$0xff]   ;;  %2474 = vmatprep.subr.bf16.mxu0 %v2831_v0 }
 0x3fe   : > { %v2457_v10 = vpop.f32.mrf.mxu1  ;;  %v2462_v15 = vpop.f32.mrf.mxu0 }
 0x3ff   : > { %v1486_v17 = vmul.f32 %v2651_v9, %v1482_v8  ;;  %v1501_v23 = vrot.slane %v1487_v16, %v3146_v43  ;;  %v1689_v10 = vsub.s32 4, %v3124_v11  ;;  %v1694_v15 = vsub.s32 5, %v3124_v11 }
 0x400   : > { %v1478_v18 = vpop.f32.mrf.mxu0 }
 0x401   : > { %v1502_v20 = vcombine.high %v1486_v17, %v2831_v0  ;;  %v1509_v21 = vrot.slane %v1486_v17, %v3146_v43  ;;  %v1690_v16 = vrot.slane %v3130_v13, %v1689_v10 }
 0x402   : > { %v2463_v22 = vpop.f32.mrf.mxu0 }
 0x403   : > { %v1516_v24 = vrot.slane %v1502_v20, %v3146_v43  ;;  %v1517_v25 = vcombine.low %v1494_v19, %v1509_v21  ;;  %v1518_v26 = vcombine.high %v1494_v19, %v1509_v21  ;;  %v1695_v19 = vrot.slane %v3130_v13, %v1694_v15  ;;  %v2630_v22 = vld [vmem:[#allocation7 + $0x18] sm:$0xff]  }
 0x405   : > { %v1525_v27 = vrot.slane %v1517_v25, %v3151_v47  ;;  %v1532_v28 = vrot.slane %v1518_v26, %v3151_v47  ;;  %v1533_v29 = vcombine.low %v1501_v23, %v1516_v24  ;;  %v1534_v30 = vcombine.high %v1501_v23, %v1516_v24  ;;  %v2631_v24 = vld [vmem:[#allocation7 + $0x10] sm:$0xff]   ;;  %v2634_v26 = vld [vmem:[%s3407_s12 + $0x8] sm:$0xff]  }
 0x406   : > { %v2633_v25 = vld [vmem:[%s3407_s12 + $0x10] sm:$0xff]  }
 0x407   : > { %v1541_v32 = vrot.slane %v1533_v29, %v3151_v47  ;;  %v1548_v33 = vrot.slane %v1534_v30, %v3151_v47  ;;  %v1553_v34 = vcombine.low %v1525_v27, %v1532_v28  ;;  %v2330_v36 = vcombine.high %v1525_v27, %v1532_v28  ;;  %v2635_v27 = vld [vmem:[%s3407_s12 + $0x38] sm:$0xff]   ;;  %v2636_v28 = vld [vmem:[%s3407_s12] sm:$0xff]   ;;  %v2637_v29 = vld [vmem:[%s3407_s12 + $0x30] sm:$0xff]  }
 0x408   : > { %v2638_v30 = vld [vmem:[%s3407_s12 + $0x28] sm:$0xff]  }
 0x409   : > { %v1560_v37 = vrot.slane %v1553_v34, %v3146_v43  ;;  %v1568_v38 = vrot.slane %v2330_v36, %v3146_v43  ;;  %v1569_v39 = vcombine.low %v1541_v32, %v1548_v33  ;;  %v2331_v35 = vcombine.high %v1541_v32, %v1548_v33  ;;  %v2335_v32 = vld [vmem:[%s3454_s24] ss:$0 sm:$0xff]  ;;  %s3458_s24 = sld [smem:[#allocation26_spill]] }
 0x40a   : > { %v2339_v33 = vld [vmem:[%s3455_s16] ss:$0 sm:$0xff] }
 0x40b   : > { %v1576_v40 = vrot.slane %v1569_v39, %v3146_v43  ;;  %v1584_v41 = vrot.slane %v2331_v35, %v3146_v43  ;;  %v1585_v42 = vcombine.low %v1560_v37, %v1568_v38  ;;  %v1615_v43 = vsub.s32 3, %v3124_v11 }
 0x40d   : > { %v1593_v44 = vcombine.low %v1576_v40, %v1584_v41  ;;  %v1592_v45 = vrot.slane %v1585_v42, %v3151_v47  ;;  %v1616_v55 = vrot.slane %v3130_v13, %v1615_v43  ;;  %v2632_v13 = vld [vmem:[%s3407_s12 + $0x18] sm:$0xff]  }
 0x40f   : > { %v1600_v46 = vrot.slane %v1593_v44, %v3151_v47 }
 0x411   : > { %v1602_v48 = vcombine.high %v1592_v45, %v1600_v46  ;;  %v1601_v49 = vcombine.low %v1592_v45, %v1600_v46 }
 0x413   : > { %1604 = vrot.lane.b32.xlu1 %v1602_v48, %s2837_s30  ;;  %v2350_v48 = vld [vmem:[%s3455_s16 + $0x1] ss:$0 sm:$0xff]  ;;  %s3456_s30 = sld [smem:[#allocation25_spill]] }
 0x485   : > { %v1605_v50 = vpop.permute.xlu1 %1604 }
 0x486   : > { %v1607_v51 = vsel %vm1264_vm2, %v1601_v49, %v1605_v50 }
 0x487   : > { %v1608_v54 = vpack.c.bf16 %v1607_v51, %v1607_v51 }
 0x489   : > { %2469 = vmatmul.mubr.msk.bf16.vlgmr.msra.gmra.mxu1 %vm676_vm1, %v1608_v54 }
 0x48a   : > { %2484 = vmatprep.mubr.msk.bf16.mxu1 %vm2832_vm0, %v2831_v0  ;;  %2481 = vmatpush3.bf16.msra.mxu1 %v2627_v4 }
 0x48b   : > { %2482 = vmatprep.subr.bf16.mxu1 %v2831_v0 }
 0x48e   : > { %2483 = vmatpush3.bf16.msra.mxu1 %v2629_v5 }
 0x48f   : > { %2500 = vmatprep.subr.bf16.mxu1 %v2831_v0 }
 0x549   : > { %v1666_v56 = vpop.f32.mrf.mxu1 }
 0x54a   : > { %v1667_v52 = vadd.f32 %v1666_v56, %v1616_v55 }
 0x54b   : > { %v2470_v47 = vpop.f32.mrf.mxu1 }
 0x54c   : > { %v1672_v57 = vadd.f32 %v1667_v52, %v3098_v2  ;;  %v2628_v2 = vld [vmem:[%s3403_s8] sm:$0xff]  }
 0x54d   : > { %v1669_v60 = vpop.f32.mrf.mxu1  ;;  %2475 = vmatpush3.bf16.msra.mxu0 %v2628_v2 }
 0x54e   : > { %v1673_v61 = vsel %vm676_vm1, %v1672_v57, 0.0  ;;  %2488 = vmatprep.subr.bf16.mxu0 %v2831_v0 }
 0x54f   : > { %1674 = vadd.xlane.f32.xlu1 %v1673_v61  ;;  %v2471_v62 = vpop.f32.mrf.mxu1 }
 0x5d8   : > { %v1675_v63 = vpop.xlane.xlu1 %1674 }
 0x5d9   : > { %v1677_v58 = vmul.f32 0.03125, %v1675_v63 }
 0x5db   : > { %v1678_v1 = vsub.f32 %v1672_v57, %v1677_v58 }
 0x5dd   : > { %v1679_v3 = vmul.f32 %v1678_v1, %v1678_v1 }
 0x5df   : > { %v1680_v53 = vsel %vm676_vm1, %v1679_v3, 0.0 }
 0x5e0   : > { %1681 = vadd.xlane.f32.xlu0 %v1680_v53 }
 0x669   : > { %v1682_v6 = vpop.xlane.xlu0 %1681 }
 0x66a   : > { %v1683_v8 = vmul.f32 0.03125, %v1682_v6 }
 0x66c   : > { %v1684_v9 = vadd.f32 1e-12, %v1683_v8 }
 0x66e   : > { %2652 = vrsqrt.f32 %v1684_v9 }
 0x67b   : > { %v2653_v17 = vpop.eup %2652 }
 0x67c   : > { %v1686_v18 = vmul.f32 %v2653_v17, %v1678_v1 }
 0x67e   : > { %v1691_v20 = vmul.f32 %v1690_v16, %v1686_v18 }
 0x680   : > { %v3278_v21 = vadd.f32 %v1695_v19, %v1691_v20 }
 0x682   : > { %v1697_v23 = vpack.c.bf16 %v3278_v21, %v3278_v21 }
 0x684   : > { %2477 = vmatmul.mubr.msk.bf16.vlgmr.msra.gmra.mxu0 %vm676_vm1, %v1697_v23  ;;  %2485 = vmatmul.mubr.msk.bf16.vlgmr.msra.gmra.mxu1 %vm676_vm1, %v1697_v23 }
 0x685   : > { %2501 = vmatpush3.bf16.msra.mxu1 %v2630_v22  ;;  %2504 = vmatprep.mubr.msk.bf16.mxu1 %vm2832_vm0, %v2831_v0 }
 0x686   : > { %2502 = vmatprep.subr.bf16.mxu1 %v2831_v0  ;;  %2496 = vmatprep.mubr.msk.bf16.mxu0 %vm2832_vm0, %v2831_v0 }
 0x687   : > { %2489 = vmatpush3.bf16.msra.mxu0 %v2632_v13 }
 0x688   : > { %2490 = vmatprep.subr.bf16.mxu0 %v2831_v0 }
 0x689   : > { %2503 = vmatpush3.bf16.msra.mxu1 %v2631_v24 }
 0x68a   : > { %2508 = vmatprep.subr.bf16.mxu1 %v2831_v0 }
 0x68b   : > { %2491 = vmatpush3.bf16.msra.mxu0 %v2633_v25 }
 0x68c   : > { %2505 = vmatmul.mubr.msk.bf16.vlgmr.msra.gmra.mxu1 %vm676_vm1, %v1697_v23  ;;  %2492 = vmatprep.subr.bf16.mxu0 %v2831_v0 }
 0x68d   : > { %2516 = vmatprep.mubr.msk.bf16.mxu1 %vm2832_vm0, %v2831_v0  ;;  %2509 = vmatpush3.bf16.msra.mxu1 %v2635_v27 }
 0x68e   : > { %2510 = vmatprep.subr.bf16.mxu1 %v2831_v0 }
 0x68f   : > { %2493 = vmatpush3.bf16.msra.mxu0 %v2634_v26 }
 0x690   : > { %2494 = vmatprep.subr.bf16.mxu0 %v2831_v0 }
 0x691   : > { %2511 = vmatpush3.bf16.msra.mxu1 %v2637_v29 }
 0x692   : > { %2512 = vmatprep.subr.bf16.mxu1 %v2831_v0 }
 0x693   : > { %2495 = vmatpush3.bf16.msra.mxu0 %v2636_v28 }
 0x695   : > { %2513 = vmatpush3.bf16.msra.mxu1 %v2638_v30 }
 0x696   : > { %2514 = vmatprep.subr.bf16.mxu1 %v2831_v0 }
 0x699   : > { %2515 = vmatpush3.bf16.msra.mxu1 %v2639_v31  ;;  %v2343_v31 = vld [vmem:[%s3456_s30] ss:$0 sm:$0xff] }
 0x744   : > { %v1758_v34 = vpop.f32.mrf.mxu0  ;;  %v1839_v36 = vpop.f32.mrf.mxu1 }
 0x745   : > { %v1759_v37 = vadd.f32 %v2335_v32, %v1758_v34  ;;  %v1840_v38 = vadd.f32 %v2339_v33, %v1839_v36  ;;  %v2363_v32 = vld [vmem:[%s3456_s30 + $0x1] ss:$0 sm:$0xff] }
 0x746   : > { %v2478_v39 = vpop.f32.mrf.mxu0  ;;  %v2486_v0 = vpop.f32.mrf.mxu1 }
 0x747   : > { %v1845_v35 = vmul.f32 %v1840_v38, %v1840_v38  ;;  %v1765_v40 = vsel %vm1764_vm5, %v1759_v37, -inf }
 0x748   : > { %v1842_v41 = vpop.f32.mrf.mxu1  ;;  %1766 = vmax.xlane.f32.xlu0 %v1765_v40  ;;  %v1761_v42 = vpop.f32.mrf.mxu0 }
 0x749   : > { %v1846_v44 = vmul.f32 %v1845_v35, %v1840_v38 }
 0x74a   : > { %v2479_v45 = vpop.f32.mrf.mxu0  ;;  %v2487_v46 = vpop.f32.mrf.mxu1 }
 0x74b   : > { %v1847_v49 = vmul.f32 0.044715, %v1846_v44 }
 0x74c   : > { %v1997_v50 = vpop.f32.mrf.mxu1 }
 0x74d   : > { %v1848_v51 = vadd.f32 %v1847_v49, %v1840_v38  ;;  %v1998_v54 = vadd.f32 %v2350_v48, %v1997_v50 }
 0x74e   : > { %v2506_v43 = vpop.f32.mrf.mxu1 }
 0x74f   : > { %v1849_v55 = vmul.f32 0.7978846, %v1848_v51  ;;  %v2003_v56 = vmul.f32 %v1998_v54, %v1998_v54 }
 0x750   : > { %v2000_v52 = vpop.f32.mrf.mxu1 }
 0x751   : > { %2654 = vtanh.f32 %v1849_v55  ;;  %v2004_v47 = vmul.f32 %v2003_v56, %v1998_v54 }
 0x752   : > { %v2507_v57 = vpop.f32.mrf.mxu1 }
 0x753   : > { %v2005_v60 = vmul.f32 0.044715, %v2004_v47 }
 0x755   : > { %v2006_v61 = vadd.f32 %v2005_v60, %v1998_v54 }
 0x757   : > { %v2007_v62 = vmul.f32 0.7978846, %v2006_v61 }
 0x759   : > { %2656 = vtanh.f32 %v2007_v62 }
 0x75e   : > { %v2655_v63 = vpop.eup %2654 }
 0x75f   : > { %v1851_v58 = vadd.f32 1.0, %v2655_v63 }
 0x761   : > { %v1852_v1 = vmul.f32 0.5, %v1851_v58 }
 0x763   : > { %v1853_v3 = vmul.f32 %v1852_v1, %v1840_v38 }
 0x765   : > { %v1854_v53 = vpack.c.bf16 %v1853_v3, %v1853_v3 }
 0x766   : > { %v2657_v59 = vpop.eup %2656 }
 0x767   : > { %v2009_v4 = vadd.f32 1.0, %v2657_v59  ;;  %2497 = vmatmul.mubr.msk.bf16.vlgmr.msra.gmra.mxu0 %vm1894_vm6, %v1854_v53 }
 0x769   : > { %v2010_v2 = vmul.f32 0.5, %v2009_v4 }
 0x76b   : > { %v2011_v5 = vmul.f32 %v2010_v2, %v1998_v54 }
 0x76d   : > { %v2012_v6 = vpack.c.bf16 %v2011_v5, %v2011_v5 }
 0x76f   : > { %2517 = vmatmul.mubr.msk.bf16.vlgmr.msra.gmra.mxu1 %vm1894_vm6, %v2012_v6 }
 0x7d1   : > { %v1767_v8 = vpop.xlane.xlu0 %1766 }
 0x7d2   : > { %v1768_v9 = vsub.f32 %v1759_v37, %v1767_v8 }
 0x7d4   : > { %v1769_v10 = vmul.f32 1.442695, %v1768_v9 }
 0x7d6   : > { %2658 = vpow2.f32 %v1769_v10 }
 0x7e3   : > { %v2659_v15 = vpop.eup %2658 }
 0x7e4   : > { %v1771_v16 = vsel %vm1764_vm5, %v2659_v15, 0.0 }
 0x7e5   : > { %1772 = vadd.xlane.f32.xlu0 %v1771_v16 }
 0x827   : > { %v1932_v17 = vpop.f32.mrf.mxu0 }
 0x828   : > { %v1933_v33 = vadd.f32 %v2343_v31, %v1932_v17 }
 0x829   : > { %v2498_v18 = vpop.f32.mrf.mxu0 }
 0x82b   : > { %v1935_v19 = vpop.f32.mrf.mxu0 }
 0x82d   : > { %v2499_v20 = vpop.f32.mrf.mxu0 }
 0x82f   : > { %v2091_v22 = vpop.f32.mrf.mxu1 }
 0x830   : > { %v2092_v34 = vadd.f32 %v2363_v32, %v2091_v22 }
 0x831   : > { %v2518_v23 = vpop.f32.mrf.mxu1 }
 0x833   : > { %v2094_v24 = vpop.f32.mrf.mxu1 }
 0x835   : > { %v2519_v13 = vpop.f32.mrf.mxu1 }
 0x86e   : > { %v1773_v25 = vpop.xlane.xlu0 %1772 }
 0x86f   : > { %2660 = vrcp.f32 %v1773_v25 }
 0x87c   : > { %v2661_v26 = vpop.eup %2660 }
 0x87d   : > { %v1775_v27 = vmul.f32 %v2661_v26, %v2659_v15 }
 0x87f   : > { %1777 = vrot.lane.b32.xlu0 %v1775_v27, %s2838_s23  ;;  %s2148_s23 = sshll.u32 %s612_s0, 4  ;;  %s2149_s23 = int_to_ptr.vmem [resolvable:$true] %s2148_s23 }
 0x880   : > { %s2730_s21 = scalar_lea.vmem %s2149_s23, 128 }
 0x881   : > { %p2731_p4 = scmp.ne.s32.totalorder %s2149_s23, %s2730_s21 }
 0x883   : > { %p2732_p10 = pnand %p2731_p4, %p3461_p9 }
 0x885   : > { %p2733_p7 = pneg %p2732_p10 }
 0x8f1   : > { %v1778_v28 = vpop.permute.xlu0 %1777 }
 0x8f2   : > { %vm1780_vm7 = vcmp.ge.f32.partialorder %v1775_v27, %v1778_v28 }
 0x8f3   : > { %v2097_v29 = vsel %vm1780_vm7, 1, %v2833_v7  ;;  %v1781_v30 = vsel %vm1780_vm7, %v1775_v27, %v1778_v28 }
 0x8f4   : > { %2099 = vperm.xlu1 %2616, %v2097_v29   ;;  %2105 = vperm.xlu0 %2617, %v1781_v30  }
 0x96f   : > { %v2100_v36 = vpop.permute.xlu1 %2099  ;;  %v2106_v37 = vpop.permute.xlu0 %2105 }
 0x970   : > { %vm2101_vm8 = vcmp.eq.s32.totalorder %v2100_v36, 1 }
 0x971   : > { %v2102_v38 = vsel %vm2101_vm8, %v1933_v33, %v2092_v34 }
 0x972   : > { %v2108_v39 = vmul.f32 %v2106_v37, %v2102_v38 }
 0x974   : > { %v2109_v7 = vadd.f32 %v2108_v39, %v3278_v21  ;;  %v655_v21 = vld [vmem:[%s3458_s24] sm:$0x3]  ;;  %s2734_s24 = sshll.u32 %s2839_s15, 4  ;;  %s2735_s24 = int_to_ptr.vmem [resolvable:$false] %s2734_s24 }
 0x975   : > { %v2126_v49 = vrot.slane %v655_v21, %v3133_v14  ;;  %v2131_v51 = vrot.slane %v655_v21, %v726_v12  ;;  %s2736_s29 = scalar_lea.vmem %s2735_s24, 256  ;;  %p2737_p13 = scmp.lt.s32.totalorder %s2149_s23, %s2735_s24 }
 0x976   : > { %v2110_v0 = vsel %vm676_vm1, %v2109_v7, 0.0  ;;  %p2738_p5 = scmp.lt.s32.totalorder %s2736_s29, %s2730_s21 }
 0x977   : > { %2111 = vadd.xlane.f32.xlu1 %v2110_v0 }
 0x978   : > { %p2739_p6 = por %p2738_p5, %p2737_p13 }
 0x97a   : > { %p2740_p8 = pnand %p2739_p6, %p2733_p7 }
 0xa00   : > { %v2112_v35 = vpop.xlane.xlu1 %2111 }
 0xa01   : > { %v2113_v40 = vmul.f32 0.03125, %v2112_v35 }
 0xa03   : > { %v2114_v41 = vsub.f32 %v2109_v7, %v2113_v40 }
 0xa05   : > { %v2115_v42 = vmul.f32 %v2114_v41, %v2114_v41 }
 0xa07   : > { %v2116_v44 = vsel %vm676_vm1, %v2115_v42, 0.0 }
 0xa08   : > { %2117 = vadd.xlane.f32.xlu0 %v2116_v44 }
 0xa91   : > { %v2118_v45 = vpop.xlane.xlu0 %2117 }
 0xa92   : > { %v2119_v46 = vmul.f32 0.03125, %v2118_v45 }
 0xa94   : > { %v2120_v48 = vadd.f32 1e-12, %v2119_v46 }
 0xa96   : > { %2662 = vrsqrt.f32 %v2120_v48 }
 0xaa3   : > { %v2663_v50 = vpop.eup %2662 }
 0xaa4   : > { %v2122_v54 = vmul.f32 %v2663_v50, %v2114_v41 }
 0xaa6   : > { %v2127_v43 = vmul.f32 %v2126_v49, %v2122_v54 }
 0xaa8   : > { %v2132_v55 = vadd.f32 %v2131_v51, %v2127_v43 }
 0xaaa   : > { %2133 = vst.msk [vmem:[%s612_s0] sm:$0xff] %vm676_vm1, %v2132_v55 }
 0xaab   : > { %2743 = shalt.err (!%p2740_p8)
}
 0xaac   : > { %s2744_s20 = scalar_lea.hbm %s2146_s25, 128  ;;  %s2748_s0 = scalar_lea.hbm %s3460_s9, 256 }
 0xaad   : > { %p2745_p3 = scmp.ne.s32.totalorder %s2146_s25, %s2744_s20  ;;  %p2749_p1 = scmp.lt.s32.totalorder %s2146_s25, %s3460_s9 }
 0xaae   : > { %p2750_p0 = scmp.lt.s32.totalorder %s2748_s0, %s2744_s20 }
 0xaaf   : > { %p2746_p11 = pnand %p2745_p3, %p3461_p9 }
 0xab0   : > { %p2751_p2 = por %p2750_p0, %p2749_p1 }
 0xab1   : > { %p2747_p12 = pneg %p2746_p11 }
 0xab3   : > { %p2752_p4 = pnand %p2751_p2, %p2747_p12 }
 0xab5   : > { %2755 = shalt.err (!%p2752_p4)
}
 0xab6   : > { %2528 = dma.vmem_to_hbm [thread:$0]  (%p3461_p9), %s2149_s23, 128, %s2146_s25, %s2135_s17  }
 0xab7 PF: > { %s3462_s21 = sld [smem:[#allocation16_spill]]  ;;  %p3465_p7 = scmp.ge.s32.totalorder %s2824_s28, 2 }
 0xab8   : > { %s3463_s15 = sld [smem:[#allocation22_spill]] }
 0xabd   : > { %s2160_s24 = sand.u32 1, %s3462_s21  }
 0xabe   : > { %p3464_p10 = scmp.ne.s32.totalorder %s3463_s15, 0  ;;  %s2161_s29 = scalar_lea.sflag [#allocation6], %s2160_s24 }
 0xac0   : > { %p2541_p13 = pnand %p3465_p7, %p3464_p10 }
 0xac2   : > { %p2542_p5 = pneg %p2541_p13 }
 0xac4   : > { %2795 = dma.done.wait (%p2542_p5), %s2161_s29, 128  }
 0xac5   : > { %2797 = vsyncadd (%p2542_p5), %s2161_s29, 4294967168  ;;  %s3466_s28 = sld [smem:[#allocation19_spill]]  ;;  %s3470_s25 = smov %s2816_s26 }
 0xac6   : > { %s3467_s23 = sld [smem:[#allocation17_spill]]  ;;  %s3471_s26 = smov %s2820_s27 }
 0xac7   : > { %s3468_s0 = sld [smem:[#allocation18_spill]]  ;;  %s3472_s27 = smov %s3024_s11 }
 0xac8   : > { %s3469_s24 = sld [smem:[#allocation20_spill]] }
 0xacb   : > { %p35_p9 = scmp.ge.s32.totalorder %s3466_s28, 4  }
 0xacd   :  { %37 = sbr.rel (!%p35_p9) target bundleno = 25 (0x19), region = 147 }
 0xad2   :  { %2166 = vsyncpa [#allocation5], 1 }
 0xad3   :  { %2168 = vsyncpa [#allocation5 + $0x1], 1 }
 0xad4   :  { %2169 = vsyncpa [#allocation8], 1 }
 0xad5   :  { %2170 = vsyncpa [#allocation6], 1 }
 0xad6   :  { %2172 = vsyncpa [#allocation6 + $0x1], 1 }

</bundles_post_ra>
